<compile_context>
chip_gen: v7x
topology: tpu7x:2x2x1
jax: 0.10.0
libtpu: 0.0.40
codegen_flags: <defaults>
</compile_context>

<pallas_src>
import functools
import math

import jax
import jax.numpy as jnp
from jax.experimental import pallas as pl
from jax.experimental.pallas import tpu as pltpu


# ----------------------------------------------------------------------------- helpers
def _round_up(x, m):
    return ((x + m - 1) // m) * m


def _pad_to(a, shape):
    return jnp.pad(a, [(0, t - s) for s, t in zip(a.shape, shape)])


def _sigmoid(z):
    # One EUP op (tanh) instead of exp + divide: sigmoid(z) = 0.5 * (tanh(z/2) + 1).
    return 0.5 * (jnp.tanh(0.5 * z) + 1.0)


if hasattr(pltpu, "einshape"):
    def _to_time_major(a):                    # (B, S, D) -> (S, B, D); lane dim intact
        return pltpu.einshape("bsd->sbd", a)
else:                                         # fallback for older pallas builds
    def _to_time_major(a):
        return jnp.transpose(a, (1, 0, 2))


def _default_vmem_limit_bytes():
    """~3/4 of physical VMEM (v5e/v6e 128 MiB -> 96 MiB, v7x 64 MiB -> 48 MiB);
    conservative 48 MiB fallback if the hardware query is unavailable."""
    try:
        cap = int(pltpu.get_tpu_info().vmem_capacity_bytes)
    except Exception:
        cap = 64 << 20
    return max(32 << 20, (cap * 3) // 4)


# ----------------------------------------------------------------------------- kernel
def _fused_attn_lstm_kernel(x_ref, wqkv_ref, bqkv_ref, wa_ref, ba_ref,
                            w_ih_ref, w_hh_ref, b_lstm_ref, w_fc_ref, b_fc_ref,
                            o_ref, pregate_ref, *, scale, unroll):
    f32 = jnp.float32
    cdt = wqkv_ref.dtype                       # matmul-operand dtype (f32 or bf16)
    TB, S, Dp = x_ref.shape
    Qp = wa_ref.shape[0]
    Hp = w_hh_ref.shape[0]

    # ---------------- attention over the whole batch tile -----------------------------
    x32 = x_ref[...].astype(f32)               # residual adds kept in f32
    x2d = x32.reshape(TB * S, Dp)
    xf = x2d.astype(cdt)

    # fused Q/K/V: one matmul with N = 3*Qp; bias-add in f32, then a single cast.
    qkv = (jnp.dot(xf, wqkv_ref[...], preferred_element_type=f32)
           + bqkv_ref[...]).astype(cdt)        # (TB*S, 3*Qp)
    q3 = qkv[:, 0 * Qp:1 * Qp].reshape(TB, S, Qp)
    k3 = qkv[:, 1 * Qp:2 * Qp].reshape(TB, S, Qp)
    v3 = qkv[:, 2 * Qp:3 * Qp].reshape(TB, S, Qp)

    logits = jnp.einsum("bsq,btq->bst", q3, k3,
                        preferred_element_type=f32) * (1.0 / scale)
    m = jnp.max(logits, axis=-1, keepdims=True)
    e = jnp.exp(logits - m)
    p = (e * pl.reciprocal(jnp.sum(e, axis=-1, keepdims=True), approx=True)).astype(cdt)
    ctx = jnp.einsum("bst,btq->bsq", p, v3, preferred_element_type=f32)

    scaled2d = ctx.reshape(TB * S, Dp) + x2d                        # residual 1
    a2d = jnp.dot(scaled2d.astype(cdt), wa_ref[...], preferred_element_type=f32)
    lstm_in = (a2d + ba_ref[...] + x2d).reshape(TB, S, Dp)          # residual 2

    # ---------------- bulk input projection (hoisted off the sequential path) ---------
    # (TB, S, Dp) -> (S, TB, Dp) in VMEM, then one big matmul for all timesteps.
    x_tm = _to_time_major(lstm_in.astype(cdt))                      # (S, TB, Dp)
    pre = (jnp.dot(x_tm.reshape(S * TB, Dp), w_ih_ref[...],
                   preferred_element_type=f32) + b_lstm_ref[...])   # (S*TB, 4*Hp) f32
    pregate_ref[...] = pre.reshape(S, TB, 4 * Hp)

    # ---------------- sequential LSTM recurrence (only h @ w_hh per step) -------------
    def step(t, carry):
        h, c = carry                                                # f32 carries
        gates = pregate_ref[t] + jnp.dot(h.astype(cdt), w_hh_ref[...],
                                         preferred_element_type=f32)
        i_g = _sigmoid(gates[:, 0 * Hp:1 * Hp])
        f_g = _sigmoid(gates[:, 1 * Hp:2 * Hp])
        g_g = jnp.tanh(gates[:, 2 * Hp:3 * Hp])
        o_g = _sigmoid(gates[:, 3 * Hp:4 * Hp])
        c_new = f_g * c + i_g * g_g
        h_new = o_g * jnp.tanh(c_new)
        return h_new, c_new

    h0 = jnp.zeros((TB, Hp), f32)
    c0 = jnp.zeros((TB, Hp), f32)
    h, _ = jax.lax.fori_loop(0, S, step, (h0, c0), unroll=unroll)

    # ---------------- last-step FC, lane-dense (128-padded) output --------------------
    y = jnp.dot(h.astype(cdt), w_fc_ref[...], preferred_element_type=f32) + b_fc_ref[...]
    o_ref[...] = y.astype(o_ref.dtype)


# ----------------------------------------------------------------------------- wrapper
def attentional_lstm_forward(x, params, *, block_batch=64,
                             compute_dtype=jnp.bfloat16):
    """x: (batch, seq, input_size) -> (batch, output_size).

    Single-layer, unidirectional LSTM (matches AttentionalLSTM defaults).
    Requires input_size == qkv (the module's residual add implies it) and seq % 8 == 0.
    """
    B, S, D = x.shape
    qkv = params["wq"].shape[0]
    H = params["w_hh"].shape[1]
    O = params["w_fc"].shape[0]
    assert D == qkv, "residual `scores@V + x` requires input_size == qkv"
    assert S % 8 == 0, "seq_len must be a multiple of 8 (sublane tiling)"

    LANE = 128
    f32 = jnp.float32
    cdt = compute_dtype
    esz = jnp.dtype(cdt).itemsize
    Dp = _round_up(D, LANE)
    Qp = _round_up(qkv, LANE)        # == Dp since D == qkv
    Hp = _round_up(H, LANE)
    Op = _round_up(O, LANE)
    scale = math.sqrt(qkv)
    unroll = bool(S <= 64)           # fully unroll the recurrence for short windows

    vmem_lim = _default_vmem_limit_bytes()

    # -------- batch-tile sizing: fit VMEM, then prefer >= 2 tiles for v7x megacore ----
    def tile_bytes(tb):              # rough per-tile footprint: activations + weights
        act = tb * S * (2 * Dp * esz                 # x tile (double-buffered, cdt)
                        + 4 * (5 * Dp + 4 * Qp)      # f32/cdt attention temporaries
                        + 8 * S                      # logits + exp (f32)
                        + 4 * 4 * Hp)                # time-major pre-gate scratch
        wts = 2 * esz * (Dp * 3 * Qp + Qp * Dp + Dp * 4 * Hp + Hp * 4 * Hp + Hp * Op)
        return act + wts

    TB = _round_up(max(8, min(block_batch, _round_up(B, 8))), 8)
    while TB > 8 and tile_bytes(TB) > (vmem_lim * 3) // 5:
        TB = max(8, _round_up(TB // 2, 8))
    B8 = _round_up(B, 8)
    if B8 >= 16 and -(-B8 // TB) < 2:                # ensure >= 2 "parallel" batch tiles
        TB = _round_up(-(-B8 // 2), 8)
    Bp = _round_up(B, TB)
    grid_b = Bp // TB

    # -------- pad / transpose weights once in XLA (zero padding is exact) -------------
    def lin_wb(w, b, in_p, out_p):   # torch Linear stores (out, in) -> (in_p, out_p)
        wp = _pad_to(w.T.astype(f32), (in_p, out_p)).astype(cdt)
        bp = _pad_to(b.astype(f32).reshape(1, -1), (1, out_p))      # bias stays f32
        return wp, bp

    wq, bq = lin_wb(params["wq"], params["bq"], Dp, Qp)
    wk, bk = lin_wb(params["wk"], params["bk"], Dp, Qp)
    wv, bv = lin_wb(params["wv"], params["bv"], Dp, Qp)
    wqkv = jnp.concatenate([wq, wk, wv], axis=1)                    # (Dp, 3*Qp)
    bqkv = jnp.concatenate([bq, bk, bv], axis=1)                    # (1, 3*Qp) f32
    wa, ba = lin_wb(params["wa"], params["ba"], Qp, Dp)
    wfc, bfc = lin_wb(params["w_fc"], params["b_fc"], Hp, Op)

    def pad_gate_w(w, in_p):         # (4H, in) -> (in_p, 4Hp), gate-blocked (i,f,g,o)
        blocks = [_pad_to(w[g * H:(g + 1) * H, :].T.astype(f32), (in_p, Hp))
                  for g in range(4)]
        return jnp.concatenate(blocks, axis=1).astype(cdt)

    w_ih = pad_gate_w(params["w_ih"], Dp)                           # (Dp, 4Hp)
    w_hh = pad_gate_w(params["w_hh"], Hp)                           # (Hp, 4Hp)
    b_sum = (params["b_ih"] + params["b_hh"]).astype(f32)
    b_lstm = jnp.concatenate(
        [_pad_to(b_sum[g * H:(g + 1) * H].reshape(1, -1), (1, Hp)) for g in range(4)],
        axis=1)                                                     # (1, 4Hp) f32

    xp = _pad_to(x.astype(f32), (Bp, S, Dp)).astype(cdt)            # (Bp, S, Dp)

    # -------- cost estimate hints ------------------------------------------------------
    flops = int(2 * Bp * S * Dp * 3 * Qp          # fused QKV
                + 4 * Bp * S * S * Qp             # logits + context
                + 2 * Bp * S * Qp * Dp            # attn projection
                + 2 * Bp * S * Dp * 4 * Hp        # bulk input pre-gates
                + 2 * Bp * S * Hp * 4 * Hp        # recurrent matmul
                + 2 * Bp * Hp * Op)               # final FC
    transc = int(Bp * S * S + Bp * S + 5 * Bp * S * Hp)
    bytes_acc = int(xp.size * esz + Bp * Op * 4
                    + sum(int(a.size) * a.dtype.itemsize for a in
                          (wqkv, bqkv, wa, ba, w_ih, w_hh, b_lstm, wfc, bfc)))

    out_pad = pl.pallas_call(
        functools.partial(_fused_attn_lstm_kernel, scale=scale, unroll=unroll),
        out_shape=jax.ShapeDtypeStruct((Bp, Op), f32),
        grid=(grid_b,),
        in_specs=[
            pl.BlockSpec((TB, S, Dp), lambda i: (i, 0, 0)),
            pl.BlockSpec((Dp, 3 * Qp), lambda i: (0, 0)),
            pl.BlockSpec((1, 3 * Qp), lambda i: (0, 0)),
            pl.BlockSpec((Qp, Dp), lambda i: (0, 0)),
            pl.BlockSpec((1, Dp), lambda i: (0, 0)),
            pl.BlockSpec((Dp, 4 * Hp), lambda i: (0, 0)),
            pl.BlockSpec((Hp, 4 * Hp), lambda i: (0, 0)),
            pl.BlockSpec((1, 4 * Hp), lambda i: (0, 0)),
            pl.BlockSpec((Hp, Op), lambda i: (0, 0)),
            pl.BlockSpec((1, Op), lambda i: (0, 0)),
        ],
        out_specs=pl.BlockSpec((TB, Op), lambda i: (i, 0)),
        scratch_shapes=[pltpu.VMEM((S, TB, 4 * Hp), f32)],          # time-major pre-gates
        compiler_params=pltpu.CompilerParams(
            dimension_semantics=("parallel",),
            vmem_limit_bytes=int(vmem_lim)),
        cost_estimate=pl.CostEstimate(flops=flops, transcendentals=transc,
                                      bytes_accessed=bytes_acc),
    )(xp, wqkv, bqkv, wa, ba, w_ih, w_hh, b_lstm, wfc, bfc)

    return out_pad[:B, :O]


# ----------------------------------------------------------------------------- params / reference
def init_attentional_lstm_params(key, input_size, qkv, hidden_size, output_size,
                                 dtype=jnp.float32):
    ks = jax.random.split(key, 14)

    def unif(k, shape, fan_in):
        b = 1.0 / math.sqrt(fan_in)
        return jax.random.uniform(k, shape, dtype, -b, b)

    p = {}
    p["wq"] = unif(ks[0], (qkv, input_size), input_size); p["bq"] = unif(ks[1], (qkv,), input_size)
    p["wk"] = unif(ks[2], (qkv, input_size), input_size); p["bk"] = unif(ks[3], (qkv,), input_size)
    p["wv"] = unif(ks[4], (qkv, input_size), input_size); p["bv"] = unif(ks[5], (qkv,), input_size)
    p["wa"] = unif(ks[6], (input_size, qkv), qkv);         p["ba"] = unif(ks[7], (input_size,), qkv)
    p["w_ih"] = unif(ks[8], (4 * hidden_size, input_size), hidden_size)
    p["w_hh"] = unif(ks[9], (4 * hidden_size, hidden_size), hidden_size)
    p["b_ih"] = unif(ks[10], (4 * hidden_size,), hidden_size)
    p["b_hh"] = unif(ks[11], (4 * hidden_size,), hidden_size)
    p["w_fc"] = unif(ks[12], (output_size, hidden_size), hidden_size)
    p["b_fc"] = unif(ks[13], (output_size,), hidden_size)
    return p


def reference_forward(x, p):
    """Pure-JAX f32 replica of AttentionalLSTM.forward (num_layers=1, unidirectional)."""
    x = x.astype(jnp.float32)
    qkv = p["wq"].shape[0]
    Q = x @ p["wq"].T + p["bq"]
    K = x @ p["wk"].T + p["bk"]
    V = x @ p["wv"].T + p["bv"]
    dot = jnp.einsum("bsq,btq->bst", Q, K) / math.sqrt(qkv)
    scores = jax.nn.softmax(dot, axis=-1)
    scaled_x = jnp.einsum("bst,btq->bsq", scores, V) + x
    out = scaled_x @ p["wa"].T + p["ba"] + x

    B = x.shape[0]
    H = p["w_hh"].shape[1]

    def step(carry, x_t):
        h, c = carry
        gates = x_t @ p["w_ih"].T + p["b_ih"] + h @ p["w_hh"].T + p["b_hh"]
        i, f, g, o = jnp.split(gates, 4, axis=-1)
        i, f, o = jax.nn.sigmoid(i), jax.nn.sigmoid(f), jax.nn.sigmoid(o)
        g = jnp.tanh(g)
        c = f * c + i * g
        h = o * jnp.tanh(c)
        return (h, c), None

    h0 = jnp.zeros((B, H), jnp.float32)
    c0 = jnp.zeros((B, H), jnp.float32)
    (h, _), _ = jax.lax.scan(step, (h0, c0), jnp.swapaxes(out, 0, 1))
    return h @ p["w_fc"].T + p["b_fc"]


# ----------------------------------------------------------------------------- main
if __name__ == "__main__":
    batch, seq_len, input_size, hidden_size, output_size = 4, 8, 8, 32, 1
    qkv = input_size   # module's residual add requires qkv == input_size

    key = jax.random.PRNGKey(0)
    kx, kp = jax.random.split(key)
    x = jax.random.normal(kx, (batch, seq_len, input_size), dtype=jnp.float32)
    params = init_attentional_lstm_params(kp, input_size, qkv, hidden_size, output_size)

    ref = reference_forward(x, params)

    # f32 path: correctness gate
    out_f32 = jax.block_until_ready(
        attentional_lstm_forward(x, params, compute_dtype=jnp.float32))
    assert out_f32.shape == (batch, output_size)
    assert jnp.allclose(out_f32, ref, atol=1e-2, rtol=1e-2), (
        f"f32 mismatch: max|d|={float(jnp.max(jnp.abs(out_f32 - ref)))}")

    # bf16 matmul-operand path (default fast path): loose numerical check
    out_bf16 = jax.block_until_ready(
        attentional_lstm_forward(x, params, compute_dtype=jnp.bfloat16))
    assert out_bf16.shape == (batch, output_size)
    assert jnp.allclose(out_bf16, ref, atol=8e-2, rtol=8e-2), (
        f"bf16 mismatch: max|d|={float(jnp.max(jnp.abs(out_bf16 - ref)))}")

    print("KERNEL_OK")
</pallas_src>

<mosaic_0001>
module attributes {stable_mosaic.version = 11 : i64} {
  func.func @_fused_attn_lstm_kernel(%arg0: i32, %arg1: memref<8x8x128xf32, #tpu.memory_space<vmem>>, %arg2: memref<128x384xf32, #tpu.memory_space<vmem>>, %arg3: memref<1x384xf32, #tpu.memory_space<vmem>>, %arg4: memref<128x128xf32, #tpu.memory_space<vmem>>, %arg5: memref<1x128xf32, #tpu.memory_space<vmem>>, %arg6: memref<128x512xf32, #tpu.memory_space<vmem>>, %arg7: memref<128x512xf32, #tpu.memory_space<vmem>>, %arg8: memref<1x512xf32, #tpu.memory_space<vmem>>, %arg9: memref<128x128xf32, #tpu.memory_space<vmem>>, %arg10: memref<1x128xf32, #tpu.memory_space<vmem>>, %arg11: memref<8x128xf32, #tpu.memory_space<vmem>>, %arg12: memref<8x8x512xf32, #tpu.memory_space<vmem>>) attributes {dimension_semantics = [#tpu.dimension_semantics<parallel>], iteration_bounds = array<i64: 1>, scalar_prefetch = 0 : i64, scratch_operands = 1 : i64, tpu.core_type = #tpu.core_type<tc>, window_params = [{transform_indices = @transform_0, window_bounds = array<i64: 8, 8, 128>}, {pipeline_mode = #tpu.pipeline_mode<synchronous>, transform_indices = @transform_1, window_bounds = array<i64: 128, 384>}, {pipeline_mode = #tpu.pipeline_mode<synchronous>, transform_indices = @transform_2, window_bounds = array<i64: 1, 384>}, {pipeline_mode = #tpu.pipeline_mode<synchronous>, transform_indices = @transform_3, window_bounds = array<i64: 128, 128>}, {pipeline_mode = #tpu.pipeline_mode<synchronous>, transform_indices = @transform_4, window_bounds = array<i64: 1, 128>}, {pipeline_mode = #tpu.pipeline_mode<synchronous>, transform_indices = @transform_5, window_bounds = array<i64: 128, 512>}, {pipeline_mode = #tpu.pipeline_mode<synchronous>, transform_indices = @transform_6, window_bounds = array<i64: 128, 512>}, {pipeline_mode = #tpu.pipeline_mode<synchronous>, transform_indices = @transform_7, window_bounds = array<i64: 1, 512>}, {pipeline_mode = #tpu.pipeline_mode<synchronous>, transform_indices = @transform_8, window_bounds = array<i64: 128, 128>}, {pipeline_mode = #tpu.pipeline_mode<synchronous>, transform_indices = @transform_9, window_bounds = array<i64: 1, 128>}, {transform_indices = @transform_10, window_bounds = array<i64: 8, 128>}]} {
    %c0 = arith.constant 0 : index
    %c0_0 = arith.constant 0 : index
    %c0_1 = arith.constant 0 : index
    %0 = vector.load %arg1[%c0, %c0_0, %c0_1] : memref<8x8x128xf32, #tpu.memory_space<vmem>>, vector<8x8x128xf32>
    %1 = vector.shape_cast %0 : vector<8x8x128xf32> to vector<64x128xf32>
    %c0_2 = arith.constant 0 : index
    %c0_3 = arith.constant 0 : index
    %2 = vector.load %arg2[%c0_2, %c0_3] : memref<128x384xf32, #tpu.memory_space<vmem>>, vector<128x384xf32>
    %cst = arith.constant dense<0.000000e+00> : vector<64x384xf32>
    %3 = tpu.matmul %1, %2, %cst {dimension_numbers = #tpu.dot_dimension_numbers<[1], [0], [0], [1], [0, 0, 1, 1], [], []>} : vector<64x128xf32>, vector<128x384xf32>, vector<64x384xf32> -> vector<64x384xf32>
    %c0_4 = arith.constant 0 : index
    %c0_5 = arith.constant 0 : index
    %4 = vector.load %arg3[%c0_4, %c0_5] : memref<1x384xf32, #tpu.memory_space<vmem>>, vector<1x384xf32>
    %5 = vector.broadcast %4 : vector<1x384xf32> to vector<64x384xf32>
    %6 = arith.addf %3, %5 : vector<64x384xf32>
    %7 = vector.extract_strided_slice %6 {offsets = [0, 0], sizes = [64, 128], strides = [1, 1]} : vector<64x384xf32> to vector<64x128xf32>
    %8 = vector.shape_cast %7 : vector<64x128xf32> to vector<8x8x128xf32>
    %9 = vector.extract_strided_slice %6 {offsets = [0, 128], sizes = [64, 128], strides = [1, 1]} : vector<64x384xf32> to vector<64x128xf32>
    %10 = vector.shape_cast %9 : vector<64x128xf32> to vector<8x8x128xf32>
    %11 = vector.extract_strided_slice %6 {offsets = [0, 256], sizes = [64, 128], strides = [1, 1]} : vector<64x384xf32> to vector<64x128xf32>
    %12 = vector.shape_cast %11 : vector<64x128xf32> to vector<8x8x128xf32>
    "tpu.trace_start"() <{level = 10 : i32, message = "bsq,btq->bst"}> : () -> ()
    %cst_6 = arith.constant dense<0.000000e+00> : vector<8x8x8xf32>
    %13 = tpu.matmul %8, %10, %cst_6 {dimension_numbers = #tpu.dot_dimension_numbers<[2], [2], [1], [1], [0, 0, 0, 1, 1, 1], [0], [0]>} : vector<8x8x128xf32>, vector<8x8x128xf32>, vector<8x8x8xf32> -> vector<8x8x8xf32>
    "tpu.trace_stop"() : () -> ()
    %cst_7 = arith.constant 0.353553385 : f32
    %14 = vector.broadcast %cst_7 : f32 to vector<8x8x8xf32>
    %15 = arith.mulf %13, %14 : vector<8x8x8xf32>
    %cst_8 = arith.constant dense<0xFF800000> : vector<8x8xf32>
    %16 = vector.multi_reduction <maximumf>, %15, %cst_8 [2] : vector<8x8x8xf32> to vector<8x8xf32>
    %17 = vector.shape_cast %16 : vector<8x8xf32> to vector<8x8x1xf32>
    %18 = vector.broadcast %17 : vector<8x8x1xf32> to vector<8x8x8xf32>
    %19 = arith.subf %15, %18 : vector<8x8x8xf32>
    %20 = math.exp %19 : vector<8x8x8xf32>
    %cst_9 = arith.constant dense<0.000000e+00> : vector<8x8xf32>
    %21 = vector.multi_reduction <add>, %20, %cst_9 [2] : vector<8x8x8xf32> to vector<8x8xf32>
    %22 = vector.shape_cast %21 : vector<8x8xf32> to vector<8x8x1xf32>
    %23 = tpu.reciprocal %22 {approx = true} : vector<8x8x1xf32> -> vector<8x8x1xf32>
    %24 = vector.broadcast %23 : vector<8x8x1xf32> to vector<8x8x8xf32>
    %25 = arith.mulf %20, %24 : vector<8x8x8xf32>
    "tpu.trace_start"() <{level = 10 : i32, message = "bst,btq->bsq"}> : () -> ()
    %cst_10 = arith.constant dense<0.000000e+00> : vector<8x8x128xf32>
    %26 = tpu.matmul %25, %12, %cst_10 {dimension_numbers = #tpu.dot_dimension_numbers<[2], [1], [1], [2], [0, 0, 0, 1, 1, 2], [0], [0]>} : vector<8x8x8xf32>, vector<8x8x128xf32>, vector<8x8x128xf32> -> vector<8x8x128xf32>
    "tpu.trace_stop"() : () -> ()
    %27 = vector.shape_cast %26 : vector<8x8x128xf32> to vector<64x128xf32>
    %28 = arith.addf %27, %1 : vector<64x128xf32>
    %c0_11 = arith.constant 0 : index
    %c0_12 = arith.constant 0 : index
    %29 = vector.load %arg4[%c0_11, %c0_12] : memref<128x128xf32, #tpu.memory_space<vmem>>, vector<128x128xf32>
    %cst_13 = arith.constant dense<0.000000e+00> : vector<64x128xf32>
    %30 = tpu.matmul %28, %29, %cst_13 {dimension_numbers = #tpu.dot_dimension_numbers<[1], [0], [0], [1], [0, 0, 1, 1], [], []>} : vector<64x128xf32>, vector<128x128xf32>, vector<64x128xf32> -> vector<64x128xf32>
    %c0_14 = arith.constant 0 : index
    %c0_15 = arith.constant 0 : index
    %31 = vector.load %arg5[%c0_14, %c0_15] : memref<1x128xf32, #tpu.memory_space<vmem>>, vector<1x128xf32>
    %32 = vector.broadcast %31 : vector<1x128xf32> to vector<64x128xf32>
    %33 = arith.addf %30, %32 : vector<64x128xf32>
    %34 = arith.addf %33, %1 : vector<64x128xf32>
    %35 = vector.shape_cast %34 : vector<64x128xf32> to vector<8x8x128xf32>
    %36 = tpu.transpose %35, [1, 0, 2] : vector<8x8x128xf32> -> vector<8x8x128xf32>
    %37 = vector.shape_cast %36 : vector<8x8x128xf32> to vector<64x128xf32>
    %c0_16 = arith.constant 0 : index
    %c0_17 = arith.constant 0 : index
    %38 = vector.load %arg6[%c0_16, %c0_17] : memref<128x512xf32, #tpu.memory_space<vmem>>, vector<128x512xf32>
    %cst_18 = arith.constant dense<0.000000e+00> : vector<64x512xf32>
    %39 = tpu.matmul %37, %38, %cst_18 {dimension_numbers = #tpu.dot_dimension_numbers<[1], [0], [0], [1], [0, 0, 1, 1], [], []>} : vector<64x128xf32>, vector<128x512xf32>, vector<64x512xf32> -> vector<64x512xf32>
    %c0_19 = arith.constant 0 : index
    %c0_20 = arith.constant 0 : index
    %40 = vector.load %arg8[%c0_19, %c0_20] : memref<1x512xf32, #tpu.memory_space<vmem>>, vector<1x512xf32>
    %41 = vector.broadcast %40 : vector<1x512xf32> to vector<64x512xf32>
    %42 = arith.addf %39, %41 : vector<64x512xf32>
    %43 = vector.shape_cast %42 : vector<64x512xf32> to vector<8x8x512xf32>
    %c0_21 = arith.constant 0 : index
    %c0_22 = arith.constant 0 : index
    %c0_23 = arith.constant 0 : index
    %44 = vector.load %arg12[%c0_21, %c0_22, %c0_23] : memref<8x8x512xf32, #tpu.memory_space<vmem>>, vector<8x8x512xf32>
    tpu.vector_store %arg12[%c0_21, %c0_22, %c0_23], %43 {strides = array<i32>} : memref<8x8x512xf32, #tpu.memory_space<vmem>>, vector<8x8x512xf32>,
    %cst_24 = arith.constant 0.000000e+00 : f32
    %45 = vector.broadcast %cst_24 : f32 to vector<8x128xf32>
    %cst_25 = arith.constant 0.000000e+00 : f32
    %46 = vector.broadcast %cst_25 : f32 to vector<8x128xf32>
    %c0_i32 = arith.constant 0 : i32
    %47 = arith.index_cast %c0_i32 : i32 to index
    %c0_26 = arith.constant 0 : index
    %c0_27 = arith.constant 0 : index
    %48 = vector.load %arg12[%47, %c0_26, %c0_27] : memref<8x8x512xf32, #tpu.memory_space<vmem>>, vector<1x8x512xf32>
    %49 = vector.shape_cast %48 : vector<1x8x512xf32> to vector<8x512xf32>
    %c0_28 = arith.constant 0 : index
    %c0_29 = arith.constant 0 : index
    %50 = vector.load %arg7[%c0_28, %c0_29] : memref<128x512xf32, #tpu.memory_space<vmem>>, vector<128x512xf32>
    %cst_30 = arith.constant dense<0.000000e+00> : vector<8x512xf32>
    %51 = tpu.matmul %45, %50, %cst_30 {dimension_numbers = #tpu.dot_dimension_numbers<[1], [0], [0], [1], [0, 0, 1, 1], [], []>} : vector<8x128xf32>, vector<128x512xf32>, vector<8x512xf32> -> vector<8x512xf32>
    %52 = arith.addf %49, %51 : vector<8x512xf32>
    %53 = vector.extract_strided_slice %52 {offsets = [0, 0], sizes = [8, 128], strides = [1, 1]} : vector<8x512xf32> to vector<8x128xf32>
    %cst_31 = arith.constant 5.000000e-01 : f32
    %54 = vector.broadcast %cst_31 : f32 to vector<8x128xf32>
    %55 = arith.mulf %54, %53 : vector<8x128xf32>
    %56 = math.tanh %55 : vector<8x128xf32>
    %cst_32 = arith.constant 1.000000e+00 : f32
    %57 = vector.broadcast %cst_32 : f32 to vector<8x128xf32>
    %58 = arith.addf %56, %57 : vector<8x128xf32>
    %cst_33 = arith.constant 5.000000e-01 : f32
    %59 = vector.broadcast %cst_33 : f32 to vector<8x128xf32>
    %60 = arith.mulf %59, %58 : vector<8x128xf32>
    %61 = vector.extract_strided_slice %52 {offsets = [0, 128], sizes = [8, 128], strides = [1, 1]} : vector<8x512xf32> to vector<8x128xf32>
    %cst_34 = arith.constant 5.000000e-01 : f32
    %62 = vector.broadcast %cst_34 : f32 to vector<8x128xf32>
    %63 = arith.mulf %62, %61 : vector<8x128xf32>
    %64 = math.tanh %63 : vector<8x128xf32>
    %cst_35 = arith.constant 1.000000e+00 : f32
    %65 = vector.broadcast %cst_35 : f32 to vector<8x128xf32>
    %66 = arith.addf %64, %65 : vector<8x128xf32>
    %cst_36 = arith.constant 5.000000e-01 : f32
    %67 = vector.broadcast %cst_36 : f32 to vector<8x128xf32>
    %68 = arith.mulf %67, %66 : vector<8x128xf32>
    %69 = vector.extract_strided_slice %52 {offsets = [0, 256], sizes = [8, 128], strides = [1, 1]} : vector<8x512xf32> to vector<8x128xf32>
    %70 = math.tanh %69 : vector<8x128xf32>
    %71 = vector.extract_strided_slice %52 {offsets = [0, 384], sizes = [8, 128], strides = [1, 1]} : vector<8x512xf32> to vector<8x128xf32>
    %cst_37 = arith.constant 5.000000e-01 : f32
    %72 = vector.broadcast %cst_37 : f32 to vector<8x128xf32>
    %73 = arith.mulf %72, %71 : vector<8x128xf32>
    %74 = math.tanh %73 : vector<8x128xf32>
    %cst_38 = arith.constant 1.000000e+00 : f32
    %75 = vector.broadcast %cst_38 : f32 to vector<8x128xf32>
    %76 = arith.addf %74, %75 : vector<8x128xf32>
    %cst_39 = arith.constant 5.000000e-01 : f32
    %77 = vector.broadcast %cst_39 : f32 to vector<8x128xf32>
    %78 = arith.mulf %77, %76 : vector<8x128xf32>
    %79 = arith.mulf %68, %46 : vector<8x128xf32>
    %80 = arith.mulf %60, %70 : vector<8x128xf32>
    %81 = arith.addf %79, %80 : vector<8x128xf32>
    %82 = math.tanh %81 : vector<8x128xf32>
    %83 = arith.mulf %78, %82 : vector<8x128xf32>
    %c1_i32 = arith.constant 1 : i32
    %84 = arith.index_cast %c1_i32 : i32 to index
    %c0_40 = arith.constant 0 : index
    %c0_41 = arith.constant 0 : index
    %85 = vector.load %arg12[%84, %c0_40, %c0_41] : memref<8x8x512xf32, #tpu.memory_space<vmem>>, vector<1x8x512xf32>
    %86 = vector.shape_cast %85 : vector<1x8x512xf32> to vector<8x512xf32>
    %c0_42 = arith.constant 0 : index
    %c0_43 = arith.constant 0 : index
    %87 = vector.load %arg7[%c0_42, %c0_43] : memref<128x512xf32, #tpu.memory_space<vmem>>, vector<128x512xf32>
    %cst_44 = arith.constant dense<0.000000e+00> : vector<8x512xf32>
    %88 = tpu.matmul %83, %87, %cst_44 {dimension_numbers = #tpu.dot_dimension_numbers<[1], [0], [0], [1], [0, 0, 1, 1], [], []>} : vector<8x128xf32>, vector<128x512xf32>, vector<8x512xf32> -> vector<8x512xf32>
    %89 = arith.addf %86, %88 : vector<8x512xf32>
    %90 = vector.extract_strided_slice %89 {offsets = [0, 0], sizes = [8, 128], strides = [1, 1]} : vector<8x512xf32> to vector<8x128xf32>
    %cst_45 = arith.constant 5.000000e-01 : f32
    %91 = vector.broadcast %cst_45 : f32 to vector<8x128xf32>
    %92 = arith.mulf %91, %90 : vector<8x128xf32>
    %93 = math.tanh %92 : vector<8x128xf32>
    %cst_46 = arith.constant 1.000000e+00 : f32
    %94 = vector.broadcast %cst_46 : f32 to vector<8x128xf32>
    %95 = arith.addf %93, %94 : vector<8x128xf32>
    %cst_47 = arith.constant 5.000000e-01 : f32
    %96 = vector.broadcast %cst_47 : f32 to vector<8x128xf32>
    %97 = arith.mulf %96, %95 : vector<8x128xf32>
    %98 = vector.extract_strided_slice %89 {offsets = [0, 128], sizes = [8, 128], strides = [1, 1]} : vector<8x512xf32> to vector<8x128xf32>
    %cst_48 = arith.constant 5.000000e-01 : f32
    %99 = vector.broadcast %cst_48 : f32 to vector<8x128xf32>
    %100 = arith.mulf %99, %98 : vector<8x128xf32>
    %101 = math.tanh %100 : vector<8x128xf32>
    %cst_49 = arith.constant 1.000000e+00 : f32
    %102 = vector.broadcast %cst_49 : f32 to vector<8x128xf32>
    %103 = arith.addf %101, %102 : vector<8x128xf32>
    %cst_50 = arith.constant 5.000000e-01 : f32
    %104 = vector.broadcast %cst_50 : f32 to vector<8x128xf32>
    %105 = arith.mulf %104, %103 : vector<8x128xf32>
    %106 = vector.extract_strided_slice %89 {offsets = [0, 256], sizes = [8, 128], strides = [1, 1]} : vector<8x512xf32> to vector<8x128xf32>
    %107 = math.tanh %106 : vector<8x128xf32>
    %108 = vector.extract_strided_slice %89 {offsets = [0, 384], sizes = [8, 128], strides = [1, 1]} : vector<8x512xf32> to vector<8x128xf32>
    %cst_51 = arith.constant 5.000000e-01 : f32
    %109 = vector.broadcast %cst_51 : f32 to vector<8x128xf32>
    %110 = arith.mulf %109, %108 : vector<8x128xf32>
    %111 = math.tanh %110 : vector<8x128xf32>
    %cst_52 = arith.constant 1.000000e+00 : f32
    %112 = vector.broadcast %cst_52 : f32 to vector<8x128xf32>
    %113 = arith.addf %111, %112 : vector<8x128xf32>
    %cst_53 = arith.constant 5.000000e-01 : f32
    %114 = vector.broadcast %cst_53 : f32 to vector<8x128xf32>
    %115 = arith.mulf %114, %113 : vector<8x128xf32>
    %116 = arith.mulf %105, %81 : vector<8x128xf32>
    %117 = arith.mulf %97, %107 : vector<8x128xf32>
    %118 = arith.addf %116, %117 : vector<8x128xf32>
    %119 = math.tanh %118 : vector<8x128xf32>
    %120 = arith.mulf %115, %119 : vector<8x128xf32>
    %c2_i32 = arith.constant 2 : i32
    %121 = arith.index_cast %c2_i32 : i32 to index
    %c0_54 = arith.constant 0 : index
    %c0_55 = arith.constant 0 : index
    %122 = vector.load %arg12[%121, %c0_54, %c0_55] : memref<8x8x512xf32, #tpu.memory_space<vmem>>, vector<1x8x512xf32>
    %123 = vector.shape_cast %122 : vector<1x8x512xf32> to vector<8x512xf32>
    %c0_56 = arith.constant 0 : index
    %c0_57 = arith.constant 0 : index
    %124 = vector.load %arg7[%c0_56, %c0_57] : memref<128x512xf32, #tpu.memory_space<vmem>>, vector<128x512xf32>
    %cst_58 = arith.constant dense<0.000000e+00> : vector<8x512xf32>
    %125 = tpu.matmul %120, %124, %cst_58 {dimension_numbers = #tpu.dot_dimension_numbers<[1], [0], [0], [1], [0, 0, 1, 1], [], []>} : vector<8x128xf32>, vector<128x512xf32>, vector<8x512xf32> -> vector<8x512xf32>
    %126 = arith.addf %123, %125 : vector<8x512xf32>
    %127 = vector.extract_strided_slice %126 {offsets = [0, 0], sizes = [8, 128], strides = [1, 1]} : vector<8x512xf32> to vector<8x128xf32>
    %cst_59 = arith.constant 5.000000e-01 : f32
    %128 = vector.broadcast %cst_59 : f32 to vector<8x128xf32>
    %129 = arith.mulf %128, %127 : vector<8x128xf32>
    %130 = math.tanh %129 : vector<8x128xf32>
    %cst_60 = arith.constant 1.000000e+00 : f32
    %131 = vector.broadcast %cst_60 : f32 to vector<8x128xf32>
    %132 = arith.addf %130, %131 : vector<8x128xf32>
    %cst_61 = arith.constant 5.000000e-01 : f32
    %133 = vector.broadcast %cst_61 : f32 to vector<8x128xf32>
    %134 = arith.mulf %133, %132 : vector<8x128xf32>
    %135 = vector.extract_strided_slice %126 {offsets = [0, 128], sizes = [8, 128], strides = [1, 1]} : vector<8x512xf32> to vector<8x128xf32>
    %cst_62 = arith.constant 5.000000e-01 : f32
    %136 = vector.broadcast %cst_62 : f32 to vector<8x128xf32>
    %137 = arith.mulf %136, %135 : vector<8x128xf32>
    %138 = math.tanh %137 : vector<8x128xf32>
    %cst_63 = arith.constant 1.000000e+00 : f32
    %139 = vector.broadcast %cst_63 : f32 to vector<8x128xf32>
    %140 = arith.addf %138, %139 : vector<8x128xf32>
    %cst_64 = arith.constant 5.000000e-01 : f32
    %141 = vector.broadcast %cst_64 : f32 to vector<8x128xf32>
    %142 = arith.mulf %141, %140 : vector<8x128xf32>
    %143 = vector.extract_strided_slice %126 {offsets = [0, 256], sizes = [8, 128], strides = [1, 1]} : vector<8x512xf32> to vector<8x128xf32>
    %144 = math.tanh %143 : vector<8x128xf32>
    %145 = vector.extract_strided_slice %126 {offsets = [0, 384], sizes = [8, 128], strides = [1, 1]} : vector<8x512xf32> to vector<8x128xf32>
    %cst_65 = arith.constant 5.000000e-01 : f32
    %146 = vector.broadcast %cst_65 : f32 to vector<8x128xf32>
    %147 = arith.mulf %146, %145 : vector<8x128xf32>
    %148 = math.tanh %147 : vector<8x128xf32>
    %cst_66 = arith.constant 1.000000e+00 : f32
    %149 = vector.broadcast %cst_66 : f32 to vector<8x128xf32>
    %150 = arith.addf %148, %149 : vector<8x128xf32>
    %cst_67 = arith.constant 5.000000e-01 : f32
    %151 = vector.broadcast %cst_67 : f32 to vector<8x128xf32>
    %152 = arith.mulf %151, %150 : vector<8x128xf32>
    %153 = arith.mulf %142, %118 : vector<8x128xf32>
    %154 = arith.mulf %134, %144 : vector<8x128xf32>
    %155 = arith.addf %153, %154 : vector<8x128xf32>
    %156 = math.tanh %155 : vector<8x128xf32>
    %157 = arith.mulf %152, %156 : vector<8x128xf32>
    %c3_i32 = arith.constant 3 : i32
    %158 = arith.index_cast %c3_i32 : i32 to index
    %c0_68 = arith.constant 0 : index
    %c0_69 = arith.constant 0 : index
    %159 = vector.load %arg12[%158, %c0_68, %c0_69] : memref<8x8x512xf32, #tpu.memory_space<vmem>>, vector<1x8x512xf32>
    %160 = vector.shape_cast %159 : vector<1x8x512xf32> to vector<8x512xf32>
    %c0_70 = arith.constant 0 : index
    %c0_71 = arith.constant 0 : index
    %161 = vector.load %arg7[%c0_70, %c0_71] : memref<128x512xf32, #tpu.memory_space<vmem>>, vector<128x512xf32>
    %cst_72 = arith.constant dense<0.000000e+00> : vector<8x512xf32>
    %162 = tpu.matmul %157, %161, %cst_72 {dimension_numbers = #tpu.dot_dimension_numbers<[1], [0], [0], [1], [0, 0, 1, 1], [], []>} : vector<8x128xf32>, vector<128x512xf32>, vector<8x512xf32> -> vector<8x512xf32>
    %163 = arith.addf %160, %162 : vector<8x512xf32>
    %164 = vector.extract_strided_slice %163 {offsets = [0, 0], sizes = [8, 128], strides = [1, 1]} : vector<8x512xf32> to vector<8x128xf32>
    %cst_73 = arith.constant 5.000000e-01 : f32
    %165 = vector.broadcast %cst_73 : f32 to vector<8x128xf32>
    %166 = arith.mulf %165, %164 : vector<8x128xf32>
    %167 = math.tanh %166 : vector<8x128xf32>
    %cst_74 = arith.constant 1.000000e+00 : f32
    %168 = vector.broadcast %cst_74 : f32 to vector<8x128xf32>
    %169 = arith.addf %167, %168 : vector<8x128xf32>
    %cst_75 = arith.constant 5.000000e-01 : f32
    %170 = vector.broadcast %cst_75 : f32 to vector<8x128xf32>
    %171 = arith.mulf %170, %169 : vector<8x128xf32>
    %172 = vector.extract_strided_slice %163 {offsets = [0, 128], sizes = [8, 128], strides = [1, 1]} : vector<8x512xf32> to vector<8x128xf32>
    %cst_76 = arith.constant 5.000000e-01 : f32
    %173 = vector.broadcast %cst_76 : f32 to vector<8x128xf32>
    %174 = arith.mulf %173, %172 : vector<8x128xf32>
    %175 = math.tanh %174 : vector<8x128xf32>
    %cst_77 = arith.constant 1.000000e+00 : f32
    %176 = vector.broadcast %cst_77 : f32 to vector<8x128xf32>
    %177 = arith.addf %175, %176 : vector<8x128xf32>
    %cst_78 = arith.constant 5.000000e-01 : f32
    %178 = vector.broadcast %cst_78 : f32 to vector<8x128xf32>
    %179 = arith.mulf %178, %177 : vector<8x128xf32>
    %180 = vector.extract_strided_slice %163 {offsets = [0, 256], sizes = [8, 128], strides = [1, 1]} : vector<8x512xf32> to vector<8x128xf32>
    %181 = math.tanh %180 : vector<8x128xf32>
    %182 = vector.extract_strided_slice %163 {offsets = [0, 384], sizes = [8, 128], strides = [1, 1]} : vector<8x512xf32> to vector<8x128xf32>
    %cst_79 = arith.constant 5.000000e-01 : f32
    %183 = vector.broadcast %cst_79 : f32 to vector<8x128xf32>
    %184 = arith.mulf %183, %182 : vector<8x128xf32>
    %185 = math.tanh %184 : vector<8x128xf32>
    %cst_80 = arith.constant 1.000000e+00 : f32
    %186 = vector.broadcast %cst_80 : f32 to vector<8x128xf32>
    %187 = arith.addf %185, %186 : vector<8x128xf32>
    %cst_81 = arith.constant 5.000000e-01 : f32
    %188 = vector.broadcast %cst_81 : f32 to vector<8x128xf32>
    %189 = arith.mulf %188, %187 : vector<8x128xf32>
    %190 = arith.mulf %179, %155 : vector<8x128xf32>
    %191 = arith.mulf %171, %181 : vector<8x128xf32>
    %192 = arith.addf %190, %191 : vector<8x128xf32>
    %193 = math.tanh %192 : vector<8x128xf32>
    %194 = arith.mulf %189, %193 : vector<8x128xf32>
    %c4_i32 = arith.constant 4 : i32
    %195 = arith.index_cast %c4_i32 : i32 to index
    %c0_82 = arith.constant 0 : index
    %c0_83 = arith.constant 0 : index
    %196 = vector.load %arg12[%195, %c0_82, %c0_83] : memref<8x8x512xf32, #tpu.memory_space<vmem>>, vector<1x8x512xf32>
    %197 = vector.shape_cast %196 : vector<1x8x512xf32> to vector<8x512xf32>
    %c0_84 = arith.constant 0 : index
    %c0_85 = arith.constant 0 : index
    %198 = vector.load %arg7[%c0_84, %c0_85] : memref<128x512xf32, #tpu.memory_space<vmem>>, vector<128x512xf32>
    %cst_86 = arith.constant dense<0.000000e+00> : vector<8x512xf32>
    %199 = tpu.matmul %194, %198, %cst_86 {dimension_numbers = #tpu.dot_dimension_numbers<[1], [0], [0], [1], [0, 0, 1, 1], [], []>} : vector<8x128xf32>, vector<128x512xf32>, vector<8x512xf32> -> vector<8x512xf32>
    %200 = arith.addf %197, %199 : vector<8x512xf32>
    %201 = vector.extract_strided_slice %200 {offsets = [0, 0], sizes = [8, 128], strides = [1, 1]} : vector<8x512xf32> to vector<8x128xf32>
    %cst_87 = arith.constant 5.000000e-01 : f32
    %202 = vector.broadcast %cst_87 : f32 to vector<8x128xf32>
    %203 = arith.mulf %202, %201 : vector<8x128xf32>
    %204 = math.tanh %203 : vector<8x128xf32>
    %cst_88 = arith.constant 1.000000e+00 : f32
    %205 = vector.broadcast %cst_88 : f32 to vector<8x128xf32>
    %206 = arith.addf %204, %205 : vector<8x128xf32>
    %cst_89 = arith.constant 5.000000e-01 : f32
    %207 = vector.broadcast %cst_89 : f32 to vector<8x128xf32>
    %208 = arith.mulf %207, %206 : vector<8x128xf32>
    %209 = vector.extract_strided_slice %200 {offsets = [0, 128], sizes = [8, 128], strides = [1, 1]} : vector<8x512xf32> to vector<8x128xf32>
    %cst_90 = arith.constant 5.000000e-01 : f32
    %210 = vector.broadcast %cst_90 : f32 to vector<8x128xf32>
    %211 = arith.mulf %210, %209 : vector<8x128xf32>
    %212 = math.tanh %211 : vector<8x128xf32>
    %cst_91 = arith.constant 1.000000e+00 : f32
    %213 = vector.broadcast %cst_91 : f32 to vector<8x128xf32>
    %214 = arith.addf %212, %213 : vector<8x128xf32>
    %cst_92 = arith.constant 5.000000e-01 : f32
    %215 = vector.broadcast %cst_92 : f32 to vector<8x128xf32>
    %216 = arith.mulf %215, %214 : vector<8x128xf32>
    %217 = vector.extract_strided_slice %200 {offsets = [0, 256], sizes = [8, 128], strides = [1, 1]} : vector<8x512xf32> to vector<8x128xf32>
    %218 = math.tanh %217 : vector<8x128xf32>
    %219 = vector.extract_strided_slice %200 {offsets = [0, 384], sizes = [8, 128], strides = [1, 1]} : vector<8x512xf32> to vector<8x128xf32>
    %cst_93 = arith.constant 5.000000e-01 : f32
    %220 = vector.broadcast %cst_93 : f32 to vector<8x128xf32>
    %221 = arith.mulf %220, %219 : vector<8x128xf32>
    %222 = math.tanh %221 : vector<8x128xf32>
    %cst_94 = arith.constant 1.000000e+00 : f32
    %223 = vector.broadcast %cst_94 : f32 to vector<8x128xf32>
    %224 = arith.addf %222, %223 : vector<8x128xf32>
    %cst_95 = arith.constant 5.000000e-01 : f32
    %225 = vector.broadcast %cst_95 : f32 to vector<8x128xf32>
    %226 = arith.mulf %225, %224 : vector<8x128xf32>
    %227 = arith.mulf %216, %192 : vector<8x128xf32>
    %228 = arith.mulf %208, %218 : vector<8x128xf32>
    %229 = arith.addf %227, %228 : vector<8x128xf32>
    %230 = math.tanh %229 : vector<8x128xf32>
    %231 = arith.mulf %226, %230 : vector<8x128xf32>
    %c5_i32 = arith.constant 5 : i32
    %232 = arith.index_cast %c5_i32 : i32 to index
    %c0_96 = arith.constant 0 : index
    %c0_97 = arith.constant 0 : index
    %233 = vector.load %arg12[%232, %c0_96, %c0_97] : memref<8x8x512xf32, #tpu.memory_space<vmem>>, vector<1x8x512xf32>
    %234 = vector.shape_cast %233 : vector<1x8x512xf32> to vector<8x512xf32>
    %c0_98 = arith.constant 0 : index
    %c0_99 = arith.constant 0 : index
    %235 = vector.load %arg7[%c0_98, %c0_99] : memref<128x512xf32, #tpu.memory_space<vmem>>, vector<128x512xf32>
    %cst_100 = arith.constant dense<0.000000e+00> : vector<8x512xf32>
    %236 = tpu.matmul %231, %235, %cst_100 {dimension_numbers = #tpu.dot_dimension_numbers<[1], [0], [0], [1], [0, 0, 1, 1], [], []>} : vector<8x128xf32>, vector<128x512xf32>, vector<8x512xf32> -> vector<8x512xf32>
    %237 = arith.addf %234, %236 : vector<8x512xf32>
    %238 = vector.extract_strided_slice %237 {offsets = [0, 0], sizes = [8, 128], strides = [1, 1]} : vector<8x512xf32> to vector<8x128xf32>
    %cst_101 = arith.constant 5.000000e-01 : f32
    %239 = vector.broadcast %cst_101 : f32 to vector<8x128xf32>
    %240 = arith.mulf %239, %238 : vector<8x128xf32>
    %241 = math.tanh %240 : vector<8x128xf32>
    %cst_102 = arith.constant 1.000000e+00 : f32
    %242 = vector.broadcast %cst_102 : f32 to vector<8x128xf32>
    %243 = arith.addf %241, %242 : vector<8x128xf32>
    %cst_103 = arith.constant 5.000000e-01 : f32
    %244 = vector.broadcast %cst_103 : f32 to vector<8x128xf32>
    %245 = arith.mulf %244, %243 : vector<8x128xf32>
    %246 = vector.extract_strided_slice %237 {offsets = [0, 128], sizes = [8, 128], strides = [1, 1]} : vector<8x512xf32> to vector<8x128xf32>
    %cst_104 = arith.constant 5.000000e-01 : f32
    %247 = vector.broadcast %cst_104 : f32 to vector<8x128xf32>
    %248 = arith.mulf %247, %246 : vector<8x128xf32>
    %249 = math.tanh %248 : vector<8x128xf32>
    %cst_105 = arith.constant 1.000000e+00 : f32
    %250 = vector.broadcast %cst_105 : f32 to vector<8x128xf32>
    %251 = arith.addf %249, %250 : vector<8x128xf32>
    %cst_106 = arith.constant 5.000000e-01 : f32
    %252 = vector.broadcast %cst_106 : f32 to vector<8x128xf32>
    %253 = arith.mulf %252, %251 : vector<8x128xf32>
    %254 = vector.extract_strided_slice %237 {offsets = [0, 256], sizes = [8, 128], strides = [1, 1]} : vector<8x512xf32> to vector<8x128xf32>
    %255 = math.tanh %254 : vector<8x128xf32>
    %256 = vector.extract_strided_slice %237 {offsets = [0, 384], sizes = [8, 128], strides = [1, 1]} : vector<8x512xf32> to vector<8x128xf32>
    %cst_107 = arith.constant 5.000000e-01 : f32
    %257 = vector.broadcast %cst_107 : f32 to vector<8x128xf32>
    %258 = arith.mulf %257, %256 : vector<8x128xf32>
    %259 = math.tanh %258 : vector<8x128xf32>
    %cst_108 = arith.constant 1.000000e+00 : f32
    %260 = vector.broadcast %cst_108 : f32 to vector<8x128xf32>
    %261 = arith.addf %259, %260 : vector<8x128xf32>
    %cst_109 = arith.constant 5.000000e-01 : f32
    %262 = vector.broadcast %cst_109 : f32 to vector<8x128xf32>
    %263 = arith.mulf %262, %261 : vector<8x128xf32>
    %264 = arith.mulf %253, %229 : vector<8x128xf32>
    %265 = arith.mulf %245, %255 : vector<8x128xf32>
    %266 = arith.addf %264, %265 : vector<8x128xf32>
    %267 = math.tanh %266 : vector<8x128xf32>
    %268 = arith.mulf %263, %267 : vector<8x128xf32>
    %c6_i32 = arith.constant 6 : i32
    %269 = arith.index_cast %c6_i32 : i32 to index
    %c0_110 = arith.constant 0 : index
    %c0_111 = arith.constant 0 : index
    %270 = vector.load %arg12[%269, %c0_110, %c0_111] : memref<8x8x512xf32, #tpu.memory_space<vmem>>, vector<1x8x512xf32>
    %271 = vector.shape_cast %270 : vector<1x8x512xf32> to vector<8x512xf32>
    %c0_112 = arith.constant 0 : index
    %c0_113 = arith.constant 0 : index
    %272 = vector.load %arg7[%c0_112, %c0_113] : memref<128x512xf32, #tpu.memory_space<vmem>>, vector<128x512xf32>
    %cst_114 = arith.constant dense<0.000000e+00> : vector<8x512xf32>
    %273 = tpu.matmul %268, %272, %cst_114 {dimension_numbers = #tpu.dot_dimension_numbers<[1], [0], [0], [1], [0, 0, 1, 1], [], []>} : vector<8x128xf32>, vector<128x512xf32>, vector<8x512xf32> -> vector<8x512xf32>
    %274 = arith.addf %271, %273 : vector<8x512xf32>
    %275 = vector.extract_strided_slice %274 {offsets = [0, 0], sizes = [8, 128], strides = [1, 1]} : vector<8x512xf32> to vector<8x128xf32>
    %cst_115 = arith.constant 5.000000e-01 : f32
    %276 = vector.broadcast %cst_115 : f32 to vector<8x128xf32>
    %277 = arith.mulf %276, %275 : vector<8x128xf32>
    %278 = math.tanh %277 : vector<8x128xf32>
    %cst_116 = arith.constant 1.000000e+00 : f32
    %279 = vector.broadcast %cst_116 : f32 to vector<8x128xf32>
    %280 = arith.addf %278, %279 : vector<8x128xf32>
    %cst_117 = arith.constant 5.000000e-01 : f32
    %281 = vector.broadcast %cst_117 : f32 to vector<8x128xf32>
    %282 = arith.mulf %281, %280 : vector<8x128xf32>
    %283 = vector.extract_strided_slice %274 {offsets = [0, 128], sizes = [8, 128], strides = [1, 1]} : vector<8x512xf32> to vector<8x128xf32>
    %cst_118 = arith.constant 5.000000e-01 : f32
    %284 = vector.broadcast %cst_118 : f32 to vector<8x128xf32>
    %285 = arith.mulf %284, %283 : vector<8x128xf32>
    %286 = math.tanh %285 : vector<8x128xf32>
    %cst_119 = arith.constant 1.000000e+00 : f32
    %287 = vector.broadcast %cst_119 : f32 to vector<8x128xf32>
    %288 = arith.addf %286, %287 : vector<8x128xf32>
    %cst_120 = arith.constant 5.000000e-01 : f32
    %289 = vector.broadcast %cst_120 : f32 to vector<8x128xf32>
    %290 = arith.mulf %289, %288 : vector<8x128xf32>
    %291 = vector.extract_strided_slice %274 {offsets = [0, 256], sizes = [8, 128], strides = [1, 1]} : vector<8x512xf32> to vector<8x128xf32>
    %292 = math.tanh %291 : vector<8x128xf32>
    %293 = vector.extract_strided_slice %274 {offsets = [0, 384], sizes = [8, 128], strides = [1, 1]} : vector<8x512xf32> to vector<8x128xf32>
    %cst_121 = arith.constant 5.000000e-01 : f32
    %294 = vector.broadcast %cst_121 : f32 to vector<8x128xf32>
    %295 = arith.mulf %294, %293 : vector<8x128xf32>
    %296 = math.tanh %295 : vector<8x128xf32>
    %cst_122 = arith.constant 1.000000e+00 : f32
    %297 = vector.broadcast %cst_122 : f32 to vector<8x128xf32>
    %298 = arith.addf %296, %297 : vector<8x128xf32>
    %cst_123 = arith.constant 5.000000e-01 : f32
    %299 = vector.broadcast %cst_123 : f32 to vector<8x128xf32>
    %300 = arith.mulf %299, %298 : vector<8x128xf32>
    %301 = arith.mulf %290, %266 : vector<8x128xf32>
    %302 = arith.mulf %282, %292 : vector<8x128xf32>
    %303 = arith.addf %301, %302 : vector<8x128xf32>
    %304 = math.tanh %303 : vector<8x128xf32>
    %305 = arith.mulf %300, %304 : vector<8x128xf32>
    %c7_i32 = arith.constant 7 : i32
    %306 = arith.index_cast %c7_i32 : i32 to index
    %c0_124 = arith.constant 0 : index
    %c0_125 = arith.constant 0 : index
    %307 = vector.load %arg12[%306, %c0_124, %c0_125] : memref<8x8x512xf32, #tpu.memory_space<vmem>>, vector<1x8x512xf32>
    %308 = vector.shape_cast %307 : vector<1x8x512xf32> to vector<8x512xf32>
    %c0_126 = arith.constant 0 : index
    %c0_127 = arith.constant 0 : index
    %309 = vector.load %arg7[%c0_126, %c0_127] : memref<128x512xf32, #tpu.memory_space<vmem>>, vector<128x512xf32>
    %cst_128 = arith.constant dense<0.000000e+00> : vector<8x512xf32>
    %310 = tpu.matmul %305, %309, %cst_128 {dimension_numbers = #tpu.dot_dimension_numbers<[1], [0], [0], [1], [0, 0, 1, 1], [], []>} : vector<8x128xf32>, vector<128x512xf32>, vector<8x512xf32> -> vector<8x512xf32>
    %311 = arith.addf %308, %310 : vector<8x512xf32>
    %312 = vector.extract_strided_slice %311 {offsets = [0, 0], sizes = [8, 128], strides = [1, 1]} : vector<8x512xf32> to vector<8x128xf32>
    %cst_129 = arith.constant 5.000000e-01 : f32
    %313 = vector.broadcast %cst_129 : f32 to vector<8x128xf32>
    %314 = arith.mulf %313, %312 : vector<8x128xf32>
    %315 = math.tanh %314 : vector<8x128xf32>
    %cst_130 = arith.constant 1.000000e+00 : f32
    %316 = vector.broadcast %cst_130 : f32 to vector<8x128xf32>
    %317 = arith.addf %315, %316 : vector<8x128xf32>
    %cst_131 = arith.constant 5.000000e-01 : f32
    %318 = vector.broadcast %cst_131 : f32 to vector<8x128xf32>
    %319 = arith.mulf %318, %317 : vector<8x128xf32>
    %320 = vector.extract_strided_slice %311 {offsets = [0, 128], sizes = [8, 128], strides = [1, 1]} : vector<8x512xf32> to vector<8x128xf32>
    %cst_132 = arith.constant 5.000000e-01 : f32
    %321 = vector.broadcast %cst_132 : f32 to vector<8x128xf32>
    %322 = arith.mulf %321, %320 : vector<8x128xf32>
    %323 = math.tanh %322 : vector<8x128xf32>
    %cst_133 = arith.constant 1.000000e+00 : f32
    %324 = vector.broadcast %cst_133 : f32 to vector<8x128xf32>
    %325 = arith.addf %323, %324 : vector<8x128xf32>
    %cst_134 = arith.constant 5.000000e-01 : f32
    %326 = vector.broadcast %cst_134 : f32 to vector<8x128xf32>
    %327 = arith.mulf %326, %325 : vector<8x128xf32>
    %328 = vector.extract_strided_slice %311 {offsets = [0, 256], sizes = [8, 128], strides = [1, 1]} : vector<8x512xf32> to vector<8x128xf32>
    %329 = math.tanh %328 : vector<8x128xf32>
    %330 = vector.extract_strided_slice %311 {offsets = [0, 384], sizes = [8, 128], strides = [1, 1]} : vector<8x512xf32> to vector<8x128xf32>
    %cst_135 = arith.constant 5.000000e-01 : f32
    %331 = vector.broadcast %cst_135 : f32 to vector<8x128xf32>
    %332 = arith.mulf %331, %330 : vector<8x128xf32>
    %333 = math.tanh %332 : vector<8x128xf32>
    %cst_136 = arith.constant 1.000000e+00 : f32
    %334 = vector.broadcast %cst_136 : f32 to vector<8x128xf32>
    %335 = arith.addf %333, %334 : vector<8x128xf32>
    %cst_137 = arith.constant 5.000000e-01 : f32
    %336 = vector.broadcast %cst_137 : f32 to vector<8x128xf32>
    %337 = arith.mulf %336, %335 : vector<8x128xf32>
    %338 = arith.mulf %327, %303 : vector<8x128xf32>
    %339 = arith.mulf %319, %329 : vector<8x128xf32>
    %340 = arith.addf %338, %339 : vector<8x128xf32>
    %341 = math.tanh %340 : vector<8x128xf32>
    %342 = arith.mulf %337, %341 : vector<8x128xf32>
    %c8_i32 = arith.constant 8 : i32
    %c0_138 = arith.constant 0 : index
    %c0_139 = arith.constant 0 : index
    %343 = vector.load %arg9[%c0_138, %c0_139] : memref<128x128xf32, #tpu.memory_space<vmem>>, vector<128x128xf32>
    %cst_140 = arith.constant dense<0.000000e+00> : vector<8x128xf32>
    %344 = tpu.matmul %342, %343, %cst_140 {dimension_numbers = #tpu.dot_dimension_numbers<[1], [0], [0], [1], [0, 0, 1, 1], [], []>} : vector<8x128xf32>, vector<128x128xf32>, vector<8x128xf32> -> vector<8x128xf32>
    %c0_141 = arith.constant 0 : index
    %c0_142 = arith.constant 0 : index
    %345 = vector.load %arg10[%c0_141, %c0_142] : memref<1x128xf32, #tpu.memory_space<vmem>>, vector<1x128xf32>
    %346 = vector.broadcast %345 : vector<1x128xf32> to vector<8x128xf32>
    %347 = arith.addf %344, %346 : vector<8x128xf32>
    %c0_143 = arith.constant 0 : index
    %c0_144 = arith.constant 0 : index
    %348 = vector.load %arg11[%c0_143, %c0_144] : memref<8x128xf32, #tpu.memory_space<vmem>>, vector<8x128xf32>
    tpu.vector_store %arg11[%c0_143, %c0_144], %347 {strides = array<i32>} : memref<8x128xf32, #tpu.memory_space<vmem>>, vector<8x128xf32>,
    return
  }
  func.func @transform_0(%arg0: i32) -> (i32, i32, i32) {
    %c0_i32 = arith.constant 0 : i32
    %c0_i32_0 = arith.constant 0 : i32
    %c0_i32_1 = arith.constant 0 : i32
    return %arg0, %c0_i32, %c0_i32_0 : i32, i32, i32
  }
  func.func @transform_1(%arg0: i32) -> (i32, i32) {
    %c0_i32 = arith.constant 0 : i32
    %c0_i32_0 = arith.constant 0 : i32
    %c0_i32_1 = arith.constant 0 : i32
    return %c0_i32, %c0_i32_0 : i32, i32
  }
  func.func @transform_2(%arg0: i32) -> (i32, i32) {
    %c0_i32 = arith.constant 0 : i32
    %c0_i32_0 = arith.constant 0 : i32
    %c0_i32_1 = arith.constant 0 : i32
    return %c0_i32, %c0_i32_0 : i32, i32
  }
  func.func @transform_3(%arg0: i32) -> (i32, i32) {
    %c0_i32 = arith.constant 0 : i32
    %c0_i32_0 = arith.constant 0 : i32
    %c0_i32_1 = arith.constant 0 : i32
    return %c0_i32, %c0_i32_0 : i32, i32
  }
  func.func @transform_4(%arg0: i32) -> (i32, i32) {
    %c0_i32 = arith.constant 0 : i32
    %c0_i32_0 = arith.constant 0 : i32
    %c0_i32_1 = arith.constant 0 : i32
    return %c0_i32, %c0_i32_0 : i32, i32
  }
  func.func @transform_5(%arg0: i32) -> (i32, i32) {
    %c0_i32 = arith.constant 0 : i32
    %c0_i32_0 = arith.constant 0 : i32
    %c0_i32_1 = arith.constant 0 : i32
    return %c0_i32, %c0_i32_0 : i32, i32
  }
  func.func @transform_6(%arg0: i32) -> (i32, i32) {
    %c0_i32 = arith.constant 0 : i32
    %c0_i32_0 = arith.constant 0 : i32
    %c0_i32_1 = arith.constant 0 : i32
    return %c0_i32, %c0_i32_0 : i32, i32
  }
  func.func @transform_7(%arg0: i32) -> (i32, i32) {
    %c0_i32 = arith.constant 0 : i32
    %c0_i32_0 = arith.constant 0 : i32
    %c0_i32_1 = arith.constant 0 : i32
    return %c0_i32, %c0_i32_0 : i32, i32
  }
  func.func @transform_8(%arg0: i32) -> (i32, i32) {
    %c0_i32 = arith.constant 0 : i32
    %c0_i32_0 = arith.constant 0 : i32
    %c0_i32_1 = arith.constant 0 : i32
    return %c0_i32, %c0_i32_0 : i32, i32
  }
  func.func @transform_9(%arg0: i32) -> (i32, i32) {
    %c0_i32 = arith.constant 0 : i32
    %c0_i32_0 = arith.constant 0 : i32
    %c0_i32_1 = arith.constant 0 : i32
    return %c0_i32, %c0_i32_0 : i32, i32
  }
  func.func @transform_10(%arg0: i32) -> (i32, i32) {
    %c0_i32 = arith.constant 0 : i32
    %c0_i32_0 = arith.constant 0 : i32
    return %arg0, %c0_i32 : i32, i32
  }
}

</mosaic_0001>

<bundles_post_ra>
// kernel: tpu_custom_call.1
= control target key start
LH: loop header
LB: loop body
LE: loop exit
PB: predicated region body
PF: predicated region fallthrough
CT: control target
= control target key end

     0   :  { %15 = vsyncpa [#allocation4], 0  ;;  %s5987_s0 = inlined_call_operand.hbm [shape: f32[8,8,128], index: 0, kind: input, shape index: {}]   ;;  %s5988_s1 = inlined_call_operand.hbm [shape: f32[128,384], index: 1, kind: input, shape index: {}]   ;;  %s5989_s2 = inlined_call_operand.vmem [shape: f32[1,384], index: 2, kind: input, shape index: {}]   ;;  %s5990_s3 = inlined_call_operand.hbm [shape: f32[128,128], index: 3, kind: input, shape index: {}]   ;;  %s5991_s4 = inlined_call_operand.vmem [shape: f32[1,128], index: 4, kind: input, shape index: {}]   ;;  %s5992_s5 = inlined_call_operand.hbm [shape: f32[128,512], index: 5, kind: input, shape index: {}]   ;;  %s5993_s6 = inlined_call_operand.hbm [shape: f32[128,512], index: 6, kind: input, shape index: {}]   ;;  %s5994_s7 = inlined_call_operand.vmem [shape: f32[1,512], index: 7, kind: input, shape index: {}]   ;;  %s5995_s8 = inlined_call_operand.hbm [shape: f32[128,128], index: 8, kind: input, shape index: {}]   ;;  %s5996_s9 = inlined_call_operand.vmem [shape: f32[1,128], index: 9, kind: input, shape index: {}]   ;;  %s5997_s10 = inlined_call_operand.hbm [shape: f32[8,128], index: 10, kind: output, shape index: {}]  }
   0x1   :  { %16 = vsyncpa [#allocation7], 0 }
   0x2   :  { %17 = vsyncpa [#allocation10], 0 }
   0x3   :  { %18 = vsyncpa [#allocation13], 0 }
   0x4   :  { %19 = vsyncpa [#allocation5], 0  ;;  %s5167_s13 = smov [#allocation6]   ;;  %s5003_s17 = scalar_lea.hbm %s5988_s1, 6144 }
   0x5   :  { %s37_s14 = sshll.u32 %s5167_s13, 4  ;;  %p5004_p0 = scmp.ne.s32.totalorder %s5988_s1, %s5003_s17  ;;  %s38_s14 = int_to_ptr.vmem [resolvable:$true] %s37_s14 }
   0x6   :  { %p5007_p1 = scmp.lt.u32.totalorder %s5003_s17, %s5988_s1 }
   0x8   :  { %p5009_p2 = pnand %p5007_p1, %p5004_p0 }
   0xa   :  { %5012 = shalt.err (!%p5009_p2)
}
   0xb   :  { %s5013_s22 = scalar_lea.vmem %s38_s14, 6144  ;;  %p5018_p4 = scmp.lt.s32.totalorder %s38_s14, %s38_s14 }
   0xc   :  { %p5014_p3 = scmp.ne.s32.totalorder %s38_s14, %s5013_s22  ;;  %p5019_p5 = scmp.lt.s32.totalorder %s5013_s22, %s5013_s22 }
   0xe   :  { %p5020_p6 = por %p5019_p5, %p5018_p4 }
  0x10   :  { %p5021_p7 = pnand %p5020_p6, %p5014_p3 }
  0x12   :  { %5024 = shalt.err (!%p5021_p7)
}
  0x13   :  { %s5168_s23 = smov 384   ;;  %s5169_s24 = smov 24  }
  0x14   :  { %43 = dma.hbm_to_vmem [thread:$0]  %s5988_s1, 6144, %s38_s14, [#allocation7], %s5168_s23, %s5168_s23, %s5169_s24  }
  0x15   :  { %s5170_s27 = smov [#allocation9]   ;;  %s5025_s11 = scalar_lea.hbm %s5992_s5, 8192 }
  0x16   :  { %s65_s28 = sshll.u32 %s5170_s27, 4  ;;  %p5026_p8 = scmp.ne.s32.totalorder %s5992_s5, %s5025_s11  ;;  %s66_s28 = int_to_ptr.vmem [resolvable:$true] %s65_s28 }
  0x17   :  { %p5029_p9 = scmp.lt.u32.totalorder %s5025_s11, %s5992_s5 }
  0x19   :  { %p5031_p10 = pnand %p5029_p9, %p5026_p8 }
  0x1b   :  { %5034 = shalt.err (!%p5031_p10)
}
  0x1c   :  { %s5035_s17 = scalar_lea.vmem %s66_s28, 8192  ;;  %p5040_p12 = scmp.lt.s32.totalorder %s66_s28, %s66_s28 }
  0x1d   :  { %p5036_p11 = scmp.ne.s32.totalorder %s66_s28, %s5035_s17  ;;  %p5041_p13 = scmp.lt.s32.totalorder %s5035_s17, %s5035_s17 }
  0x1f   :  { %p5042_p0 = por %p5041_p13, %p5040_p12 }
  0x21   :  { %p5043_p1 = pnand %p5042_p0, %p5036_p11 }
  0x23   :  { %5046 = shalt.err (!%p5043_p1)
}
  0x24   :  { %s5171_s1 = smov 512   ;;  %s5172_s14 = smov 32  }
  0x25   :  { %71 = dma.hbm_to_vmem [thread:$0]  %s5992_s5, 8192, %s66_s28, [#allocation10], %s5171_s1, %s5171_s1, %s5172_s14  }
  0x26   :  { %s5173_s20 = smov [#allocation3]   ;;  %s5047_s24 = scalar_lea.hbm %s5987_s0, 1024 }
  0x27   :  { %s25_s21 = sshll.u32 %s5173_s20, 4  ;;  %p5048_p2 = scmp.ne.s32.totalorder %s5987_s0, %s5047_s24  ;;  %s26_s21 = int_to_ptr.vmem [resolvable:$true] %s25_s21 }
  0x28   :  { %p5051_p3 = scmp.lt.u32.totalorder %s5047_s24, %s5987_s0 }
  0x2a   :  { %p5053_p4 = pnand %p5051_p3, %p5048_p2 }
  0x2c   :  { %5056 = shalt.err (!%p5053_p4)
}
  0x2d   :  { %s5057_s30 = scalar_lea.vmem %s26_s21, 1024  ;;  %p5062_p6 = scmp.lt.s32.totalorder %s26_s21, %s26_s21 }
  0x2e   :  { %p5058_p5 = scmp.ne.s32.totalorder %s26_s21, %s5057_s30  ;;  %p5063_p7 = scmp.lt.s32.totalorder %s5057_s30, %s5057_s30 }
  0x30   :  { %p5064_p8 = por %p5063_p7, %p5062_p6 }
  0x32   :  { %p5065_p9 = pnand %p5064_p8, %p5058_p5 }
  0x34   :  { %5068 = shalt.err (!%p5065_p9)
}
  0x35   :  { %s5174_s5 = smov 128   ;;  %s5175_s28 = smov 8  }
  0x36   :  { %31 = dma.hbm_to_vmem [thread:$0]  %s5987_s0, 1024, %s26_s21, [#allocation4], %s5174_s5, %s5174_s5, %s5175_s28  }
  0x37   :  { %s5176_s13 = smov [#allocation8]   ;;  %s5177_s16 = smov [#allocation11]  }
  0x38   :  { %s51_s15 = sshll.u32 %s5176_s13, 4  ;;  %s77_s17 = sshll.u32 %s5177_s16, 4  ;;  %s52_s15 = int_to_ptr.vmem [resolvable:$true] %s51_s15  ;;  %s78_s17 = int_to_ptr.vmem [resolvable:$true] %s77_s17 }
  0x39   :  { %s5069_s20 = scalar_lea.hbm %s5990_s3, 2048 }
  0x3a   :  { %p5070_p10 = scmp.ne.s32.totalorder %s5990_s3, %s5069_s20  ;;  %p5073_p11 = scmp.lt.u32.totalorder %s5069_s20, %s5990_s3 }
  0x3c   :  { %p5075_p12 = pnand %p5073_p11, %p5070_p10 }
  0x3e   :  { %5078 = shalt.err (!%p5075_p12)
}
  0x3f   :  { %s5079_s0 = scalar_lea.vmem %s52_s15, 2048  ;;  %p5084_p0 = scmp.lt.s32.totalorder %s52_s15, %s52_s15 }
  0x40   :  { %p5080_p13 = scmp.ne.s32.totalorder %s52_s15, %s5079_s0  ;;  %p5085_p1 = scmp.lt.s32.totalorder %s5079_s0, %s5079_s0 }
  0x42   :  { %p5086_p2 = por %p5085_p1, %p5084_p0 }
  0x44   :  { %p5087_p3 = pnand %p5086_p2, %p5080_p13 }
  0x46   :  { %5090 = shalt.err (!%p5087_p3)
}
  0x47   :  { %57 = dma.hbm_to_vmem [thread:$0]  %s5990_s3, 2048, %s52_s15, [#allocation7], %s5174_s5, %s5174_s5, %s5175_s28  }
  0x48   :  { %s5091_s30 = scalar_lea.hbm %s5993_s6, 8192 }
  0x49   :  { %p5092_p4 = scmp.ne.s32.totalorder %s5993_s6, %s5091_s30  ;;  %p5095_p5 = scmp.lt.u32.totalorder %s5091_s30, %s5993_s6 }
  0x4b   :  { %p5097_p6 = pnand %p5095_p5, %p5092_p4 }
  0x4d   :  { %5100 = shalt.err (!%p5097_p6)
}
  0x4e   :  { %s5101_s18 = scalar_lea.vmem %s78_s17, 8192  ;;  %p5106_p8 = scmp.lt.s32.totalorder %s78_s17, %s78_s17 }
  0x4f   :  { %p5102_p7 = scmp.ne.s32.totalorder %s78_s17, %s5101_s18  ;;  %p5107_p9 = scmp.lt.s32.totalorder %s5101_s18, %s5101_s18 }
  0x51   :  { %p5108_p10 = por %p5107_p9, %p5106_p8 }
  0x53   :  { %p5109_p11 = pnand %p5108_p10, %p5102_p7 }
  0x55   :  { %5112 = shalt.err (!%p5109_p11)
}
  0x56   :  { %83 = dma.hbm_to_vmem [thread:$0]  %s5993_s6, 8192, %s78_s17, [#allocation10], %s5171_s1, %s5171_s1, %s5172_s14  }
  0x57   :  { %s5178_s19 = smov [#allocation12]   ;;  %s5113_s24 = scalar_lea.hbm %s5995_s8, 2048 }
  0x58   :  { %s91_s20 = sshll.u32 %s5178_s19, 4  ;;  %p5114_p12 = scmp.ne.s32.totalorder %s5995_s8, %s5113_s24  ;;  %s92_s20 = int_to_ptr.vmem [resolvable:$true] %s91_s20 }
  0x59   :  { %p5117_p13 = scmp.lt.u32.totalorder %s5113_s24, %s5995_s8 }
  0x5b   :  { %p5119_p0 = pnand %p5117_p13, %p5114_p12 }
  0x5d   :  { %5122 = shalt.err (!%p5119_p0)
}
  0x5e   :  { %s5123_s27 = scalar_lea.vmem %s92_s20, 2048  ;;  %p5128_p2 = scmp.lt.s32.totalorder %s92_s20, %s92_s20 }
  0x5f   :  { %p5124_p1 = scmp.ne.s32.totalorder %s92_s20, %s5123_s27  ;;  %p5129_p3 = scmp.lt.s32.totalorder %s5123_s27, %s5123_s27 }
  0x61   :  { %p5130_p4 = por %p5129_p3, %p5128_p2 }
  0x63   :  { %p5131_p5 = pnand %p5130_p4, %p5124_p1 }
  0x65   :  { %5134 = shalt.err (!%p5131_p5)
}
  0x66   :  { %97 = dma.hbm_to_vmem [thread:$0]  %s5995_s8, 2048, %s92_s20, [#allocation13], %s5174_s5, %s5174_s5, %s5175_s28  }
  0x67   :  { %5157 = dma.done.wait [#allocation4], 1024  }
  0x68   :  { %5158 = vsyncadd [#allocation4], 4294966272 }
  0x69   :  { %5159 = dma.done.wait [#allocation7], 8192  }
  0x6a   :  { %5160 = vsyncadd [#allocation7], 4294959104 }
  0x6b   :  { %5161 = dma.done.wait [#allocation10], 16384  }
  0x6c   :  { %5162 = vsyncadd [#allocation10], 4294950912 }
  0x6d   :  { %5163 = dma.done.wait [#allocation13], 2048  }
  0x6e   :  { %5164 = vsyncadd [#allocation13], 4294965248  ;;  %v5179_v0 = vmov 0.0   ;;  %v127_v1 = vld [vmem:[#allocation6 + $0x8] sm:$0xff]  ;;  %v130_v2 = vld [vmem:[#allocation6 + $0x20] sm:$0xff]  ;;  %vm5180_vm0 = vmmov 0  }
  0x6f   :  { %255 = vmatprep.mubr.f32.mxu0 %v5179_v0  ;;  %v126_v3 = vld [vmem:[#allocation6] sm:$0xff]  ;;  %v4111_v4 = vpack.c.bf16 %v130_v2, %v127_v1  ;;  %v129_v5 = vld [vmem:[#allocation6 + $0x18] sm:$0xff]  ;;  %v136_v7 = vld [vmem:[#allocation6 + $0x50] sm:$0xff]  ;;  %vm977_vm1 = vcmask 64512   ;;  %s5184_s29 = smov [#allocation14]  }
  0x70   :  { %v133_v6 = vld [vmem:[#allocation6 + $0x38] sm:$0xff]  ;;  %v4113_v8 = vpack.c.bf16 %v129_v5, %v126_v3  ;;  %v132_v10 = vld [vmem:[#allocation6 + $0x30] sm:$0xff]  ;;  %v135_v11 = vld [vmem:[#allocation6 + $0x48] sm:$0xff]  ;;  %s3789_s30 = sshll.u32 %s5184_s29, 4  ;;  %s3790_s30 = int_to_ptr.vmem [resolvable:$true] %s3789_s30 }
  0x71   :  { %v4115_v9 = vpack.c.bf16 %v136_v7, %v133_v6  ;;  %v139_v12 = vld [vmem:[#allocation6 + $0x68] sm:$0xff]  ;;  %4112 = vmatprep.subr.bf16.mxu0 %v4111_v4  ;;  %v142_v13 = vld [vmem:[#allocation6 + $0x80] sm:$0xff]  ;;  %v4117_v14 = vpack.c.bf16 %v135_v11, %v132_v10  ;;  %v141_v17 = vld [vmem:[#allocation6 + $0x78] sm:$0xff]  ;;  %s5135_s11 = scalar_lea.vmem %s3790_s30, 128  ;;  %p5140_p7 = scmp.lt.s32.totalorder %s3790_s30, %s3790_s30 }
  0x72   :  { %4114 = vmatpush1.bf16.msra.mxu0 %v4113_v8  ;;  %v4119_v15 = vpack.c.bf16 %v142_v13, %v139_v12  ;;  %v138_v16 = vld [vmem:[#allocation6 + $0x60] sm:$0xff]  ;;  %v145_v18 = vld [vmem:[#allocation6 + $0x98] sm:$0xff]  ;;  %v148_v19 = vld [vmem:[#allocation6 + $0xb0] sm:$0xff]  ;;  %p5136_p6 = scmp.ne.s32.totalorder %s3790_s30, %s5135_s11  ;;  %p5141_p8 = scmp.lt.s32.totalorder %s5135_s11, %s5135_s11 }
  0x73   :  { %4116 = vmatprep.subr.bf16.mxu0 %v4115_v9  ;;  %v4121_v20 = vpack.c.bf16 %v141_v17, %v138_v16  ;;  %v4123_v21 = vpack.c.bf16 %v148_v19, %v145_v18  ;;  %v144_v22 = vld [vmem:[#allocation6 + $0x90] sm:$0xff]  ;;  %v147_v23 = vld [vmem:[#allocation6 + $0xa8] sm:$0xff]  ;;  %v154_v25 = vld [vmem:[#allocation6 + $0xe0] sm:$0xff]  ;;  %v176_v18 = vlaneseq }
  0x74   :  { %v151_v24 = vld [vmem:[#allocation6 + $0xc8] sm:$0xff]  ;;  %v5328_v26 = vld [vmem:[#allocation3] sm:$0xff]  ;;  %v4125_v27 = vpack.c.bf16 %v147_v23, %v144_v22  ;;  %v153_v29 = vld [vmem:[#allocation6 + $0xd8] sm:$0xff]  ;;  %p5142_p9 = por %p5141_p8, %p5140_p7 }
  0x75   :  { %3940 = vmatprep.mubr.f32.mxu1 %v5328_v26  ;;  %v150_v28 = vld [vmem:[#allocation6 + $0xc0] sm:$0xff]  ;;  %v4127_v30 = vpack.c.bf16 %v154_v25, %v151_v24  ;;  %v157_v31 = vld [vmem:[#allocation6 + $0xf8] sm:$0xff]  ;;  %v128_v32 = vld [vmem:[#allocation6 + $0x10] sm:$0xff]  ;;  %v5373_v19 = vshrl.u32 %v176_v18, 7 }
  0x76   :  { %4118 = vmatpush1.bf16.msra.mxu0 %v4117_v14  ;;  %v131_v33 = vld [vmem:[#allocation6 + $0x28] sm:$0xff]  ;;  %v160_v34 = vld [vmem:[#allocation6 + $0x110] sm:$0xff]  ;;  %v134_v36 = vld [vmem:[#allocation6 + $0x40] sm:$0xff]  ;;  %v4129_v41 = vpack.c.bf16 %v153_v29, %v150_v28  ;;  %p5143_p10 = pnand %p5142_p9, %p5136_p6 }
  0x77   :  { %4120 = vmatprep.subr.bf16.mxu0 %v4119_v15  ;;  %v4143_v35 = vpack.c.bf16 %v131_v33, %v128_v32  ;;  %v137_v37 = vld [vmem:[#allocation6 + $0x58] sm:$0xff]  ;;  %v140_v39 = vld [vmem:[#allocation6 + $0x70] sm:$0xff]  ;;  %v143_v40 = vld [vmem:[#allocation6 + $0x88] sm:$0xff]  ;;  %v4131_v42 = vpack.c.bf16 %v160_v34, %v157_v31  ;;  %v178_v22 = vsub.s32 0, %v5373_v19 }
  0x78   :  { %v4147_v38 = vpack.c.bf16 %v137_v37, %v134_v36  ;;  %v156_v43 = vld [vmem:[#allocation6 + $0xf0] sm:$0xff]  ;;  %v159_v44 = vld [vmem:[#allocation6 + $0x108] sm:$0xff]  ;;  %v166_v46 = vld [vmem:[#allocation6 + $0x140] sm:$0xff]  ;;  %v4151_v47 = vpack.c.bf16 %v143_v40, %v140_v39 }
  0x79   :  { %4144 = vmatprep.subr.bf16.mxu1 %v4143_v35  ;;  %v163_v45 = vld [vmem:[#allocation6 + $0x128] sm:$0xff]  ;;  %v146_v48 = vld [vmem:[#allocation6 + $0xa0] sm:$0xff]  ;;  %v149_v49 = vld [vmem:[#allocation6 + $0xb8] sm:$0xff]  ;;  %v4133_v50 = vpack.c.bf16 %v159_v44, %v156_v43 }
  0x7a   :  { %4122 = vmatpush1.bf16.msra.mxu0 %v4121_v20  ;;  %4146 = vmatpush3.bf16.msra.mxu1 %v4143_v35  ;;  %v4135_v51 = vpack.c.bf16 %v166_v46, %v163_v45  ;;  %v162_v52 = vld [vmem:[#allocation6 + $0x120] sm:$0xff]  ;;  %v165_v53 = vld [vmem:[#allocation6 + $0x138] sm:$0xff]  ;;  %v172_v55 = vld [vmem:[#allocation6 + $0x170] sm:$0xff]  ;;  %v4155_v56 = vpack.c.bf16 %v149_v49, %v146_v48  ;;  %v182_v20 = vsub.s32 1, %v5373_v19 }
  0x7b   :  { %4124 = vmatprep.subr.bf16.mxu0 %v4123_v21  ;;  %4148 = vmatprep.subr.bf16.mxu1 %v4147_v38  ;;  %v169_v54 = vld [vmem:[#allocation6 + $0x158] sm:$0xff]  ;;  %v152_v57 = vld [vmem:[#allocation6 + $0xd0] sm:$0xff]  ;;  %v155_v58 = vld [vmem:[#allocation6 + $0xe8] sm:$0xff]  ;;  %v4137_v59 = vpack.c.bf16 %v165_v53, %v162_v52 }
  0x7c   :  { %v4139_v60 = vpack.c.bf16 %v172_v55, %v169_v54  ;;  %v168_v61 = vld [vmem:[#allocation6 + $0x150] sm:$0xff]  ;;  %v171_v62 = vld [vmem:[#allocation6 + $0x168] sm:$0xff]  ;;  %v4159_v63 = vpack.c.bf16 %v155_v58, %v152_v57  ;;  %v158_v1 = vld [vmem:[#allocation6 + $0x100] sm:$0xff] }
  0x7d   :  { %v161_v2 = vld [vmem:[#allocation6 + $0x118] sm:$0xff]  ;;  %v4141_v3 = vpack.c.bf16 %v171_v62, %v168_v61  ;;  %v164_v5 = vld [vmem:[#allocation6 + $0x130] sm:$0xff]  ;;  %v167_v6 = vld [vmem:[#allocation6 + $0x148] sm:$0xff] }
  0x7e   :  { %4126 = vmatpush1.bf16.msra.mxu0 %v4125_v27  ;;  %4150 = vmatpush3.bf16.msra.mxu1 %v4147_v38  ;;  %v4163_v4 = vpack.c.bf16 %v161_v2, %v158_v1  ;;  %v4167_v7 = vpack.c.bf16 %v167_v6, %v164_v5  ;;  %v170_v8 = vld [vmem:[#allocation6 + $0x160] sm:$0xff]  ;;  %v173_v9 = vld [vmem:[#allocation6 + $0x178] sm:$0xff]  ;;  %v5334_v10 = vld [vmem:[#allocation3 + $0x8] sm:$0xff]  ;;  %v186_v38 = vsub.s32 2, %v5373_v19 }
  0x7f   :  { %4128 = vmatprep.subr.bf16.mxu0 %v4127_v30  ;;  %4152 = vmatprep.subr.bf16.mxu1 %v4151_v47  ;;  %v4171_v11 = vpack.c.bf16 %v173_v9, %v170_v8  ;;  %v5338_v12 = vld [vmem:[#allocation3 + $0x10] sm:$0xff]  ;;  %v5342_v13 = vld [vmem:[#allocation3 + $0x18] sm:$0xff]  ;;  %v5347_v14 = vld [vmem:[#allocation3 + $0x20] sm:$0xff] }
  0x80   :  { %v5353_v15 = vld [vmem:[#allocation3 + $0x28] sm:$0xff]  ;;  %v5359_v16 = vld [vmem:[#allocation3 + $0x30] sm:$0xff]  ;;  %v5364_v17 = vld [vmem:[#allocation3 + $0x38] sm:$0xff] }
  0x81   :  { %v174_v21 = vld [vmem:[%s5989_s2] sm:$0x7] }
  0x82   :  { %4130 = vmatpush1.bf16.msra.mxu0 %v4129_v41  ;;  %4154 = vmatpush3.bf16.msra.mxu1 %v4151_v47  ;;  %v5382_v23 = vrot.slane %v174_v21, %v182_v20  ;;  %v5386_v25 = vrot.slane %v174_v21, %v178_v22  ;;  %v187_v45 = vrot.slane %v174_v21, %v186_v38 }
  0x83   :  { %4132 = vmatprep.subr.bf16.mxu0 %v4131_v42  ;;  %4156 = vmatprep.subr.bf16.mxu1 %v4155_v56 }
  0x86   :  { %4134 = vmatpush1.bf16.msra.mxu0 %v4133_v50  ;;  %4158 = vmatpush3.bf16.msra.mxu1 %v4155_v56 }
  0x87   :  { %4136 = vmatprep.subr.bf16.mxu0 %v4135_v51  ;;  %4160 = vmatprep.subr.bf16.mxu1 %v4159_v63 }
  0x8a   :  { %4138 = vmatpush1.bf16.msra.mxu0 %v4137_v59  ;;  %4162 = vmatpush3.bf16.msra.mxu1 %v4159_v63 }
  0x8b   :  { %4140 = vmatprep.subr.bf16.mxu0 %v4139_v60  ;;  %4164 = vmatprep.subr.bf16.mxu1 %v4163_v4 }
  0x8e   :  { %4142 = vmatpush1.bf16.msra.mxu0 %v4141_v3  ;;  %4166 = vmatpush3.bf16.msra.mxu1 %v4163_v4 }
  0x8f   :  { %3972 = vmatprep.subr.mxu0 %v5179_v0  ;;  %4168 = vmatprep.subr.bf16.mxu1 %v4167_v7 }
  0x91   :  { %256 = vmatmul.mubr.f32.vlgmr.msra.gmra.mrb[0].mxu0 %v5328_v26 }
  0x92   :  { %261 = vmatprep.mubr.f32.mxu0 %v5179_v0  ;;  %4170 = vmatpush3.bf16.msra.mxu1 %v4167_v7 }
  0x93   :  { %4172 = vmatprep.subr.bf16.mxu1 %v4171_v11 }
  0x95   :  { %262 = vmatmul.mubr.f32.gmra.mrb[2].mxu0 %v5334_v10 }
  0x96   :  { %267 = vmatprep.mubr.f32.mxu0 %v5179_v0  ;;  %4174 = vmatpush3.bf16.msra.mxu1 %v4171_v11 }
  0x97   :  { %3952 = vmatprep.subr.mxu1 %v5179_v0 }
  0x99   :  { %268 = vmatmul.mubr.f32.gmra.mrb[4].mxu0 %v5338_v12  ;;  %3941 = vmatmul.mubr.f32.vlgmr.msra.gmra.mrb[0].mxu1 %v5334_v10 }
  0x9a   :  { %273 = vmatprep.mubr.f32.mxu0 %v5179_v0  ;;  %3943 = vmatprep.mubr.f32.mxu1 %v5338_v12 }
  0x9d   :  { %274 = vmatmul.mubr.f32.gmra.mrb[6].mxu0 %v5342_v13  ;;  %3944 = vmatmul.mubr.f32.gmra.mrb[2].mxu1 %v5342_v13 }
  0x9e   :  { %279 = vmatprep.mubr.f32.mxu0 %v5179_v0  ;;  %3946 = vmatprep.mubr.f32.mxu1 %v5347_v14 }
  0xa1   :  { %280 = vmatmul.mubr.f32.gmra.mrb[8].mxu0 %v5347_v14  ;;  %3947 = vmatmul.mubr.f32.gmra.mrb[4].mxu1 %v5353_v15 }
  0xa2   :  { %285 = vmatprep.mubr.f32.mxu0 %v5179_v0  ;;  %3949 = vmatprep.mubr.f32.mxu1 %v5359_v16 }
  0xa5   :  { %286 = vmatmul.mubr.f32.gmra.mrb[10].mxu0 %v5353_v15  ;;  %3950 = vmatmul.mubr.f32.gmra.mrb[6].mxu1 %v5364_v17 }
  0xa6   :  { %291 = vmatprep.mubr.f32.mxu0 %v5179_v0  ;;  %3954 = vmatprep.mubr.msk.f32.mxu1 %vm5180_vm0, %v5179_v0 }
  0xa9   :  { %292 = vmatmul.mubr.f32.gmra.mrb[12].mxu0 %v5359_v16 }
  0xaa   :  { %297 = vmatprep.mubr.f32.mxu0 %v5179_v0 }
  0xad   :  { %298 = vmatmul.mubr.f32.gmra.mrb[14].mxu0 %v5364_v17 }
  0xae   :  { %3974 = vmatprep.mubr.msk.f32.mxu0 %vm5180_vm0, %v5179_v0 }
 0x164   :  { %v257_v24 = vpop.f32.mrb[0].mxu0 }
 0x165   :  { %v259_v27 = vpop.f32.mrb[1].mxu0  ;;  %v258_v30 = vadd.f32 %v257_v24, %v5386_v25 }
 0x166   :  { %v260_v28 = vadd.f32 %v259_v27, %v5382_v23 }
 0x168   :  { %v263_v29 = vpop.f32.mrb[2].mxu0  ;;  %3953 = vmatpush3.xpose.msra.mxu1 %v260_v28 }
 0x169   :  { %v265_v31 = vpop.f32.mrb[3].mxu0  ;;  %3957 = vmatprep.subr.mxu1 %v5179_v0  ;;  %v264_v34 = vadd.f32 %v263_v29, %v5386_v25 }
 0x16a   :  { %v266_v32 = vadd.f32 %v265_v31, %v5382_v23 }
 0x16b   :  { %3955 = vmatmul.mubr.f32.vlgmr.msra.gmra.mrb[8].mxu1 %v258_v30 }
 0x16c   :  { %v269_v33 = vpop.f32.mrb[4].mxu0  ;;  %3958 = vmatpush3.xpose.msra.mxu1 %v266_v32  ;;  %3959 = vmatprep.mubr.msk.f32.mxu1 %vm5180_vm0, %v5179_v0  ;;  %v3942_v41 = vpop.f32.mrb[0].mxu1 }
 0x16d   :  { %v271_v35 = vpop.f32.mrb[5].mxu0  ;;  %3962 = vmatprep.subr.mxu1 %v5179_v0  ;;  %v270_v39 = vadd.f32 %v269_v33, %v5386_v25  ;;  %v370_v43 = vpop.f32.mrb[1].mxu1  ;;  %v376_v18 = vadd.f32 %v3942_v41, %v187_v45 }
 0x16e   :  { %v272_v36 = vadd.f32 %v271_v35, %v5382_v23  ;;  %v371_v7 = vadd.f32 %v370_v43, %v187_v45 }
 0x16f   :  { %3960 = vmatmul.mubr.f32.vlgmr.msra.gmra.mrb[10].mxu1 %v264_v34 }
 0x170   :  { %v275_v37 = vpop.f32.mrb[6].mxu0  ;;  %3963 = vmatpush3.xpose.msra.mxu1 %v272_v36  ;;  %3964 = vmatprep.mubr.msk.f32.mxu1 %vm5180_vm0, %v5179_v0  ;;  %v3945_v48 = vpop.f32.mrb[2].mxu1 }
 0x171   :  { %v277_v40 = vpop.f32.mrb[7].mxu0  ;;  %3967 = vmatprep.subr.mxu1 %v5179_v0  ;;  %v276_v46 = vadd.f32 %v275_v37, %v5386_v25  ;;  %v5410_v50 = vadd.f32 %v3945_v48, %v187_v45  ;;  %v380_v51 = vpop.f32.mrb[3].mxu1 }
 0x172   :  { %v278_v42 = vadd.f32 %v277_v40, %v5382_v23  ;;  %v5412_v52 = vadd.f32 %v380_v51, %v187_v45 }
 0x173   :  { %3965 = vmatmul.mubr.f32.vlgmr.msra.gmra.mrb[12].mxu1 %v270_v39 }
 0x174   :  { %v281_v44 = vpop.f32.mrb[8].mxu0  ;;  %3968 = vmatpush3.xpose.msra.mxu1 %v278_v42  ;;  %3969 = vmatprep.mubr.msk.f32.mxu1 %vm5180_vm0, %v5179_v0  ;;  %v3948_v56 = vpop.f32.mrb[4].mxu1 }
 0x175   :  { %v283_v47 = vpop.f32.mrb[9].mxu0  ;;  %3977 = vmatprep.subr.mxu1 %v5179_v0  ;;  %v282_v54 = vadd.f32 %v281_v44, %v5386_v25  ;;  %v5419_v58 = vadd.f32 %v3948_v56, %v187_v45  ;;  %v390_v59 = vpop.f32.mrb[5].mxu1 }
 0x176   :  { %v284_v49 = vadd.f32 %v283_v47, %v5382_v23  ;;  %v5421_v60 = vadd.f32 %v390_v59, %v187_v45 }
 0x177   :  { %3970 = vmatmul.mubr.f32.vlgmr.msra.gmra.mrb[14].mxu1 %v276_v46 }
 0x178   :  { %v287_v53 = vpop.f32.mrb[10].mxu0  ;;  %3973 = vmatpush3.xpose.msra.mxu0 %v284_v49  ;;  %3979 = vmatprep.mubr.msk.f32.mxu1 %vm5180_vm0, %v5179_v0  ;;  %v3951_v1 = vpop.f32.mrb[6].mxu1 }
 0x179   :  { %v289_v55 = vpop.f32.mrb[11].mxu0  ;;  %3982 = vmatprep.subr.mxu0 %v5179_v0  ;;  %v288_v62 = vadd.f32 %v287_v53, %v5386_v25  ;;  %v5428_v3 = vadd.f32 %v3951_v1, %v187_v45  ;;  %v400_v4 = vpop.f32.mrb[7].mxu1 }
 0x17a   :  { %v290_v57 = vadd.f32 %v289_v55, %v5382_v23  ;;  %v5430_v5 = vadd.f32 %v400_v4, %v187_v45 }
 0x17b   :  { %3975 = vmatmul.mubr.f32.vlgmr.msra.gmra.mrb[16].mxu0 %v282_v54 }
 0x17c   :  { %v293_v61 = vpop.f32.mrb[12].mxu0  ;;  %3978 = vmatpush3.xpose.msra.mxu1 %v290_v57  ;;  %3984 = vmatprep.mubr.msk.f32.mxu0 %vm5180_vm0, %v5179_v0 }
 0x17d   :  { %v295_v63 = vpop.f32.mrb[13].mxu0  ;;  %3987 = vmatprep.subr.mxu1 %v5179_v0  ;;  %v294_v8 = vadd.f32 %v293_v61, %v5386_v25 }
 0x17e   :  { %v296_v2 = vadd.f32 %v295_v63, %v5382_v23 }
 0x17f   :  { %3980 = vmatmul.mubr.f32.vlgmr.msra.gmra.mrb[16].mxu1 %v288_v62 }
 0x180   :  { %v299_v6 = vpop.f32.mrb[14].mxu0  ;;  %3983 = vmatpush3.xpose.msra.mxu0 %v296_v2  ;;  %3989 = vmatprep.mubr.msk.f32.mxu1 %vm5180_vm0, %v5179_v0 }
 0x181   :  { %v301_v9 = vpop.f32.mrb[15].mxu0  ;;  %3992 = vmatprep.subr.mxu0 %v5179_v0  ;;  %v300_v21 = vadd.f32 %v299_v6, %v5386_v25 }
 0x182   :  { %v302_v11 = vadd.f32 %v301_v9, %v5382_v23 }
 0x183   :  { %3985 = vmatmul.mubr.f32.vlgmr.msra.gmra.mrb[18].mxu0 %v294_v8 }
 0x184   :  { %3988 = vmatpush3.xpose.msra.mxu1 %v302_v11  ;;  %3993 = vmatpush3.msra.mxu0 %v371_v7 }
 0x185   :  { %3997 = vmatprep.subr.mxu1 %v5179_v0  ;;  %3994 = vmatprep.mubr.msk.f32.mxu0 %vm5180_vm0, %v5179_v0 }
 0x186   :  { %4002 = vmatprep.subr.mxu0 %v5179_v0 }
 0x187   :  { %3990 = vmatmul.mubr.f32.vlgmr.msra.gmra.mrb[18].mxu1 %v300_v21 }
 0x188   :  { %3998 = vmatpush3.msra.mxu1 %v376_v18  ;;  %3999 = vmatprep.mubr.msk.f32.mxu1 %vm5180_vm0, %v5179_v0 }
 0x189   :  { %4007 = vmatprep.subr.mxu1 %v5179_v0 }
 0x23e   :  { %v475_v23 = vpop.f32.mrb[8].mxu1 }
 0x23f   :  { %v969_v24 = vmul.f32 0.35355338, %v475_v23  ;;  %v3956_v27 = vpop.f32.mrb[9].mxu1 }
 0x241   :  { %v978_v25 = vsel %vm977_vm1, %v969_v24, -inf }
 0x242   :  { %979 = vmax.xlane.f32.xlu0 %v978_v25  ;;  %v545_v28 = vpop.f32.mrb[10].mxu1 }
 0x243   :  { %v970_v29 = vmul.f32 0.35355338, %v545_v28  ;;  %v3961_v30 = vpop.f32.mrb[11].mxu1 }
 0x245   :  { %v981_v31 = vsel %vm977_vm1, %v970_v29, -inf }
 0x246   :  { %982 = vmax.xlane.f32.xlu0 %v981_v31  ;;  %v615_v32 = vpop.f32.mrb[12].mxu1 }
 0x247   :  { %v971_v33 = vmul.f32 0.35355338, %v615_v32  ;;  %v3966_v34 = vpop.f32.mrb[13].mxu1 }
 0x249   :  { %v984_v35 = vsel %vm977_vm1, %v971_v33, -inf }
 0x24a   :  { %985 = vmax.xlane.f32.xlu1 %v984_v35  ;;  %v685_v36 = vpop.f32.mrb[14].mxu1 }
 0x24b   :  { %v972_v37 = vmul.f32 0.35355338, %v685_v36  ;;  %v3971_v39 = vpop.f32.mrb[15].mxu1 }
 0x24d   :  { %v987_v40 = vsel %vm977_vm1, %v972_v37, -inf }
 0x24e   :  { %v755_v41 = vpop.f32.mrb[16].mxu0  ;;  %988 = vmax.xlane.f32.xlu1 %v987_v40 }
 0x24f   :  { %v973_v42 = vmul.f32 0.35355338, %v755_v41  ;;  %v3976_v43 = vpop.f32.mrb[17].mxu0 }
 0x251   :  { %v990_v44 = vsel %vm977_vm1, %v973_v42, -inf }
 0x252   :  { %991 = vmax.xlane.f32.xlu0 %v990_v44  ;;  %v825_v45 = vpop.f32.mrb[16].mxu1 }
 0x253   :  { %v974_v46 = vmul.f32 0.35355338, %v825_v45  ;;  %v3981_v47 = vpop.f32.mrb[17].mxu1 }
 0x255   :  { %v993_v48 = vsel %vm977_vm1, %v974_v46, -inf }
 0x256   :  { %v895_v49 = vpop.f32.mrb[18].mxu0  ;;  %994 = vmax.xlane.f32.xlu1 %v993_v48 }
 0x257   :  { %v975_v51 = vmul.f32 0.35355338, %v895_v49  ;;  %v3986_v53 = vpop.f32.mrb[19].mxu0 }
 0x259   :  { %v996_v54 = vsel %vm977_vm1, %v975_v51, -inf }
 0x25a   :  { %997 = vmax.xlane.f32.xlu0 %v996_v54  ;;  %v965_v55 = vpop.f32.mrb[18].mxu1 }
 0x25b   :  { %v976_v56 = vmul.f32 0.35355338, %v965_v55  ;;  %v3991_v57 = vpop.f32.mrb[19].mxu1 }
 0x25d   :  { %v999_v59 = vsel %vm977_vm1, %v976_v56, -inf }
 0x25e   :  { %1000 = vmax.xlane.f32.xlu1 %v999_v59 }
 0x2cf   :  { %v980_v61 = vpop.xlane.xlu0 %979 }
 0x2d0   :  { %v1002_v62 = vsub.f32 %v969_v24, %v980_v61 }
 0x2d2   :  { %v1010_v63 = vmul.f32 1.442695, %v1002_v62 }
 0x2d3   :  { %v983_v1 = vpop.xlane.xlu0 %982 }
 0x2d4   :  { %4889 = vpow2.f32 %v1010_v63  ;;  %v1003_v2 = vsub.f32 %v970_v29, %v983_v1 }
 0x2d6   :  { %v1012_v4 = vmul.f32 1.442695, %v1003_v2 }
 0x2d7   :  { %v986_v6 = vpop.xlane.xlu1 %985 }
 0x2d8   :  { %4891 = vpow2.f32 %v1012_v4  ;;  %v1004_v7 = vsub.f32 %v971_v33, %v986_v6 }
 0x2da   :  { %v1014_v8 = vmul.f32 1.442695, %v1004_v7 }
 0x2db   :  { %v989_v9 = vpop.xlane.xlu1 %988 }
 0x2dc   :  { %4893 = vpow2.f32 %v1014_v8  ;;  %v1005_v11 = vsub.f32 %v972_v37, %v989_v9  ;;  %v1659_v9 = vld [vmem:[#allocation8 + $0x8] sm:$0xff] }
 0x2de   :  { %v4890_v18 = vpop.eup %4889  ;;  %v1016_v21 = vmul.f32 1.442695, %v1005_v11 }
 0x2df   :  { %v992_v23 = vpop.xlane.xlu0 %991  ;;  %v1026_v27 = vsel %vm977_vm1, %v4890_v18, 0.0 }
 0x2e0   :  { %4895 = vpow2.f32 %v1016_v21  ;;  %v1006_v25 = vsub.f32 %v973_v42, %v992_v23  ;;  %1027 = vadd.xlane.f32.xlu0 %v1026_v27 }
 0x2e2   :  { %v4892_v24 = vpop.eup %4891  ;;  %v1018_v28 = vmul.f32 1.442695, %v1006_v25  ;;  %v1661_v25 = vld [vmem:[#allocation8 + $0x18] sm:$0xff] }
 0x2e3   :  { %v995_v30 = vpop.xlane.xlu1 %994  ;;  %v1029_v29 = vsel %vm977_vm1, %v4892_v24, 0.0 }
 0x2e4   :  { %4897 = vpow2.f32 %v1018_v28  ;;  %v1007_v31 = vsub.f32 %v974_v46, %v995_v30  ;;  %1030 = vadd.xlane.f32.xlu1 %v1029_v29  ;;  %v1662_v29 = vld [vmem:[#allocation8 + $0x20] sm:$0xff] }
 0x2e6   :  { %v4894_v32 = vpop.eup %4893  ;;  %v1020_v33 = vmul.f32 1.442695, %v1007_v31 }
 0x2e7   :  { %v998_v34 = vpop.xlane.xlu0 %997  ;;  %v1032_v35 = vsel %vm977_vm1, %v4894_v32, 0.0 }
 0x2e8   :  { %4899 = vpow2.f32 %v1020_v33  ;;  %v1008_v36 = vsub.f32 %v975_v51, %v998_v34  ;;  %1033 = vadd.xlane.f32.xlu0 %v1032_v35  ;;  %v1664_v34 = vld [vmem:[#allocation8 + $0x30] sm:$0xff]  ;;  %v1665_v35 = vld [vmem:[#allocation8 + $0x38] sm:$0xff] }
 0x2ea   :  { %v4896_v37 = vpop.eup %4895  ;;  %v1022_v39 = vmul.f32 1.442695, %v1008_v36  ;;  %v1666_v36 = vld [vmem:[#allocation8 + $0x40] sm:$0xff] }
 0x2eb   :  { %v1001_v40 = vpop.xlane.xlu1 %1000  ;;  %v1035_v41 = vsel %vm977_vm1, %v4896_v37, 0.0 }
 0x2ec   :  { %4901 = vpow2.f32 %v1022_v39  ;;  %v1009_v42 = vsub.f32 %v976_v56, %v1001_v40  ;;  %1036 = vadd.xlane.f32.xlu1 %v1035_v41  ;;  %v1668_v40 = vld [vmem:[#allocation8 + $0x50] sm:$0xff]  ;;  %v1669_v41 = vld [vmem:[#allocation8 + $0x58] sm:$0xff] }
 0x2ee   :  { %v4898_v43 = vpop.eup %4897  ;;  %v1024_v44 = vmul.f32 1.442695, %v1009_v42  ;;  %v4195_v42 = vpack.c.bf16 %v1669_v41, %v1668_v40  ;;  %v1940_v41 = vld [vmem:[#allocation9 + $0x50] sm:$0xff] }
 0x2ef   :  { %v1038_v45 = vsel %vm977_vm1, %v4898_v43, 0.0 }
 0x2f0   :  { %4903 = vpow2.f32 %v1024_v44  ;;  %1039 = vadd.xlane.f32.xlu0 %v1038_v45  ;;  %v1671_v44 = vld [vmem:[#allocation8 + $0x68] sm:$0xff] }
 0x2f2   :  { %v4900_v46 = vpop.eup %4899 }
 0x2f3   :  { %v1041_v47 = vsel %vm977_vm1, %v4900_v46, 0.0 }
 0x2f4   :  { %1042 = vadd.xlane.f32.xlu1 %v1041_v47  ;;  %v1673_v47 = vld [vmem:[#allocation8 + $0x78] sm:$0xff] }
 0x2f6   :  { %v5459_v48 = vpop.eup %4901 }
 0x2f7   :  { %v1044_v49 = vsel %vm977_vm1, %v5459_v48, 0.0 }
 0x2f8   :  { %1045 = vadd.xlane.f32.xlu0 %v1044_v49 }
 0x2fa   :  { %v5463_v51 = vpop.eup %4903 }
 0x2fb   :  { %v1047_v53 = vsel %vm977_vm1, %v5463_v51, 0.0 }
 0x2fc   :  { %1048 = vadd.xlane.f32.xlu1 %v1047_v53 }
 0x36d   :  { %v1028_v54 = vpop.xlane.xlu0 %1027 }
 0x36e   :  { %4905 = vrcp.f32 %v1028_v54 }
 0x371   :  { %v1031_v55 = vpop.xlane.xlu1 %1030 }
 0x372   :  { %4907 = vrcp.f32 %v1031_v55 }
 0x375   :  { %v1034_v56 = vpop.xlane.xlu0 %1033 }
 0x376   :  { %4909 = vrcp.f32 %v1034_v56 }
 0x378   :  { %v4906_v57 = vpop.eup %4905 }
 0x379   :  { %v1058_v59 = vmul.f32 %v4906_v57, %v4890_v18  ;;  %v1037_v61 = vpop.xlane.xlu1 %1036 }
 0x37a   :  { %4911 = vrcp.f32 %v1037_v61 }
 0x37b   :  { %3995 = vmatmul.mubr.msk.f32.vlgmr.msra.gmra.mrb[20].mxu0 %vm977_vm1, %v1058_v59 }
 0x37c   :  { %v4908_v62 = vpop.eup %4907  ;;  %4003 = vmatpush3.msra.mxu0 %v5412_v52  ;;  %4004 = vmatprep.mubr.msk.f32.mxu0 %vm5180_vm0, %v5179_v0 }
 0x37d   :  { %v1059_v63 = vmul.f32 %v4908_v62, %v4892_v24  ;;  %v1040_v1 = vpop.xlane.xlu0 %1039  ;;  %4012 = vmatprep.subr.mxu0 %v5179_v0 }
 0x37e   :  { %4913 = vrcp.f32 %v1040_v1 }
 0x37f   :  { %4000 = vmatmul.mubr.msk.f32.vlgmr.msra.gmra.mrb[20].mxu1 %vm977_vm1, %v1059_v63 }
 0x380   :  { %v4910_v2 = vpop.eup %4909  ;;  %4008 = vmatpush3.msra.mxu1 %v5410_v50  ;;  %4009 = vmatprep.mubr.msk.f32.mxu1 %vm5180_vm0, %v5179_v0  ;;  %v1658_v50 = vld [vmem:[#allocation8] sm:$0xff] }
 0x381   :  { %v1060_v4 = vmul.f32 %v4910_v2, %v4894_v32  ;;  %v1043_v6 = vpop.xlane.xlu1 %1042  ;;  %4017 = vmatprep.subr.mxu1 %v5179_v0  ;;  %v4175_v21 = vpack.c.bf16 %v1659_v9, %v1658_v50 }
 0x382   :  { %4915 = vrcp.f32 %v1043_v6 }
 0x383   :  { %4005 = vmatmul.mubr.msk.f32.vlgmr.msra.gmra.mrb[22].mxu0 %vm977_vm1, %v1060_v4 }
 0x384   :  { %v4912_v52 = vpop.eup %4911  ;;  %4013 = vmatpush3.msra.mxu0 %v5421_v60  ;;  %4014 = vmatprep.mubr.msk.f32.mxu0 %vm5180_vm0, %v5179_v0 }
 0x385   :  { %v1061_v7 = vmul.f32 %v4912_v52, %v4896_v37  ;;  %v1046_v8 = vpop.xlane.xlu0 %1045  ;;  %4022 = vmatprep.subr.mxu0 %v5179_v0  ;;  %v1667_v37 = vld [vmem:[#allocation8 + $0x48] sm:$0xff] }
 0x386   :  { %4917 = vrcp.f32 %v1046_v8  ;;  %v4191_v39 = vpack.c.bf16 %v1667_v37, %v1666_v36  ;;  %v1938_v36 = vld [vmem:[#allocation9 + $0x40] sm:$0xff] }
 0x387   :  { %4010 = vmatmul.mubr.msk.f32.vlgmr.msra.gmra.mrb[22].mxu1 %vm977_vm1, %v1061_v7  ;;  %v1942_v37 = vld [vmem:[#allocation9 + $0x60] sm:$0xff] }
 0x388   :  { %v4914_v11 = vpop.eup %4913  ;;  %4018 = vmatpush3.msra.mxu1 %v5419_v58  ;;  %4019 = vmatprep.mubr.msk.f32.mxu1 %vm5180_vm0, %v5179_v0  ;;  %v1660_v58 = vld [vmem:[#allocation8 + $0x10] sm:$0xff]  ;;  %v4213_v40 = vpack.c.bf16 %v1942_v37, %v1938_v36 }
 0x389   :  { %v1062_v18 = vmul.f32 %v4914_v11, %v4898_v43  ;;  %v1049_v60 = vpop.xlane.xlu1 %1048  ;;  %4027 = vmatprep.subr.mxu1 %v5179_v0  ;;  %v4179_v30 = vpack.c.bf16 %v1661_v25, %v1660_v58  ;;  %v1670_v43 = vld [vmem:[#allocation8 + $0x60] sm:$0xff]  ;;  %v1937_v58 = vld [vmem:[#allocation9 + $0x38] sm:$0xff]  ;;  %v1976_v36 = vld [vmem:[#allocation9 + $0x170] sm:$0xff] }
 0x38a   :  { %4919 = vrcp.f32 %v1049_v60  ;;  %v4199_v45 = vpack.c.bf16 %v1671_v44, %v1670_v43  ;;  %v1930_v25 = vld [vmem:[#allocation9] sm:$0xff]  ;;  %v1947_v44 = vld [vmem:[#allocation9 + $0x88] sm:$0xff] }
 0x38b   :  { %4015 = vmatmul.mubr.msk.f32.vlgmr.msra.gmra.mrb[24].mxu0 %vm977_vm1, %v1062_v18 }
 0x38c   :  { %v4916_v23 = vpop.eup %4915  ;;  %4023 = vmatpush3.msra.mxu0 %v5430_v5  ;;  %4024 = vmatprep.mubr.msk.f32.mxu0 %vm5180_vm0, %v5179_v0  ;;  %v1663_v5 = vld [vmem:[#allocation8 + $0x28] sm:$0xff] }
 0x38d   :  { %v1063_v27 = vmul.f32 %v4916_v23, %v4900_v46  ;;  %4176 = vmatprep.subr.bf16.mxu0 %v4175_v21  ;;  %v4183_v33 = vpack.c.bf16 %v1663_v5, %v1662_v29  ;;  %v1672_v46 = vld [vmem:[#allocation8 + $0x70] sm:$0xff]  ;;  %v1933_v23 = vld [vmem:[#allocation9 + $0x18] sm:$0xff] }
 0x38e   :  { %v1932_v29 = vld [vmem:[#allocation9 + $0x10] sm:$0xff] }
 0x38f   :  { %4020 = vmatmul.mubr.msk.f32.vlgmr.msra.gmra.mrb[24].mxu1 %vm977_vm1, %v1063_v27  ;;  %v1936_v5 = vld [vmem:[#allocation9 + $0x30] sm:$0xff] }
 0x390   :  { %v4918_v24 = vpop.eup %4917  ;;  %4028 = vmatpush3.msra.mxu1 %v5428_v3  ;;  %4029 = vmatprep.mubr.msk.f32.mxu1 %vm5180_vm0, %v5179_v0  ;;  %v4187_v3 = vpack.c.bf16 %v1665_v35, %v1664_v34  ;;  %v1941_v34 = vld [vmem:[#allocation9 + $0x58] sm:$0xff] }
 0x391   :  { %v1064_v28 = vmul.f32 %v4918_v24, %v5459_v48  ;;  %v4203_v48 = vpack.c.bf16 %v1673_v47, %v1672_v46  ;;  %v1934_v24 = vld [vmem:[#allocation9 + $0x20] sm:$0xff]  ;;  %v1949_v46 = vld [vmem:[#allocation9 + $0x98] sm:$0xff] }
 0x393   :  { %4025 = vmatmul.mubr.msk.f32.vlgmr.msra.gmra.mrb[26].mxu0 %vm977_vm1, %v1064_v28  ;;  %v4239_v28 = vpack.c.bf16 %v1937_v58, %v1933_v23  ;;  %v1964_v58 = vld [vmem:[#allocation9 + $0x110] sm:$0xff] }
 0x394   :  { %v4920_v31 = vpop.eup %4919  ;;  %4178 = vmatpush3.bf16.msra.mxu0 %v4175_v21  ;;  %v1935_v21 = vld [vmem:[#allocation9 + $0x28] sm:$0xff] }
 0x395   :  { %v1065_v32 = vmul.f32 %v4920_v31, %v5463_v51  ;;  %4180 = vmatprep.subr.bf16.mxu0 %v4179_v30  ;;  %v4241_v31 = vpack.c.bf16 %v1936_v5, %v1932_v29  ;;  %v1973_v29 = vld [vmem:[#allocation9 + $0x158] sm:$0xff] }
 0x397   :  { %4030 = vmatmul.mubr.msk.f32.vlgmr.msra.gmra.mrb[26].mxu1 %vm977_vm1, %v1065_v32  ;;  %v1939_v32 = vld [vmem:[#allocation9 + $0x48] sm:$0xff] }
 0x398   :  { %4182 = vmatpush3.bf16.msra.mxu0 %v4179_v30  ;;  %2080 = vmatprep.mubr.f32.mxu1 %v5179_v0  ;;  %v4209_v30 = vpack.c.bf16 %v1934_v24, %v1930_v25  ;;  %v1968_v25 = vld [vmem:[#allocation9 + $0x130] sm:$0xff] }
 0x399   :  { %4184 = vmatprep.subr.bf16.mxu0 %v4183_v33  ;;  %v4257_v24 = vpack.c.bf16 %v1968_v25, %v1964_v58 }
 0x39c   :  { %4186 = vmatpush3.bf16.msra.mxu0 %v4183_v33  ;;  %v1943_v33 = vld [vmem:[#allocation9 + $0x68] sm:$0xff] }
 0x39d   :  { %4188 = vmatprep.subr.bf16.mxu0 %v4187_v3  ;;  %v4211_v35 = vpack.c.bf16 %v1943_v33, %v1939_v32  ;;  %v1970_v32 = vld [vmem:[#allocation9 + $0x140] sm:$0xff] }
 0x39e   :  { %v1974_v33 = vld [vmem:[#allocation9 + $0x160] sm:$0xff] }
 0x3a0   :  { %4190 = vmatpush3.bf16.msra.mxu0 %v4187_v3  ;;  %v1945_v3 = vld [vmem:[#allocation9 + $0x78] sm:$0xff] }
 0x3a1   :  { %4192 = vmatprep.subr.bf16.mxu0 %v4191_v39 }
 0x3a4   :  { %4194 = vmatpush3.bf16.msra.mxu0 %v4191_v39  ;;  %v4243_v39 = vpack.c.bf16 %v1945_v3, %v1941_v34  ;;  %v1972_v3 = vld [vmem:[#allocation9 + $0x150] sm:$0xff] }
 0x3a5   :  { %4196 = vmatprep.subr.bf16.mxu0 %v4195_v42  ;;  %v4261_v37 = vpack.c.bf16 %v1976_v36, %v1972_v3 }
 0x3a8   :  { %4198 = vmatpush3.bf16.msra.mxu0 %v4195_v42  ;;  %v1944_v42 = vld [vmem:[#allocation9 + $0x70] sm:$0xff] }
 0x3a9   :  { %4200 = vmatprep.subr.bf16.mxu0 %v4199_v45  ;;  %v4245_v43 = vpack.c.bf16 %v1944_v42, %v1940_v41  ;;  %v1981_v41 = vld [vmem:[#allocation9 + $0x198] sm:$0xff] }
 0x3ac   :  { %4202 = vmatpush3.bf16.msra.mxu0 %v4199_v45  ;;  %v1951_v45 = vld [vmem:[#allocation9 + $0xa8] sm:$0xff] }
 0x3ad   :  { %4204 = vmatprep.subr.bf16.mxu0 %v4203_v48  ;;  %v4215_v47 = vpack.c.bf16 %v1951_v45, %v1947_v44  ;;  %v1978_v44 = vld [vmem:[#allocation9 + $0x180] sm:$0xff] }
 0x3ae   :  { %v1982_v45 = vld [vmem:[#allocation9 + $0x1a0] sm:$0xff] }
 0x3b0   :  { %4206 = vmatpush3.bf16.msra.mxu0 %v4203_v48  ;;  %v1953_v48 = vld [vmem:[#allocation9 + $0xb8] sm:$0xff] }
 0x3b1   :  { %4240 = vmatprep.subr.bf16.mxu0 %v4239_v28  ;;  %v1971_v28 = vld [vmem:[#allocation9 + $0x148] sm:$0xff] }
 0x44e   :  { %v1135_v49 = vpop.f32.mrb[20].mxu0 }
 0x44f   :  { %v1650_v51 = vadd.f32 %v1135_v49, %v5328_v26  ;;  %v3996_v53 = vpop.f32.mrb[21].mxu0  ;;  %v1946_v49 = vld [vmem:[#allocation9 + $0x80] sm:$0xff] }
 0x450   :  { %v4247_v53 = vpack.c.bf16 %v1953_v48, %v1949_v46  ;;  %v1980_v48 = vld [vmem:[#allocation9 + $0x190] sm:$0xff] }
 0x451   :  { %4064 = vmatprep.mubr.f32.mxu0 %v1650_v51  ;;  %v1950_v51 = vld [vmem:[#allocation9 + $0xa0] sm:$0xff] }
 0x452   :  { %v1208_v54 = vpop.f32.mrb[20].mxu1 }
 0x453   :  { %v1651_v55 = vadd.f32 %v1208_v54, %v5334_v10  ;;  %v4001_v56 = vpop.f32.mrb[21].mxu1  ;;  %v4217_v54 = vpack.c.bf16 %v1950_v51, %v1946_v49  ;;  %v1984_v49 = vld [vmem:[#allocation9 + $0x1b0] sm:$0xff] }
 0x454   :  { %v1952_v56 = vld [vmem:[#allocation9 + $0xb0] sm:$0xff]  ;;  %v4265_v51 = vpack.c.bf16 %v1984_v49, %v1980_v48 }
 0x455   :  { %4065 = vmatmul.mubr.f32.vlgmr.msra.gmra.mrb[28].mxu0 %v1651_v55  ;;  %v1948_v55 = vld [vmem:[#allocation9 + $0x90] sm:$0xff] }
 0x456   :  { %v1281_v57 = vpop.f32.mrb[22].mxu0  ;;  %4242 = vmatpush1.bf16.msra.mxu0 %v4241_v31  ;;  %v1977_v31 = vld [vmem:[#allocation9 + $0x178] sm:$0xff] }
 0x457   :  { %v1652_v59 = vadd.f32 %v1281_v57, %v5338_v12  ;;  %v4006_v61 = vpop.f32.mrb[23].mxu0  ;;  %4244 = vmatprep.subr.bf16.mxu0 %v4243_v39  ;;  %v4249_v57 = vpack.c.bf16 %v1952_v56, %v1948_v55  ;;  %v4259_v34 = vpack.c.bf16 %v1977_v31, %v1973_v29  ;;  %v1979_v39 = vld [vmem:[#allocation9 + $0x188] sm:$0xff]  ;;  %v1989_v55 = vld [vmem:[#allocation9 + $0x1d8] sm:$0xff]  ;;  %v5001_v31 = vld [vmem:[#allocation3] sm:$0xff] }
 0x458   :  { %v1959_v61 = vld [vmem:[#allocation9 + $0xe8] sm:$0xff] }
 0x459   :  { %4067 = vmatprep.mubr.f32.mxu0 %v1652_v59  ;;  %v1955_v59 = vld [vmem:[#allocation9 + $0xc8] sm:$0xff] }
 0x45a   :  { %v1354_v62 = vpop.f32.mrb[22].mxu1  ;;  %4246 = vmatpush1.bf16.msra.mxu0 %v4245_v43  ;;  %v1985_v43 = vld [vmem:[#allocation9 + $0x1b8] sm:$0xff] }
 0x45b   :  { %v1653_v63 = vadd.f32 %v1354_v62, %v5342_v13  ;;  %v4011_v1 = vpop.f32.mrb[23].mxu1  ;;  %4248 = vmatprep.subr.bf16.mxu0 %v4247_v53  ;;  %v1957_v62 = vld [vmem:[#allocation9 + $0xd8] sm:$0xff]  ;;  %v4263_v46 = vpack.c.bf16 %v1985_v43, %v1981_v41  ;;  %v1987_v53 = vld [vmem:[#allocation9 + $0x1c8] sm:$0xff] }
 0x45c   :  { %v1961_v1 = vld [vmem:[#allocation9 + $0xf8] sm:$0xff] }
 0x45d   :  { %4068 = vmatmul.mubr.f32.gmra.mrb[30].mxu0 %v1653_v63  ;;  %v4219_v63 = vpack.c.bf16 %v1959_v61, %v1955_v59  ;;  %v1986_v59 = vld [vmem:[#allocation9 + $0x1c0] sm:$0xff] }
 0x45e   :  { %v1427_v2 = vpop.f32.mrb[24].mxu0  ;;  %4250 = vmatpush1.bf16.msra.mxu0 %v4249_v57  ;;  %v1993_v57 = vld [vmem:[#allocation9 + $0x1f8] sm:$0xff]  ;;  %v1990_v61 = vld [vmem:[#allocation9 + $0x1e0] sm:$0xff] }
 0x45f   :  { %v1654_v26 = vadd.f32 %v1427_v2, %v5347_v14  ;;  %v4016_v4 = vpop.f32.mrb[25].mxu0  ;;  %v1931_v14 = vld [vmem:[#allocation9 + $0x8] sm:$0xff]  ;;  %v1954_v2 = vld [vmem:[#allocation9 + $0xc0] sm:$0xff] }
 0x460   :  { %v4207_v27 = vpack.c.bf16 %v1935_v21, %v1931_v14  ;;  %v4251_v4 = vpack.c.bf16 %v1961_v1, %v1957_v62  ;;  %v1962_v14 = vld [vmem:[#allocation9 + $0x100] sm:$0xff]  ;;  %v4267_v62 = vpack.c.bf16 %v1993_v57, %v1989_v55  ;;  %v1988_v1 = vld [vmem:[#allocation9 + $0x1d0] sm:$0xff] }
 0x461   :  { %4070 = vmatprep.mubr.f32.mxu0 %v1654_v26  ;;  %v1958_v26 = vld [vmem:[#allocation9 + $0xe0] sm:$0xff] }
 0x462   :  { %v1500_v6 = vpop.f32.mrb[24].mxu1  ;;  %4208 = vmatprep.subr.bf16.mxu1 %v4207_v27  ;;  %4252 = vmatprep.subr.bf16.mxu0 %v4251_v4  ;;  %v1966_v21 = vld [vmem:[#allocation9 + $0x120] sm:$0xff]  ;;  %v2279_v4 = vld [vmem:[#allocation11 + $0x8] sm:$0xff] }
 0x463   :  { %v1655_v52 = vadd.f32 %v1500_v6, %v5353_v15  ;;  %v4021_v7 = vpop.f32.mrb[25].mxu1  ;;  %4210 = vmatpush1.bf16.msra.mxu1 %v4209_v30  ;;  %v4221_v6 = vpack.c.bf16 %v1958_v26, %v1954_v2  ;;  %v4225_v27 = vpack.c.bf16 %v1966_v21, %v1962_v14  ;;  %v1975_v30 = vld [vmem:[#allocation9 + $0x168] sm:$0xff]  ;;  %v1992_v2 = vld [vmem:[#allocation9 + $0x1f0] sm:$0xff]  ;;  %v3809_v14 = vld [vmem:[%s5991_s4] ss:$0 sm:$0xff] }
 0x464   :  { %4212 = vmatprep.subr.bf16.mxu1 %v4211_v35  ;;  %v1960_v7 = vld [vmem:[#allocation9 + $0xf0] sm:$0xff]  ;;  %v4227_v5 = vpack.c.bf16 %v1975_v30, %v1971_v28  ;;  %v4229_v35 = vpack.c.bf16 %v1974_v33, %v1970_v32  ;;  %v4269_v26 = vpack.c.bf16 %v1992_v2, %v1988_v1 }
 0x465   :  { %4071 = vmatmul.mubr.f32.gmra.mrb[32].mxu0 %v1655_v52  ;;  %v1956_v52 = vld [vmem:[#allocation9 + $0xd0] sm:$0xff] }
 0x466   :  { %v1573_v8 = vpop.f32.mrb[26].mxu0 }
 0x467   :  { %v1656_v50 = vadd.f32 %v1573_v8, %v5359_v16  ;;  %v4026_v9 = vpop.f32.mrb[27].mxu0  ;;  %4214 = vmatpush1.bf16.msra.mxu1 %v4213_v40  ;;  %v4253_v8 = vpack.c.bf16 %v1960_v7, %v1956_v52  ;;  %v1983_v40 = vld [vmem:[#allocation9 + $0x1a8] sm:$0xff]  ;;  %v2281_v52 = vld [vmem:[#allocation11 + $0x18] sm:$0xff] }
 0x468   :  { %4216 = vmatprep.subr.bf16.mxu1 %v4215_v47  ;;  %v1967_v9 = vld [vmem:[#allocation9 + $0x128] sm:$0xff]  ;;  %v4231_v42 = vpack.c.bf16 %v1983_v40, %v1979_v39  ;;  %v4233_v47 = vpack.c.bf16 %v1982_v45, %v1978_v44 }
 0x469   :  { %4073 = vmatprep.mubr.f32.mxu0 %v1656_v50  ;;  %v1963_v50 = vld [vmem:[#allocation9 + $0x108] sm:$0xff]  ;;  %4254 = vmatpush1.bf16.msra.mxu0 %v4253_v8  ;;  %v2285_v8 = vld [vmem:[#allocation11 + $0x38] sm:$0xff] }
 0x46a   :  { %v1646_v11 = vpop.f32.mrb[26].mxu1 }
 0x46b   :  { %v1657_v18 = vadd.f32 %v1646_v11, %v5364_v17  ;;  %v4031_v60 = vpop.f32.mrb[27].mxu1  ;;  %4218 = vmatpush1.bf16.msra.mxu1 %v4217_v54  ;;  %v1965_v11 = vld [vmem:[#allocation9 + $0x118] sm:$0xff]  ;;  %v1991_v54 = vld [vmem:[#allocation9 + $0x1e8] sm:$0xff] }
 0x46c   :  { %4220 = vmatprep.subr.bf16.mxu1 %v4219_v63  ;;  %v1969_v60 = vld [vmem:[#allocation9 + $0x138] sm:$0xff]  ;;  %v4235_v56 = vpack.c.bf16 %v1991_v54, %v1987_v53  ;;  %v4237_v63 = vpack.c.bf16 %v1990_v61, %v1986_v59  ;;  %v5002_v59 = vld [vmem:[#allocation3 + $0x20] sm:$0xff] }
 0x46d   :  { %4074 = vmatmul.mubr.f32.gmra.mrb[34].mxu0 %v1657_v18  ;;  %v4223_v18 = vpack.c.bf16 %v1967_v9, %v1963_v50  ;;  %v4255_v23 = vpack.c.bf16 %v1969_v60, %v1965_v11  ;;  %v5511_v50 = vpack.c.bf16 %v2285_v8, %v2281_v52  ;;  %v2278_v8 = vld [vmem:[#allocation11] sm:$0xff] }
 0x46e   :  { %2193 = vmatprep.mubr.f32.mxu0 %v5179_v0 }
 0x46f   :  { %4222 = vmatpush1.bf16.msra.mxu1 %v4221_v6  ;;  %4256 = vmatprep.subr.bf16.mxu0 %v4255_v23  ;;  %v2283_v6 = vld [vmem:[#allocation11 + $0x28] sm:$0xff] }
 0x470   :  { %4224 = vmatprep.subr.bf16.mxu1 %v4223_v18  ;;  %4258 = vmatpush1.bf16.msra.mxu0 %v4257_v24  ;;  %v5509_v7 = vpack.c.bf16 %v2283_v6, %v2279_v4  ;;  %v5181_v18 = vmov 1983009808  }
 0x471   :  { %4260 = vmatprep.subr.bf16.mxu0 %v4259_v34  ;;  %v1797_v60 = vunpack.c.l.s4 %v5181_v18  ;;  %v2282_v18 = vld [vmem:[#allocation11 + $0x20] sm:$0xff] }
 0x473   :  { %4226 = vmatpush1.bf16.msra.mxu1 %v4225_v27  ;;  %v1798_v23 = vunpack.c.0.s8 %v1797_v60  ;;  %v2284_v60 = vld [vmem:[#allocation11 + $0x30] sm:$0xff] }
 0x474   :  { %4228 = vmatprep.subr.bf16.mxu1 %v4227_v5  ;;  %4262 = vmatpush1.bf16.msra.mxu0 %v4261_v37 }
 0x475   :  { %4264 = vmatprep.subr.bf16.mxu0 %v4263_v46  ;;  %v1801_v5 = vsub.s32 %v1798_v23, %v5373_v19  ;;  %v2289_v23 = vld [vmem:[#allocation11 + $0x58] sm:$0xff] }
 0x477   :  { %4230 = vmatpush1.bf16.msra.mxu1 %v4229_v35 }
 0x478   :  { %4232 = vmatprep.subr.bf16.mxu1 %v4231_v42  ;;  %4266 = vmatpush1.bf16.msra.mxu0 %v4265_v51 }
 0x479   :  { %4268 = vmatprep.subr.bf16.mxu0 %v4267_v62 }
 0x47b   :  { %4234 = vmatpush1.bf16.msra.mxu1 %v4233_v47  ;;  %v5182_v47 = vmov 1934713408  }
 0x47c   :  { %4236 = vmatprep.subr.bf16.mxu1 %v4235_v56  ;;  %4270 = vmatpush1.bf16.msra.mxu0 %v4269_v26  ;;  %v1861_v48 = vunpack.c.l.s4 %v5182_v47 }
 0x47d   :  { %4304 = vmatprep.subr.bf16.mxu0 %v5511_v50 }
 0x47e   :  { %v1862_v57 = vunpack.c.0.s8 %v1861_v48 }
 0x47f   :  { %4238 = vmatpush1.bf16.msra.mxu1 %v4237_v63 }
 0x480   :  { %4272 = vmatprep.subr.bf16.mxu1 %v5509_v7  ;;  %v1865_v52 = vsub.s32 %v1862_v57, %v5373_v19  ;;  %v2296_v57 = vld [vmem:[#allocation11 + $0x90] sm:$0xff] }
 0x528   :  { %v4066_v9 = vpop.f32.mrb[28].mxu0 }
 0x529   :  { %v1747_v11 = vpop.f32.mrb[29].mxu0  ;;  %v1753_v21 = vadd.f32 %v4066_v9, %v3809_v14 }
 0x52a   :  { %v1748_v27 = vadd.f32 %v3809_v14, %v1747_v11 }
 0x52b   :  { %v1787_v30 = vadd.f32 %v1753_v21, %v5334_v10  ;;  %v2291_v21 = vld [vmem:[#allocation11 + $0x68] sm:$0xff] }
 0x52c   :  { %v1786_v32 = vadd.f32 %v5001_v31, %v1748_v27  ;;  %v2293_v27 = vld [vmem:[#allocation11 + $0x78] sm:$0xff] }
 0x530   :  { %v4069_v58 = vpop.f32.mrb[30].mxu0 }
 0x531   :  { %v1763_v25 = vadd.f32 %v4069_v58, %v3809_v14  ;;  %v1757_v24 = vpop.f32.mrb[31].mxu0 }
 0x532   :  { %v1758_v28 = vadd.f32 %v3809_v14, %v1757_v24 }
 0x533   :  { %v1789_v29 = vadd.f32 %v1763_v25, %v5342_v13 }
 0x534   :  { %v1788_v33 = vadd.f32 %v1758_v28, %v5338_v12  ;;  %v5526_v28 = vpack.c.bf16 %v2282_v18, %v2278_v8  ;;  %v2306_v8 = vld [vmem:[#allocation11 + $0xe0] sm:$0xff] }
 0x535   :  { %v1810_v34 = vcombine.low %v1787_v30, %v1789_v29  ;;  %v1811_v35 = vcombine.high %v1787_v30, %v1789_v29 }
 0x536   :  { %v1794_v3 = vcombine.low %v1786_v32, %v1788_v33  ;;  %v1795_v36 = vcombine.high %v1786_v32, %v1788_v33 }
 0x537   :  { %v1818_v37 = vrot.slane %v1810_v34, %v1801_v5  ;;  %v1825_v39 = vrot.slane %v1811_v35, %v1801_v5  ;;  %v5532_v35 = vpack.c.bf16 %v2293_v27, %v2289_v23 }
 0x538   :  { %v1802_v40 = vrot.slane %v1794_v3, %v1801_v5  ;;  %v1809_v41 = vrot.slane %v1795_v36, %v1801_v5  ;;  %v4072_v42 = vpop.f32.mrb[32].mxu0  ;;  %v2286_v3 = vld [vmem:[#allocation11 + $0x40] sm:$0xff] }
 0x539   :  { %v1767_v43 = vpop.f32.mrb[33].mxu0  ;;  %v1773_v46 = vadd.f32 %v4072_v42, %v3809_v14  ;;  %v2288_v42 = vld [vmem:[#allocation11 + $0x50] sm:$0xff] }
 0x53a   :  { %v1858_v44 = vcombine.low %v1802_v40, %v1818_v37  ;;  %v1859_v10 = vcombine.high %v1802_v40, %v1818_v37  ;;  %v1874_v45 = vcombine.low %v1809_v41, %v1825_v39  ;;  %v1875_v13 = vcombine.high %v1809_v41, %v1825_v39  ;;  %v2290_v41 = vld [vmem:[#allocation11 + $0x60] sm:$0xff] }
 0x53b   :  { %v1768_v49 = vadd.f32 %v3809_v14, %v1767_v43  ;;  %v1791_v55 = vadd.f32 %v1773_v46, %v5353_v15  ;;  %v2280_v15 = vld [vmem:[#allocation11 + $0x10] sm:$0xff] }
 0x53c   :  { %v1866_v24 = vrot.slane %v1858_v44, %v1865_v52  ;;  %v5528_v30 = vpack.c.bf16 %v2284_v60, %v2280_v15  ;;  %v1873_v29 = vrot.slane %v1859_v10, %v1865_v52  ;;  %v1882_v36 = vrot.slane %v1874_v45, %v1865_v52  ;;  %v2292_v43 = vld [vmem:[#allocation11 + $0x70] sm:$0xff]  ;;  %v2295_v10 = vld [vmem:[#allocation11 + $0x88] sm:$0xff] }
 0x53d   :  { %v1790_v61 = vadd.f32 %v5002_v59, %v1768_v49  ;;  %v1889_v37 = vrot.slane %v1875_v13, %v1865_v52  ;;  %v2299_v45 = vld [vmem:[#allocation11 + $0xa8] sm:$0xff]  ;;  %v2297_v13 = vld [vmem:[#allocation11 + $0x98] sm:$0xff]  ;;  %v2300_v59 = vld [vmem:[#allocation11 + $0xb0] sm:$0xff] }
 0x53e   :  { %v2311_v60 = vld [vmem:[#allocation11 + $0x108] sm:$0xff] }
 0x540   :  { %v4075_v51 = vpop.f32.mrb[34].mxu0 }
 0x541   :  { %v1783_v12 = vadd.f32 %v4075_v51, %v3809_v14  ;;  %v1777_v53 = vpop.f32.mrb[35].mxu0 }
 0x542   :  { %v1778_v54 = vadd.f32 %v3809_v14, %v1777_v53  ;;  %v5546_v53 = vpack.c.bf16 %v2290_v41, %v2286_v3  ;;  %v2325_v3 = vld [vmem:[#allocation11 + $0x178] sm:$0xff]  ;;  %v2320_v41 = vld [vmem:[#allocation11 + $0x150] sm:$0xff] }
 0x543   :  { %v1793_v56 = vadd.f32 %v1783_v12, %v5364_v17  ;;  %v2287_v17 = vld [vmem:[#allocation11 + $0x48] sm:$0xff]  ;;  %v2301_v12 = vld [vmem:[#allocation11 + $0xb8] sm:$0xff] }
 0x544   :  { %v1792_v62 = vadd.f32 %v1778_v54, %v5359_v16  ;;  %v5530_v34 = vpack.c.bf16 %v2291_v21, %v2287_v17  ;;  %v5548_v54 = vpack.c.bf16 %v2292_v43, %v2288_v42  ;;  %v2315_v17 = vld [vmem:[#allocation11 + $0x128] sm:$0xff]  ;;  %v2317_v21 = vld [vmem:[#allocation11 + $0x138] sm:$0xff]  ;;  %v2324_v42 = vld [vmem:[#allocation11 + $0x170] sm:$0xff] }
 0x545   :  { %v1842_v63 = vcombine.low %v1791_v55, %v1793_v56  ;;  %v1843_v1 = vcombine.high %v1791_v55, %v1793_v56  ;;  %v2294_v55 = vld [vmem:[#allocation11 + $0x80] sm:$0xff] }
 0x546   :  { %v1826_v2 = vcombine.low %v1790_v61, %v1792_v62  ;;  %v1827_v26 = vcombine.high %v1790_v61, %v1792_v62  ;;  %v2298_v56 = vld [vmem:[#allocation11 + $0xa0] sm:$0xff]  ;;  %v5554_v61 = vpack.c.bf16 %v2299_v45, %v2295_v10  ;;  %v5556_v62 = vpack.c.bf16 %v2301_v12, %v2297_v13  ;;  %v2331_v10 = vld [vmem:[#allocation11 + $0x1a8] sm:$0xff]  ;;  %v2329_v45 = vld [vmem:[#allocation11 + $0x198] sm:$0xff] }
 0x547   :  { %v1850_v4 = vrot.slane %v1842_v63, %v1801_v5  ;;  %v1857_v6 = vrot.slane %v1843_v1, %v1801_v5  ;;  %v2303_v63 = vld [vmem:[#allocation11 + $0xc8] sm:$0xff]  ;;  %v2333_v13 = vld [vmem:[#allocation11 + $0x1b8] sm:$0xff] }
 0x548   :  { %v1834_v9 = vrot.slane %v1826_v2, %v1801_v5  ;;  %v1841_v11 = vrot.slane %v1827_v26, %v1801_v5  ;;  %v2307_v1 = vld [vmem:[#allocation11 + $0xe8] sm:$0xff]  ;;  %v2305_v2 = vld [vmem:[#allocation11 + $0xd8] sm:$0xff] }
 0x549   :  { %v2309_v26 = vld [vmem:[#allocation11 + $0xf8] sm:$0xff]  ;;  %v5568_v18 = vpack.c.bf16 %v2307_v1, %v2303_v63  ;;  %v2332_v63 = vld [vmem:[#allocation11 + $0x1b0] sm:$0xff]  ;;  %v5616_v1 = vpack.c.bf16 %v2333_v13, %v2329_v45 }
 0x54a   :  { %v1890_v14 = vcombine.low %v1834_v9, %v1850_v4  ;;  %v1891_v16 = vcombine.high %v1834_v9, %v1850_v4  ;;  %v1906_v58 = vcombine.low %v1841_v11, %v1857_v6  ;;  %v1907_v25 = vcombine.high %v1841_v11, %v1857_v6  ;;  %v2304_v9 = vld [vmem:[#allocation11 + $0xd0] sm:$0xff] }
 0x54b   :  { %v5560_v4 = vpack.c.bf16 %v2298_v56, %v2294_v55  ;;  %v5562_v6 = vpack.c.bf16 %v2300_v59, %v2296_v57  ;;  %v2308_v11 = vld [vmem:[#allocation11 + $0xf0] sm:$0xff]  ;;  %v5570_v15 = vpack.c.bf16 %v2309_v26, %v2305_v2  ;;  %v5608_v55 = vpack.c.bf16 %v2324_v42, %v2320_v41  ;;  %v2326_v56 = vld [vmem:[#allocation11 + $0x180] sm:$0xff]  ;;  %v2335_v2 = vld [vmem:[#allocation11 + $0x1c8] sm:$0xff] }
 0x54c   :  { %v1898_v31 = vrot.slane %v1890_v14, %v1865_v52  ;;  %v1905_v32 = vrot.slane %v1891_v16, %v1865_v52  ;;  %v1914_v5 = vrot.slane %v1906_v58, %v1865_v52  ;;  %v1921_v33 = vrot.slane %v1907_v25, %v1865_v52  ;;  %v2302_v52 = vld [vmem:[#allocation11 + $0xc0] sm:$0xff]  ;;  %v2313_v14 = vld [vmem:[#allocation11 + $0x118] sm:$0xff]  ;;  %v2312_v25 = vld [vmem:[#allocation11 + $0x110] sm:$0xff] }
 0x54d   :  { %v5574_v23 = vpack.c.bf16 %v2306_v8, %v2302_v52  ;;  %v5576_v27 = vpack.c.bf16 %v2308_v11, %v2304_v9  ;;  %v2310_v16 = vld [vmem:[#allocation11 + $0x100] sm:$0xff]  ;;  %v2328_v59 = vld [vmem:[#allocation11 + $0x190] sm:$0xff]  ;;  %v2339_v26 = vld [vmem:[#allocation11 + $0x1e8] sm:$0xff] }
 0x54e   :  { %v1922_v39 = vcombine.low %v1866_v24, %v1898_v31  ;;  %v1923_v40 = vcombine.high %v1866_v24, %v1898_v31  ;;  %v1924_v44 = vcombine.low %v1873_v29, %v1905_v32  ;;  %v5534_v46 = vcombine.high %v1873_v29, %v1905_v32  ;;  %v2314_v58 = vld [vmem:[#allocation11 + $0x120] sm:$0xff]  ;;  %v2316_v24 = vld [vmem:[#allocation11 + $0x130] sm:$0xff]  ;;  %v2319_v32 = vld [vmem:[#allocation11 + $0x148] sm:$0xff] }
 0x54f   :  { %v5536_v47 = vcombine.low %v1882_v36, %v1914_v5  ;;  %v5538_v48 = vcombine.high %v1882_v36, %v1914_v5  ;;  %v5540_v49 = vcombine.low %v1889_v37, %v1921_v33  ;;  %v5542_v51 = vcombine.high %v1889_v37, %v1921_v33  ;;  %v2323_v5 = vld [vmem:[#allocation11 + $0x168] sm:$0xff]  ;;  %v2321_v33 = vld [vmem:[#allocation11 + $0x158] sm:$0xff]  ;;  %v2330_v57 = vld [vmem:[#allocation11 + $0x1a0] sm:$0xff] }
 0x550   :  { %2081 = vmatmul.mubr.f32.vlgmr.msra.gmra.mrb[28].mxu1 %v1922_v39  ;;  %2194 = vmatmul.mubr.f32.vlgmr.msra.gmra.mrb[36].mxu0 %v1922_v39  ;;  %v5582_v29 = vpack.c.bf16 %v2315_v17, %v2311_v60  ;;  %v5584_v31 = vpack.c.bf16 %v2317_v21, %v2313_v14  ;;  %v5590_v36 = vpack.c.bf16 %v2314_v58, %v2310_v16  ;;  %v2318_v39 = vld [vmem:[#allocation11 + $0x140] sm:$0xff]  ;;  %v2337_v52 = vld [vmem:[#allocation11 + $0x1d8] sm:$0xff]  ;;  %v2336_v14 = vld [vmem:[#allocation11 + $0x1d0] sm:$0xff] }
 0x551   :  { %4274 = vmatpush1.bf16.msra.mxu1 %v5526_v28  ;;  %4306 = vmatpush1.bf16.msra.mxu0 %v5528_v30  ;;  %v5592_v37 = vpack.c.bf16 %v2316_v24, %v2312_v25  ;;  %v5598_v43 = vpack.c.bf16 %v2323_v5, %v2319_v32  ;;  %v2341_v8 = vld [vmem:[#allocation11 + $0x1f8] sm:$0xff]  ;;  %v5622_v9 = vpack.c.bf16 %v2330_v57, %v2326_v56  ;;  %v2334_v60 = vld [vmem:[#allocation11 + $0x1c0] sm:$0xff]  ;;  %v2340_v21 = vld [vmem:[#allocation11 + $0x1f0] sm:$0xff] }
 0x552   :  { %2086 = vmatprep.mubr.f32.mxu1 %v5179_v0  ;;  %2199 = vmatprep.mubr.f32.mxu0 %v5179_v0  ;;  %v5624_v11 = vpack.c.bf16 %v2332_v63, %v2328_v59  ;;  %v2338_v17 = vld [vmem:[#allocation11 + $0x1e0] sm:$0xff]  ;;  %v5632_v16 = vpack.c.bf16 %v2341_v8, %v2337_v52  ;;  %v5640_v25 = vpack.c.bf16 %v2340_v21, %v2336_v14 }
 0x553   :  { %4276 = vmatprep.subr.bf16.mxu1 %v5530_v34  ;;  %4308 = vmatprep.subr.bf16.mxu0 %v5532_v35  ;;  %v5638_v58 = vpack.c.bf16 %v2338_v17, %v2334_v60 }
 0x554   :  { %2087 = vmatmul.mubr.f32.gmra.mrb[30].mxu1 %v1923_v40  ;;  %2200 = vmatmul.mubr.f32.gmra.mrb[38].mxu0 %v1923_v40  ;;  %v2322_v40 = vld [vmem:[#allocation11 + $0x160] sm:$0xff] }
 0x555   :  { %4278 = vmatpush1.bf16.msra.mxu1 %v5546_v53  ;;  %4310 = vmatpush1.bf16.msra.mxu0 %v5548_v54  ;;  %v5606_v12 = vpack.c.bf16 %v2322_v40, %v2318_v39  ;;  %v2010_v40 = vsub.s32 3, %v5373_v19 }
 0x556   :  { %2092 = vmatprep.mubr.f32.mxu1 %v5179_v0  ;;  %2205 = vmatprep.mubr.f32.mxu0 %v5179_v0 }
 0x557   :  { %4280 = vmatprep.subr.bf16.mxu1 %v5554_v61  ;;  %4312 = vmatprep.subr.bf16.mxu0 %v5556_v62 }
 0x558   :  { %2093 = vmatmul.mubr.f32.gmra.mrb[32].mxu1 %v1924_v44  ;;  %2206 = vmatmul.mubr.f32.gmra.mrb[40].mxu0 %v1924_v44  ;;  %v5600_v44 = vpack.c.bf16 %v2325_v3, %v2321_v33 }
 0x559   :  { %4282 = vmatpush1.bf16.msra.mxu1 %v5560_v4  ;;  %4314 = vmatpush1.bf16.msra.mxu0 %v5562_v6 }
 0x55a   :  { %2098 = vmatprep.mubr.f32.mxu1 %v5179_v0  ;;  %2211 = vmatprep.mubr.f32.mxu0 %v5179_v0 }
 0x55b   :  { %4284 = vmatprep.subr.bf16.mxu1 %v5568_v18  ;;  %4316 = vmatprep.subr.bf16.mxu0 %v5570_v15 }
 0x55c   :  { %2099 = vmatmul.mubr.f32.gmra.mrb[34].mxu1 %v5534_v46  ;;  %2212 = vmatmul.mubr.f32.gmra.mrb[42].mxu0 %v5534_v46  ;;  %v2327_v46 = vld [vmem:[#allocation11 + $0x188] sm:$0xff] }
 0x55d   :  { %4286 = vmatpush1.bf16.msra.mxu1 %v5574_v23  ;;  %4318 = vmatpush1.bf16.msra.mxu0 %v5576_v27 }
 0x55e   :  { %2104 = vmatprep.mubr.f32.mxu1 %v5179_v0  ;;  %2217 = vmatprep.mubr.f32.mxu0 %v5179_v0 }
 0x55f   :  { %4288 = vmatprep.subr.bf16.mxu1 %v5582_v29  ;;  %4320 = vmatprep.subr.bf16.mxu0 %v5584_v31 }
 0x560   :  { %2105 = vmatmul.mubr.f32.gmra.mrb[36].mxu1 %v5536_v47  ;;  %2218 = vmatmul.mubr.f32.gmra.mrb[44].mxu0 %v5536_v47  ;;  %v5614_v47 = vpack.c.bf16 %v2331_v10, %v2327_v46 }
 0x561   :  { %4290 = vmatpush1.bf16.msra.mxu1 %v5590_v36  ;;  %4322 = vmatpush1.bf16.msra.mxu0 %v5592_v37 }
 0x562   :  { %2110 = vmatprep.mubr.f32.mxu1 %v5179_v0  ;;  %2223 = vmatprep.mubr.f32.mxu0 %v5179_v0 }
 0x563   :  { %4292 = vmatprep.subr.bf16.mxu1 %v5598_v43  ;;  %4324 = vmatprep.subr.bf16.mxu0 %v5600_v44 }
 0x564   :  { %2111 = vmatmul.mubr.f32.gmra.mrb[38].mxu1 %v5538_v48  ;;  %2224 = vmatmul.mubr.f32.gmra.mrb[46].mxu0 %v5538_v48  ;;  %v5630_v48 = vpack.c.bf16 %v2339_v26, %v2335_v2 }
 0x565   :  { %4294 = vmatpush1.bf16.msra.mxu1 %v5606_v12  ;;  %4326 = vmatpush1.bf16.msra.mxu0 %v5608_v55 }
 0x566   :  { %2116 = vmatprep.mubr.f32.mxu1 %v5179_v0  ;;  %2229 = vmatprep.mubr.f32.mxu0 %v5179_v0 }
 0x567   :  { %4296 = vmatprep.subr.bf16.mxu1 %v5614_v47  ;;  %4328 = vmatprep.subr.bf16.mxu0 %v5616_v1 }
 0x568   :  { %2117 = vmatmul.mubr.f32.gmra.mrb[40].mxu1 %v5540_v49  ;;  %2230 = vmatmul.mubr.f32.gmra.mrb[48].mxu0 %v5540_v49  ;;  %v1994_v49 = vld [vmem:[%s5994_s7] sm:$0xf] }
 0x569   :  { %4298 = vmatpush1.bf16.msra.mxu1 %v5622_v9  ;;  %4330 = vmatpush1.bf16.msra.mxu0 %v5624_v11  ;;  %v5699_v24 = vrot.slane %v1994_v49, %v182_v20  ;;  %v5704_v3 = vrot.slane %v1994_v49, %v186_v38  ;;  %v5709_v10 = vrot.slane %v1994_v49, %v2010_v40 }
 0x56a   :  { %2122 = vmatprep.mubr.f32.mxu1 %v5179_v0  ;;  %2235 = vmatprep.mubr.f32.mxu0 %v5179_v0 }
 0x56b   :  { %4300 = vmatprep.subr.bf16.mxu1 %v5630_v48  ;;  %4332 = vmatprep.subr.bf16.mxu0 %v5632_v16 }
 0x56c   :  { %2123 = vmatmul.mubr.f32.gmra.mrb[42].mxu1 %v5542_v51  ;;  %2236 = vmatmul.mubr.f32.gmra.mrb[50].mxu0 %v5542_v51  ;;  %v5695_v51 = vrot.slane %v1994_v49, %v178_v22 }
 0x56d   :  { %4302 = vmatpush1.bf16.msra.mxu1 %v5638_v58  ;;  %4334 = vmatpush1.bf16.msra.mxu0 %v5640_v25 }
 0x56e   :  { %2406 = vmatprep.mubr.f32.mxu1 %v5179_v0  ;;  %2477 = vmatprep.mubr.f32.mxu0 %v5179_v0 }
 0x56f   :  { %4336 = vmatprep.subr.bf16.mxu1 %v5509_v7  ;;  %4368 = vmatprep.subr.bf16.mxu0 %v5511_v50 }
 0x570   :  { %2407 = vmatmul.mubr.f32.vlgmr.msra.gmra.mrb[28].mxu1 %v5179_v0  ;;  %2478 = vmatmul.mubr.f32.vlgmr.msra.gmra.mrb[36].mxu0 %v5179_v0 }
 0x571   :  { %4338 = vmatpush1.bf16.msra.mxu1 %v5526_v28  ;;  %4370 = vmatpush1.bf16.msra.mxu0 %v5528_v30 }
 0x572   :  { %4340 = vmatprep.subr.bf16.mxu1 %v5530_v34  ;;  %4372 = vmatprep.subr.bf16.mxu0 %v5532_v35 }
 0x573   :  { %2575 = vmatprep.mubr.f32.mxu1 %v5179_v0  ;;  %2646 = vmatprep.mubr.f32.mxu0 %v5179_v0 }
 0x575   :  { %4342 = vmatpush1.bf16.msra.mxu1 %v5546_v53  ;;  %4374 = vmatpush1.bf16.msra.mxu0 %v5548_v54 }
 0x576   :  { %4344 = vmatprep.subr.bf16.mxu1 %v5554_v61  ;;  %4376 = vmatprep.subr.bf16.mxu0 %v5556_v62 }
 0x579   :  { %4346 = vmatpush1.bf16.msra.mxu1 %v5560_v4  ;;  %4378 = vmatpush1.bf16.msra.mxu0 %v5562_v6 }
 0x57a   :  { %4348 = vmatprep.subr.bf16.mxu1 %v5568_v18  ;;  %4380 = vmatprep.subr.bf16.mxu0 %v5570_v15 }
 0x57d   :  { %4350 = vmatpush1.bf16.msra.mxu1 %v5574_v23  ;;  %4382 = vmatpush1.bf16.msra.mxu0 %v5576_v27 }
 0x57e   :  { %4352 = vmatprep.subr.bf16.mxu1 %v5582_v29  ;;  %4384 = vmatprep.subr.bf16.mxu0 %v5584_v31 }
 0x581   :  { %4354 = vmatpush1.bf16.msra.mxu1 %v5590_v36  ;;  %4386 = vmatpush1.bf16.msra.mxu0 %v5592_v37 }
 0x582   :  { %4356 = vmatprep.subr.bf16.mxu1 %v5598_v43  ;;  %4388 = vmatprep.subr.bf16.mxu0 %v5600_v44 }
 0x585   :  { %4358 = vmatpush1.bf16.msra.mxu1 %v5606_v12  ;;  %4390 = vmatpush1.bf16.msra.mxu0 %v5608_v55 }
 0x586   :  { %4360 = vmatprep.subr.bf16.mxu1 %v5614_v47  ;;  %4392 = vmatprep.subr.bf16.mxu0 %v5616_v1 }
 0x589   :  { %4362 = vmatpush1.bf16.msra.mxu1 %v5622_v9  ;;  %4394 = vmatpush1.bf16.msra.mxu0 %v5624_v11 }
 0x58a   :  { %4364 = vmatprep.subr.bf16.mxu1 %v5630_v48  ;;  %4396 = vmatprep.subr.bf16.mxu0 %v5632_v16 }
 0x58d   :  { %4366 = vmatpush1.bf16.msra.mxu1 %v5638_v58  ;;  %4398 = vmatpush1.bf16.msra.mxu0 %v5640_v25 }
 0x58e   :  { %4400 = vmatprep.subr.bf16.mxu1 %v5509_v7  ;;  %4432 = vmatprep.subr.bf16.mxu0 %v5511_v50 }
 0x643   :  { %v2408_v32 = vpop.f32.mrb[28].mxu1  ;;  %v2479_v5 = vpop.f32.mrb[36].mxu0 }
 0x644   :  { %v4807_v33 = vadd.f32 %v2408_v32, %v5695_v51  ;;  %v2410_v39 = vpop.f32.mrb[29].mxu1  ;;  %v2481_v41 = vpop.f32.mrb[37].mxu0  ;;  %v4823_v20 = vadd.f32 %v2479_v5, %v5704_v3 }
 0x645   :  { %v4808_v42 = vadd.f32 %v2410_v39, %v5699_v24  ;;  %v4824_v45 = vadd.f32 %v2481_v41, %v5709_v10 }
 0x646   :  { %v2488_v22 = vmul.f32 0.5, %v4807_v33 }
 0x647   :  { %v2492_v46 = vmul.f32 0.5, %v4808_v42  ;;  %v2497_v13 = vmul.f32 0.5, %v4824_v45 }
 0x648   :  { %4921 = vtanh.f32 %v2488_v22 }
 0x649   :  { %4923 = vtanh.f32 %v2492_v46 }
 0x64a   :  { %4925 = vtanh.f32 %v4823_v20 }
 0x64b   :  { %4927 = vtanh.f32 %v2497_v13 }
 0x652   :  { %v4922_v38 = vpop.eup %4921 }
 0x653   :  { %v4924_v56 = vpop.eup %4923  ;;  %v2490_v57 = vadd.f32 1.0, %v4922_v38 }
 0x654   :  { %v2494_v59 = vadd.f32 1.0, %v4924_v56  ;;  %v4926_v63 = vpop.eup %4925 }
 0x655   :  { %v2491_v19 = vmul.f32 0.5, %v2490_v57  ;;  %v4928_v60 = vpop.eup %4927 }
 0x656   :  { %v2495_v2 = vmul.f32 0.5, %v2494_v59  ;;  %v2499_v17 = vadd.f32 1.0, %v4928_v60 }
 0x657   :  { %v2502_v26 = vmul.f32 %v4926_v63, %v2491_v19 }
 0x658   :  { %v2501_v52 = vmul.f32 0.0, %v2495_v2  ;;  %v2500_v14 = vmul.f32 0.5, %v2499_v17 }
 0x65a   :  { %v5712_v8 = vadd.f32 %v2502_v26, %v2501_v52 }
 0x65c   :  { %4929 = vtanh.f32 %v5712_v8 }
 0x666   :  { %v4930_v21 = vpop.eup %4929 }
 0x667   :  { %v2505_v49 = vmul.f32 %v4930_v21, %v2500_v14 }
 0x669   :  { %2576 = vmatmul.mubr.f32.vlgmr.msra.gmra.mrb[30].mxu1 %v2505_v49  ;;  %2647 = vmatmul.mubr.f32.vlgmr.msra.gmra.mrb[38].mxu0 %v2505_v49 }
 0x66a   :  { %4402 = vmatpush1.bf16.msra.mxu1 %v5526_v28  ;;  %4434 = vmatpush1.bf16.msra.mxu0 %v5528_v30 }
 0x66b   :  { %4404 = vmatprep.subr.bf16.mxu1 %v5530_v34  ;;  %4436 = vmatprep.subr.bf16.mxu0 %v5532_v35 }
 0x66c   :  { %2744 = vmatprep.mubr.f32.mxu1 %v5179_v0  ;;  %2815 = vmatprep.mubr.f32.mxu0 %v5179_v0 }
 0x66e   :  { %4406 = vmatpush1.bf16.msra.mxu1 %v5546_v53  ;;  %4438 = vmatpush1.bf16.msra.mxu0 %v5548_v54 }
 0x66f   :  { %4408 = vmatprep.subr.bf16.mxu1 %v5554_v61  ;;  %4440 = vmatprep.subr.bf16.mxu0 %v5556_v62 }
 0x672   :  { %4410 = vmatpush1.bf16.msra.mxu1 %v5560_v4  ;;  %4442 = vmatpush1.bf16.msra.mxu0 %v5562_v6 }
 0x673   :  { %4412 = vmatprep.subr.bf16.mxu1 %v5568_v18  ;;  %4444 = vmatprep.subr.bf16.mxu0 %v5570_v15 }
 0x676   :  { %4414 = vmatpush1.bf16.msra.mxu1 %v5574_v23  ;;  %4446 = vmatpush1.bf16.msra.mxu0 %v5576_v27 }
 0x677   :  { %4416 = vmatprep.subr.bf16.mxu1 %v5582_v29  ;;  %4448 = vmatprep.subr.bf16.mxu0 %v5584_v31 }
 0x67a   :  { %4418 = vmatpush1.bf16.msra.mxu1 %v5590_v36  ;;  %4450 = vmatpush1.bf16.msra.mxu0 %v5592_v37 }
 0x67b   :  { %4420 = vmatprep.subr.bf16.mxu1 %v5598_v43  ;;  %4452 = vmatprep.subr.bf16.mxu0 %v5600_v44 }
 0x67e   :  { %4422 = vmatpush1.bf16.msra.mxu1 %v5606_v12  ;;  %4454 = vmatpush1.bf16.msra.mxu0 %v5608_v55 }
 0x67f   :  { %4424 = vmatprep.subr.bf16.mxu1 %v5614_v47  ;;  %4456 = vmatprep.subr.bf16.mxu0 %v5616_v1 }
 0x682   :  { %4426 = vmatpush1.bf16.msra.mxu1 %v5622_v9  ;;  %4458 = vmatpush1.bf16.msra.mxu0 %v5624_v11 }
 0x683   :  { %4428 = vmatprep.subr.bf16.mxu1 %v5630_v48  ;;  %4460 = vmatprep.subr.bf16.mxu0 %v5632_v16 }
 0x686   :  { %4430 = vmatpush1.bf16.msra.mxu1 %v5638_v58  ;;  %4462 = vmatpush1.bf16.msra.mxu0 %v5640_v25 }
 0x687   :  { %4464 = vmatprep.subr.bf16.mxu1 %v5509_v7  ;;  %4496 = vmatprep.subr.bf16.mxu0 %v5511_v50 }
 0x73c   :  { %v2577_v32 = vpop.f32.mrb[30].mxu1  ;;  %v2648_v5 = vpop.f32.mrb[38].mxu0 }
 0x73d   :  { %v4809_v33 = vadd.f32 %v2577_v32, %v5695_v51  ;;  %v2579_v39 = vpop.f32.mrb[31].mxu1  ;;  %v2650_v40 = vpop.f32.mrb[39].mxu0  ;;  %v4825_v46 = vadd.f32 %v2648_v5, %v5704_v3 }
 0x73e   :  { %v4810_v41 = vadd.f32 %v2579_v39, %v5699_v24  ;;  %v4826_v20 = vadd.f32 %v2650_v40, %v5709_v10 }
 0x73f   :  { %v2657_v42 = vmul.f32 0.5, %v4809_v33 }
 0x740   :  { %v2661_v22 = vmul.f32 0.5, %v4810_v41  ;;  %v2666_v45 = vmul.f32 0.5, %v4826_v20 }
 0x741   :  { %4931 = vtanh.f32 %v2657_v42 }
 0x742   :  { %4933 = vtanh.f32 %v2661_v22 }
 0x743   :  { %4935 = vtanh.f32 %v4825_v46 }
 0x744   :  { %4937 = vtanh.f32 %v2666_v45 }
 0x74b   :  { %v4932_v13 = vpop.eup %4931 }
 0x74c   :  { %v4934_v38 = vpop.eup %4933  ;;  %v2659_v56 = vadd.f32 1.0, %v4932_v13 }
 0x74d   :  { %v2663_v57 = vadd.f32 1.0, %v4934_v38  ;;  %v4936_v19 = vpop.eup %4935 }
 0x74e   :  { %v2660_v59 = vmul.f32 0.5, %v2659_v56  ;;  %v4938_v60 = vpop.eup %4937 }
 0x74f   :  { %v2664_v63 = vmul.f32 0.5, %v2663_v57  ;;  %v2668_v17 = vadd.f32 1.0, %v4938_v60 }
 0x750   :  { %v2671_v2 = vmul.f32 %v4936_v19, %v2660_v59 }
 0x751   :  { %v2670_v26 = vmul.f32 %v2664_v63, %v5712_v8  ;;  %v2669_v14 = vmul.f32 0.5, %v2668_v17 }
 0x753   :  { %v5754_v52 = vadd.f32 %v2671_v2, %v2670_v26 }
 0x755   :  { %4939 = vtanh.f32 %v5754_v52 }
 0x75f   :  { %v4940_v21 = vpop.eup %4939 }
 0x760   :  { %v2674_v49 = vmul.f32 %v4940_v21, %v2669_v14 }
 0x762   :  { %2745 = vmatmul.mubr.f32.vlgmr.msra.gmra.mrb[32].mxu1 %v2674_v49  ;;  %2816 = vmatmul.mubr.f32.vlgmr.msra.gmra.mrb[40].mxu0 %v2674_v49 }
 0x763   :  { %4466 = vmatpush1.bf16.msra.mxu1 %v5526_v28  ;;  %4498 = vmatpush1.bf16.msra.mxu0 %v5528_v30 }
 0x764   :  { %4468 = vmatprep.subr.bf16.mxu1 %v5530_v34  ;;  %4500 = vmatprep.subr.bf16.mxu0 %v5532_v35 }
 0x765   :  { %2913 = vmatprep.mubr.f32.mxu1 %v5179_v0  ;;  %2984 = vmatprep.mubr.f32.mxu0 %v5179_v0 }
 0x767   :  { %4470 = vmatpush1.bf16.msra.mxu1 %v5546_v53  ;;  %4502 = vmatpush1.bf16.msra.mxu0 %v5548_v54 }
 0x768   :  { %4472 = vmatprep.subr.bf16.mxu1 %v5554_v61  ;;  %4504 = vmatprep.subr.bf16.mxu0 %v5556_v62 }
 0x76b   :  { %4474 = vmatpush1.bf16.msra.mxu1 %v5560_v4  ;;  %4506 = vmatpush1.bf16.msra.mxu0 %v5562_v6 }
 0x76c   :  { %4476 = vmatprep.subr.bf16.mxu1 %v5568_v18  ;;  %4508 = vmatprep.subr.bf16.mxu0 %v5570_v15 }
 0x76f   :  { %4478 = vmatpush1.bf16.msra.mxu1 %v5574_v23  ;;  %4510 = vmatpush1.bf16.msra.mxu0 %v5576_v27 }
 0x770   :  { %4480 = vmatprep.subr.bf16.mxu1 %v5582_v29  ;;  %4512 = vmatprep.subr.bf16.mxu0 %v5584_v31 }
 0x773   :  { %4482 = vmatpush1.bf16.msra.mxu1 %v5590_v36  ;;  %4514 = vmatpush1.bf16.msra.mxu0 %v5592_v37 }
 0x774   :  { %4484 = vmatprep.subr.bf16.mxu1 %v5598_v43  ;;  %4516 = vmatprep.subr.bf16.mxu0 %v5600_v44 }
 0x777   :  { %4486 = vmatpush1.bf16.msra.mxu1 %v5606_v12  ;;  %4518 = vmatpush1.bf16.msra.mxu0 %v5608_v55 }
 0x778   :  { %4488 = vmatprep.subr.bf16.mxu1 %v5614_v47  ;;  %4520 = vmatprep.subr.bf16.mxu0 %v5616_v1 }
 0x77b   :  { %4490 = vmatpush1.bf16.msra.mxu1 %v5622_v9  ;;  %4522 = vmatpush1.bf16.msra.mxu0 %v5624_v11 }
 0x77c   :  { %4492 = vmatprep.subr.bf16.mxu1 %v5630_v48  ;;  %4524 = vmatprep.subr.bf16.mxu0 %v5632_v16 }
 0x77f   :  { %4494 = vmatpush1.bf16.msra.mxu1 %v5638_v58  ;;  %4526 = vmatpush1.bf16.msra.mxu0 %v5640_v25 }
 0x780   :  { %4528 = vmatprep.subr.bf16.mxu1 %v5509_v7  ;;  %4560 = vmatprep.subr.bf16.mxu0 %v5511_v50 }
 0x835   :  { %v2746_v8 = vpop.f32.mrb[32].mxu1  ;;  %v2817_v32 = vpop.f32.mrb[40].mxu0 }
 0x836   :  { %v4811_v5 = vadd.f32 %v2746_v8, %v5695_v51  ;;  %v2748_v33 = vpop.f32.mrb[33].mxu1  ;;  %v2819_v39 = vpop.f32.mrb[41].mxu0  ;;  %v4827_v22 = vadd.f32 %v2817_v32, %v5704_v3 }
 0x837   :  { %v4812_v40 = vadd.f32 %v2748_v33, %v5699_v24  ;;  %v4828_v46 = vadd.f32 %v2819_v39, %v5709_v10 }
 0x838   :  { %v2826_v41 = vmul.f32 0.5, %v4811_v5 }
 0x839   :  { %v2830_v42 = vmul.f32 0.5, %v4812_v40  ;;  %v2835_v20 = vmul.f32 0.5, %v4828_v46 }
 0x83a   :  { %4941 = vtanh.f32 %v2826_v41 }
 0x83b   :  { %4943 = vtanh.f32 %v2830_v42 }
 0x83c   :  { %4945 = vtanh.f32 %v4827_v22 }
 0x83d   :  { %4947 = vtanh.f32 %v2835_v20 }
 0x844   :  { %v4942_v45 = vpop.eup %4941 }
 0x845   :  { %v4944_v13 = vpop.eup %4943  ;;  %v2828_v38 = vadd.f32 1.0, %v4942_v45 }
 0x846   :  { %v2832_v56 = vadd.f32 1.0, %v4944_v13  ;;  %v4946_v59 = vpop.eup %4945 }
 0x847   :  { %v2829_v57 = vmul.f32 0.5, %v2828_v38  ;;  %v4948_v60 = vpop.eup %4947 }
 0x848   :  { %v2833_v19 = vmul.f32 0.5, %v2832_v56  ;;  %v2837_v17 = vadd.f32 1.0, %v4948_v60 }
 0x849   :  { %v2840_v63 = vmul.f32 %v4946_v59, %v2829_v57 }
 0x84a   :  { %v2839_v2 = vmul.f32 %v2833_v19, %v5754_v52  ;;  %v2838_v14 = vmul.f32 0.5, %v2837_v17 }
 0x84c   :  { %v5796_v26 = vadd.f32 %v2840_v63, %v2839_v2 }
 0x84e   :  { %4949 = vtanh.f32 %v5796_v26 }
 0x858   :  { %v4950_v21 = vpop.eup %4949 }
 0x859   :  { %v2843_v49 = vmul.f32 %v4950_v21, %v2838_v14 }
 0x85b   :  { %2914 = vmatmul.mubr.f32.vlgmr.msra.gmra.mrb[34].mxu1 %v2843_v49  ;;  %2985 = vmatmul.mubr.f32.vlgmr.msra.gmra.mrb[42].mxu0 %v2843_v49 }
 0x85c   :  { %4530 = vmatpush1.bf16.msra.mxu1 %v5526_v28  ;;  %4562 = vmatpush1.bf16.msra.mxu0 %v5528_v30 }
 0x85d   :  { %4532 = vmatprep.subr.bf16.mxu1 %v5530_v34  ;;  %4564 = vmatprep.subr.bf16.mxu0 %v5532_v35 }
 0x85e   :  { %3082 = vmatprep.mubr.f32.mxu1 %v5179_v0  ;;  %3153 = vmatprep.mubr.f32.mxu0 %v5179_v0 }
 0x860   :  { %4534 = vmatpush1.bf16.msra.mxu1 %v5546_v53  ;;  %4566 = vmatpush1.bf16.msra.mxu0 %v5548_v54 }
 0x861   :  { %4536 = vmatprep.subr.bf16.mxu1 %v5554_v61  ;;  %4568 = vmatprep.subr.bf16.mxu0 %v5556_v62 }
 0x864   :  { %4538 = vmatpush1.bf16.msra.mxu1 %v5560_v4  ;;  %4570 = vmatpush1.bf16.msra.mxu0 %v5562_v6 }
 0x865   :  { %4540 = vmatprep.subr.bf16.mxu1 %v5568_v18  ;;  %4572 = vmatprep.subr.bf16.mxu0 %v5570_v15 }
 0x868   :  { %4542 = vmatpush1.bf16.msra.mxu1 %v5574_v23  ;;  %4574 = vmatpush1.bf16.msra.mxu0 %v5576_v27 }
 0x869   :  { %4544 = vmatprep.subr.bf16.mxu1 %v5582_v29  ;;  %4576 = vmatprep.subr.bf16.mxu0 %v5584_v31 }
 0x86c   :  { %4546 = vmatpush1.bf16.msra.mxu1 %v5590_v36  ;;  %4578 = vmatpush1.bf16.msra.mxu0 %v5592_v37 }
 0x86d   :  { %4548 = vmatprep.subr.bf16.mxu1 %v5598_v43  ;;  %4580 = vmatprep.subr.bf16.mxu0 %v5600_v44 }
 0x870   :  { %4550 = vmatpush1.bf16.msra.mxu1 %v5606_v12  ;;  %4582 = vmatpush1.bf16.msra.mxu0 %v5608_v55 }
 0x871   :  { %4552 = vmatprep.subr.bf16.mxu1 %v5614_v47  ;;  %4584 = vmatprep.subr.bf16.mxu0 %v5616_v1 }
 0x874   :  { %4554 = vmatpush1.bf16.msra.mxu1 %v5622_v9  ;;  %4586 = vmatpush1.bf16.msra.mxu0 %v5624_v11 }
 0x875   :  { %4556 = vmatprep.subr.bf16.mxu1 %v5630_v48  ;;  %4588 = vmatprep.subr.bf16.mxu0 %v5632_v16 }
 0x878   :  { %4558 = vmatpush1.bf16.msra.mxu1 %v5638_v58  ;;  %4590 = vmatpush1.bf16.msra.mxu0 %v5640_v25 }
 0x879   :  { %4592 = vmatprep.subr.bf16.mxu1 %v5509_v7  ;;  %4624 = vmatprep.subr.bf16.mxu0 %v5511_v50 }
 0x92e   :  { %v2915_v52 = vpop.f32.mrb[34].mxu1  ;;  %v2986_v8 = vpop.f32.mrb[42].mxu0 }
 0x92f   :  { %v4813_v32 = vadd.f32 %v2915_v52, %v5695_v51  ;;  %v2917_v5 = vpop.f32.mrb[35].mxu1  ;;  %v2988_v33 = vpop.f32.mrb[43].mxu0  ;;  %v4829_v42 = vadd.f32 %v2986_v8, %v5704_v3 }
 0x930   :  { %v4814_v39 = vadd.f32 %v2917_v5, %v5699_v24  ;;  %v4830_v22 = vadd.f32 %v2988_v33, %v5709_v10 }
 0x931   :  { %v2995_v40 = vmul.f32 0.5, %v4813_v32 }
 0x932   :  { %v2999_v41 = vmul.f32 0.5, %v4814_v39  ;;  %v3004_v46 = vmul.f32 0.5, %v4830_v22 }
 0x933   :  { %4951 = vtanh.f32 %v2995_v40 }
 0x934   :  { %4953 = vtanh.f32 %v2999_v41 }
 0x935   :  { %4955 = vtanh.f32 %v4829_v42 }
 0x936   :  { %4957 = vtanh.f32 %v3004_v46 }
 0x93d   :  { %v4952_v20 = vpop.eup %4951 }
 0x93e   :  { %v4954_v45 = vpop.eup %4953  ;;  %v2997_v13 = vadd.f32 1.0, %v4952_v20 }
 0x93f   :  { %v3001_v38 = vadd.f32 1.0, %v4954_v45  ;;  %v4956_v57 = vpop.eup %4955 }
 0x940   :  { %v2998_v56 = vmul.f32 0.5, %v2997_v13  ;;  %v4958_v60 = vpop.eup %4957 }
 0x941   :  { %v3002_v59 = vmul.f32 0.5, %v3001_v38  ;;  %v3006_v17 = vadd.f32 1.0, %v4958_v60 }
 0x942   :  { %v3009_v19 = vmul.f32 %v4956_v57, %v2998_v56 }
 0x943   :  { %v3008_v63 = vmul.f32 %v3002_v59, %v5796_v26  ;;  %v3007_v14 = vmul.f32 0.5, %v3006_v17 }
 0x945   :  { %v5838_v2 = vadd.f32 %v3009_v19, %v3008_v63 }
 0x947   :  { %4959 = vtanh.f32 %v5838_v2 }
 0x951   :  { %v4960_v21 = vpop.eup %4959 }
 0x952   :  { %v3012_v49 = vmul.f32 %v4960_v21, %v3007_v14 }
 0x954   :  { %3083 = vmatmul.mubr.f32.vlgmr.msra.gmra.mrb[36].mxu1 %v3012_v49  ;;  %3154 = vmatmul.mubr.f32.vlgmr.msra.gmra.mrb[44].mxu0 %v3012_v49 }
 0x955   :  { %4594 = vmatpush1.bf16.msra.mxu1 %v5526_v28  ;;  %4626 = vmatpush1.bf16.msra.mxu0 %v5528_v30 }
 0x956   :  { %4596 = vmatprep.subr.bf16.mxu1 %v5530_v34  ;;  %4628 = vmatprep.subr.bf16.mxu0 %v5532_v35 }
 0x957   :  { %3251 = vmatprep.mubr.f32.mxu1 %v5179_v0  ;;  %3322 = vmatprep.mubr.f32.mxu0 %v5179_v0 }
 0x959   :  { %4598 = vmatpush1.bf16.msra.mxu1 %v5546_v53  ;;  %4630 = vmatpush1.bf16.msra.mxu0 %v5548_v54 }
 0x95a   :  { %4600 = vmatprep.subr.bf16.mxu1 %v5554_v61  ;;  %4632 = vmatprep.subr.bf16.mxu0 %v5556_v62 }
 0x95d   :  { %4602 = vmatpush1.bf16.msra.mxu1 %v5560_v4  ;;  %4634 = vmatpush1.bf16.msra.mxu0 %v5562_v6 }
 0x95e   :  { %4604 = vmatprep.subr.bf16.mxu1 %v5568_v18  ;;  %4636 = vmatprep.subr.bf16.mxu0 %v5570_v15 }
 0x961   :  { %4606 = vmatpush1.bf16.msra.mxu1 %v5574_v23  ;;  %4638 = vmatpush1.bf16.msra.mxu0 %v5576_v27 }
 0x962   :  { %4608 = vmatprep.subr.bf16.mxu1 %v5582_v29  ;;  %4640 = vmatprep.subr.bf16.mxu0 %v5584_v31 }
 0x965   :  { %4610 = vmatpush1.bf16.msra.mxu1 %v5590_v36  ;;  %4642 = vmatpush1.bf16.msra.mxu0 %v5592_v37 }
 0x966   :  { %4612 = vmatprep.subr.bf16.mxu1 %v5598_v43  ;;  %4644 = vmatprep.subr.bf16.mxu0 %v5600_v44 }
 0x969   :  { %4614 = vmatpush1.bf16.msra.mxu1 %v5606_v12  ;;  %4646 = vmatpush1.bf16.msra.mxu0 %v5608_v55 }
 0x96a   :  { %4616 = vmatprep.subr.bf16.mxu1 %v5614_v47  ;;  %4648 = vmatprep.subr.bf16.mxu0 %v5616_v1 }
 0x96d   :  { %4618 = vmatpush1.bf16.msra.mxu1 %v5622_v9  ;;  %4650 = vmatpush1.bf16.msra.mxu0 %v5624_v11 }
 0x96e   :  { %4620 = vmatprep.subr.bf16.mxu1 %v5630_v48  ;;  %4652 = vmatprep.subr.bf16.mxu0 %v5632_v16 }
 0x971   :  { %4622 = vmatpush1.bf16.msra.mxu1 %v5638_v58  ;;  %4654 = vmatpush1.bf16.msra.mxu0 %v5640_v25 }
 0x972   :  { %4656 = vmatprep.subr.bf16.mxu1 %v5509_v7  ;;  %4688 = vmatprep.subr.bf16.mxu0 %v5511_v50 }
 0xa27   :  { %v3084_v26 = vpop.f32.mrb[36].mxu1  ;;  %v3155_v52 = vpop.f32.mrb[44].mxu0 }
 0xa28   :  { %v4815_v8 = vadd.f32 %v3084_v26, %v5695_v51  ;;  %v3086_v32 = vpop.f32.mrb[37].mxu1  ;;  %v3157_v5 = vpop.f32.mrb[45].mxu0  ;;  %v4831_v41 = vadd.f32 %v3155_v52, %v5704_v3 }
 0xa29   :  { %v4816_v33 = vadd.f32 %v3086_v32, %v5699_v24  ;;  %v4832_v42 = vadd.f32 %v3157_v5, %v5709_v10 }
 0xa2a   :  { %v3164_v39 = vmul.f32 0.5, %v4815_v8 }
 0xa2b   :  { %v3168_v40 = vmul.f32 0.5, %v4816_v33  ;;  %v3173_v22 = vmul.f32 0.5, %v4832_v42 }
 0xa2c   :  { %4961 = vtanh.f32 %v3164_v39 }
 0xa2d   :  { %4963 = vtanh.f32 %v3168_v40 }
 0xa2e   :  { %4965 = vtanh.f32 %v4831_v41 }
 0xa2f   :  { %4967 = vtanh.f32 %v3173_v22 }
 0xa36   :  { %v4962_v46 = vpop.eup %4961 }
 0xa37   :  { %v4964_v20 = vpop.eup %4963  ;;  %v3166_v45 = vadd.f32 1.0, %v4962_v46 }
 0xa38   :  { %v3170_v13 = vadd.f32 1.0, %v4964_v20  ;;  %v4966_v56 = vpop.eup %4965 }
 0xa39   :  { %v3167_v38 = vmul.f32 0.5, %v3166_v45  ;;  %v4968_v60 = vpop.eup %4967 }
 0xa3a   :  { %v3171_v57 = vmul.f32 0.5, %v3170_v13  ;;  %v3175_v17 = vadd.f32 1.0, %v4968_v60 }
 0xa3b   :  { %v3178_v59 = vmul.f32 %v4966_v56, %v3167_v38 }
 0xa3c   :  { %v3177_v19 = vmul.f32 %v3171_v57, %v5838_v2  ;;  %v3176_v14 = vmul.f32 0.5, %v3175_v17 }
 0xa3e   :  { %v5880_v63 = vadd.f32 %v3178_v59, %v3177_v19 }
 0xa40   :  { %4969 = vtanh.f32 %v5880_v63 }
 0xa4a   :  { %v4970_v21 = vpop.eup %4969 }
 0xa4b   :  { %v3181_v49 = vmul.f32 %v4970_v21, %v3176_v14  ;;  %v3692_v21 = vld [vmem:[#allocation12 + $0x18] sm:$0xff] }
 0xa4d   :  { %3252 = vmatmul.mubr.f32.vlgmr.msra.gmra.mrb[38].mxu1 %v3181_v49  ;;  %3323 = vmatmul.mubr.f32.vlgmr.msra.gmra.mrb[46].mxu0 %v3181_v49 }
 0xa4e   :  { %4658 = vmatpush1.bf16.msra.mxu1 %v5526_v28  ;;  %4690 = vmatpush1.bf16.msra.mxu0 %v5528_v30 }
 0xa4f   :  { %4660 = vmatprep.subr.bf16.mxu1 %v5530_v34  ;;  %4692 = vmatprep.subr.bf16.mxu0 %v5532_v35 }
 0xa50   :  { %3420 = vmatprep.mubr.f32.mxu1 %v5179_v0  ;;  %3491 = vmatprep.mubr.f32.mxu0 %v5179_v0 }
 0xa52   :  { %4662 = vmatpush1.bf16.msra.mxu1 %v5546_v53  ;;  %4694 = vmatpush1.bf16.msra.mxu0 %v5548_v54 }
 0xa53   :  { %4664 = vmatprep.subr.bf16.mxu1 %v5554_v61  ;;  %4696 = vmatprep.subr.bf16.mxu0 %v5556_v62 }
 0xa56   :  { %4666 = vmatpush1.bf16.msra.mxu1 %v5560_v4  ;;  %4698 = vmatpush1.bf16.msra.mxu0 %v5562_v6 }
 0xa57   :  { %4668 = vmatprep.subr.bf16.mxu1 %v5568_v18  ;;  %4700 = vmatprep.subr.bf16.mxu0 %v5570_v15 }
 0xa5a   :  { %4670 = vmatpush1.bf16.msra.mxu1 %v5574_v23  ;;  %4702 = vmatpush1.bf16.msra.mxu0 %v5576_v27 }
 0xa5b   :  { %4672 = vmatprep.subr.bf16.mxu1 %v5582_v29  ;;  %4704 = vmatprep.subr.bf16.mxu0 %v5584_v31 }
 0xa5e   :  { %4674 = vmatpush1.bf16.msra.mxu1 %v5590_v36  ;;  %4706 = vmatpush1.bf16.msra.mxu0 %v5592_v37 }
 0xa5f   :  { %4676 = vmatprep.subr.bf16.mxu1 %v5598_v43  ;;  %4708 = vmatprep.subr.bf16.mxu0 %v5600_v44 }
 0xa62   :  { %4678 = vmatpush1.bf16.msra.mxu1 %v5606_v12  ;;  %4710 = vmatpush1.bf16.msra.mxu0 %v5608_v55 }
 0xa63   :  { %4680 = vmatprep.subr.bf16.mxu1 %v5614_v47  ;;  %4712 = vmatprep.subr.bf16.mxu0 %v5616_v1 }
 0xa66   :  { %4682 = vmatpush1.bf16.msra.mxu1 %v5622_v9  ;;  %4714 = vmatpush1.bf16.msra.mxu0 %v5624_v11 }
 0xa67   :  { %4684 = vmatprep.subr.bf16.mxu1 %v5630_v48  ;;  %4716 = vmatprep.subr.bf16.mxu0 %v5632_v16 }
 0xa6a   :  { %4686 = vmatpush1.bf16.msra.mxu1 %v5638_v58  ;;  %4718 = vmatpush1.bf16.msra.mxu0 %v5640_v25 }
 0xa6b   :  { %4720 = vmatprep.subr.bf16.mxu1 %v5509_v7  ;;  %4752 = vmatprep.subr.bf16.mxu0 %v5511_v50 }
 0xb20   :  { %v3253_v2 = vpop.f32.mrb[38].mxu1  ;;  %v3324_v26 = vpop.f32.mrb[46].mxu0 }
 0xb21   :  { %v4817_v52 = vadd.f32 %v3253_v2, %v5695_v51  ;;  %v3255_v8 = vpop.f32.mrb[39].mxu1  ;;  %v3326_v32 = vpop.f32.mrb[47].mxu0  ;;  %v4833_v40 = vadd.f32 %v3324_v26, %v5704_v3  ;;  %v3693_v2 = vld [vmem:[#allocation12 + $0x20] sm:$0xff]  ;;  %v3694_v26 = vld [vmem:[#allocation12 + $0x28] sm:$0xff] }
 0xb22   :  { %v4818_v5 = vadd.f32 %v3255_v8, %v5699_v24  ;;  %v4834_v41 = vadd.f32 %v3326_v32, %v5709_v10  ;;  %v3695_v8 = vld [vmem:[#allocation12 + $0x30] sm:$0xff]  ;;  %v3696_v32 = vld [vmem:[#allocation12 + $0x38] sm:$0xff] }
 0xb23   :  { %v3333_v33 = vmul.f32 0.5, %v4817_v52  ;;  %v4790_v52 = vpack.c.bf16 %v3694_v26, %v3693_v2 }
 0xb24   :  { %v3337_v39 = vmul.f32 0.5, %v4818_v5  ;;  %v3342_v7 = vmul.f32 0.5, %v4834_v41  ;;  %v3697_v5 = vld [vmem:[#allocation12 + $0x40] sm:$0xff]  ;;  %v3700_v41 = vld [vmem:[#allocation12 + $0x58] sm:$0xff] }
 0xb25   :  { %4971 = vtanh.f32 %v3333_v33  ;;  %v3698_v33 = vld [vmem:[#allocation12 + $0x48] sm:$0xff] }
 0xb26   :  { %4973 = vtanh.f32 %v3337_v39  ;;  %v4796_v39 = vpack.c.bf16 %v3698_v33, %v3697_v5 }
 0xb27   :  { %4975 = vtanh.f32 %v4833_v40  ;;  %v3699_v40 = vld [vmem:[#allocation12 + $0x50] sm:$0xff] }
 0xb28   :  { %4977 = vtanh.f32 %v3342_v7  ;;  %v4799_v7 = vpack.c.bf16 %v3700_v41, %v3699_v40 }
 0xb2f   :  { %v4972_v42 = vpop.eup %4971 }
 0xb30   :  { %v4974_v50 = vpop.eup %4973  ;;  %v3335_v22 = vadd.f32 1.0, %v4972_v42  ;;  %v3701_v42 = vld [vmem:[#allocation12 + $0x60] sm:$0xff] }
 0xb31   :  { %v3339_v46 = vadd.f32 1.0, %v4974_v50  ;;  %v4976_v45 = vpop.eup %4975  ;;  %v3702_v50 = vld [vmem:[#allocation12 + $0x68] sm:$0xff] }
 0xb32   :  { %v3336_v20 = vmul.f32 0.5, %v3335_v22  ;;  %v4978_v59 = vpop.eup %4977  ;;  %v4802_v22 = vpack.c.bf16 %v3702_v50, %v3701_v42 }
 0xb33   :  { %v3340_v13 = vmul.f32 0.5, %v3339_v46  ;;  %v3344_v19 = vadd.f32 1.0, %v4978_v59  ;;  %v3703_v46 = vld [vmem:[#allocation12 + $0x70] sm:$0xff] }
 0xb34   :  { %v3347_v38 = vmul.f32 %v4976_v45, %v3336_v20  ;;  %v3704_v20 = vld [vmem:[#allocation12 + $0x78] sm:$0xff] }
 0xb35   :  { %v3346_v56 = vmul.f32 %v3340_v13, %v5880_v63  ;;  %v3345_v60 = vmul.f32 0.5, %v3344_v19  ;;  %v3691_v63 = vld [vmem:[#allocation12 + $0x10] sm:$0xff]  ;;  %v4805_v45 = vpack.c.bf16 %v3704_v20, %v3703_v46 }
 0xb36   :  { %v4787_v49 = vpack.c.bf16 %v3692_v21, %v3691_v63 }
 0xb37   :  { %v5922_v57 = vadd.f32 %v3347_v38, %v3346_v56 }
 0xb39   :  { %4979 = vtanh.f32 %v5922_v57 }
 0xb43   :  { %v4980_v17 = vpop.eup %4979 }
 0xb44   :  { %v3350_v14 = vmul.f32 %v4980_v17, %v3345_v60 }
 0xb46   :  { %3421 = vmatmul.mubr.f32.vlgmr.msra.gmra.mrb[40].mxu1 %v3350_v14  ;;  %3492 = vmatmul.mubr.f32.vlgmr.msra.gmra.mrb[48].mxu0 %v3350_v14 }
 0xb47   :  { %4722 = vmatpush1.bf16.msra.mxu1 %v5526_v28  ;;  %4754 = vmatpush1.bf16.msra.mxu0 %v5528_v30 }
 0xb48   :  { %4724 = vmatprep.subr.bf16.mxu1 %v5530_v34  ;;  %4756 = vmatprep.subr.bf16.mxu0 %v5532_v35 }
 0xb49   :  { %3589 = vmatprep.mubr.f32.mxu1 %v5179_v0  ;;  %3660 = vmatprep.mubr.f32.mxu0 %v5179_v0 }
 0xb4b   :  { %4726 = vmatpush1.bf16.msra.mxu1 %v5546_v53  ;;  %4758 = vmatpush1.bf16.msra.mxu0 %v5548_v54 }
 0xb4c   :  { %4728 = vmatprep.subr.bf16.mxu1 %v5554_v61  ;;  %4760 = vmatprep.subr.bf16.mxu0 %v5556_v62 }
 0xb4f   :  { %4730 = vmatpush1.bf16.msra.mxu1 %v5560_v4  ;;  %4762 = vmatpush1.bf16.msra.mxu0 %v5562_v6 }
 0xb50   :  { %4732 = vmatprep.subr.bf16.mxu1 %v5568_v18  ;;  %4764 = vmatprep.subr.bf16.mxu0 %v5570_v15 }
 0xb53   :  { %4734 = vmatpush1.bf16.msra.mxu1 %v5574_v23  ;;  %4766 = vmatpush1.bf16.msra.mxu0 %v5576_v27 }
 0xb54   :  { %4736 = vmatprep.subr.bf16.mxu1 %v5582_v29  ;;  %4768 = vmatprep.subr.bf16.mxu0 %v5584_v31 }
 0xb57   :  { %4738 = vmatpush1.bf16.msra.mxu1 %v5590_v36  ;;  %4770 = vmatpush1.bf16.msra.mxu0 %v5592_v37 }
 0xb58   :  { %4740 = vmatprep.subr.bf16.mxu1 %v5598_v43  ;;  %4772 = vmatprep.subr.bf16.mxu0 %v5600_v44 }
 0xb5b   :  { %4742 = vmatpush1.bf16.msra.mxu1 %v5606_v12  ;;  %4774 = vmatpush1.bf16.msra.mxu0 %v5608_v55 }
 0xb5c   :  { %4744 = vmatprep.subr.bf16.mxu1 %v5614_v47  ;;  %4776 = vmatprep.subr.bf16.mxu0 %v5616_v1 }
 0xb5f   :  { %4746 = vmatpush1.bf16.msra.mxu1 %v5622_v9  ;;  %4778 = vmatpush1.bf16.msra.mxu0 %v5624_v11 }
 0xb60   :  { %4748 = vmatprep.subr.bf16.mxu1 %v5630_v48  ;;  %4780 = vmatprep.subr.bf16.mxu0 %v5632_v16  ;;  %v3689_v48 = vld [vmem:[#allocation12] sm:$0xff]  ;;  %v3690_v16 = vld [vmem:[#allocation12 + $0x8] sm:$0xff] }
 0xb63   :  { %4750 = vmatpush1.bf16.msra.mxu1 %v5638_v58  ;;  %4782 = vmatpush1.bf16.msra.mxu0 %v5640_v25  ;;  %v4784_v58 = vpack.c.bf16 %v3690_v16, %v3689_v48  ;;  %v5183_v25 = vmov 0.0|0.0  }
 0xb64   :  { %4783 = vmatprep.subr.bf16.mxu1 %v5183_v25 }
 0xc19   :  { %v3422_v28 = vpop.f32.mrb[40].mxu1  ;;  %v3493_v30 = vpop.f32.mrb[48].mxu0 }
 0xc1a   :  { %v4819_v34 = vadd.f32 %v3422_v28, %v5695_v51  ;;  %v3424_v35 = vpop.f32.mrb[41].mxu1  ;;  %v3495_v53 = vpop.f32.mrb[49].mxu0  ;;  %v4835_v4 = vadd.f32 %v3493_v30, %v5704_v3 }
 0xc1b   :  { %v4820_v54 = vadd.f32 %v3424_v35, %v5699_v24  ;;  %v4836_v6 = vadd.f32 %v3495_v53, %v5709_v10 }
 0xc1c   :  { %v3502_v61 = vmul.f32 0.5, %v4819_v34 }
 0xc1d   :  { %v3506_v62 = vmul.f32 0.5, %v4820_v54  ;;  %v3511_v18 = vmul.f32 0.5, %v4836_v6 }
 0xc1e   :  { %4981 = vtanh.f32 %v3502_v61 }
 0xc1f   :  { %4983 = vtanh.f32 %v3506_v62 }
 0xc20   :  { %4985 = vtanh.f32 %v4835_v4 }
 0xc21   :  { %4987 = vtanh.f32 %v3511_v18 }
 0xc28   :  { %v4982_v15 = vpop.eup %4981 }
 0xc29   :  { %v4984_v23 = vpop.eup %4983  ;;  %v3504_v27 = vadd.f32 1.0, %v4982_v15 }
 0xc2a   :  { %v3508_v29 = vadd.f32 1.0, %v4984_v23  ;;  %v4986_v36 = vpop.eup %4985 }
 0xc2b   :  { %v3505_v31 = vmul.f32 0.5, %v3504_v27  ;;  %v4988_v55 = vpop.eup %4987 }
 0xc2c   :  { %v3509_v37 = vmul.f32 0.5, %v3508_v29  ;;  %v3513_v47 = vadd.f32 1.0, %v4988_v55 }
 0xc2d   :  { %v3516_v43 = vmul.f32 %v4986_v36, %v3505_v31 }
 0xc2e   :  { %v3515_v44 = vmul.f32 %v3509_v37, %v5922_v57  ;;  %v3514_v1 = vmul.f32 0.5, %v3513_v47 }
 0xc30   :  { %v5962_v12 = vadd.f32 %v3516_v43, %v3515_v44 }
 0xc32   :  { %4989 = vtanh.f32 %v5962_v12 }
 0xc3c   :  { %v4990_v9 = vpop.eup %4989 }
 0xc3d   :  { %v3519_v11 = vmul.f32 %v4990_v9, %v3514_v1 }
 0xc3f   :  { %3590 = vmatmul.mubr.f32.vlgmr.msra.gmra.mrb[42].mxu1 %v3519_v11  ;;  %3661 = vmatmul.mubr.f32.vlgmr.msra.gmra.mrb[50].mxu0 %v3519_v11 }
 0xc40   :  { %4108 = vmatprep.mubr.msk.f32.mxu1 %vm5180_vm0, %v5179_v0  ;;  %4785 = vmatpush3.bf16.msra.mxu1 %v4784_v58  ;;  %v4793_v0 = vpack.c.bf16 %v3696_v32, %v3695_v8 }
 0xc41   :  { %4786 = vmatprep.subr.bf16.mxu1 %v5183_v25 }
 0xc44   :  { %4788 = vmatpush3.bf16.msra.mxu1 %v4787_v49 }
 0xc45   :  { %4789 = vmatprep.subr.bf16.mxu1 %v5183_v25 }
 0xc48   :  { %4791 = vmatpush3.bf16.msra.mxu1 %v4790_v52 }
 0xc49   :  { %4792 = vmatprep.subr.bf16.mxu1 %v5183_v25 }
 0xc4c   :  { %4794 = vmatpush3.bf16.msra.mxu1 %v4793_v0 }
 0xc4d   :  { %4795 = vmatprep.subr.bf16.mxu1 %v5183_v25 }
 0xc50   :  { %4797 = vmatpush3.bf16.msra.mxu1 %v4796_v39 }
 0xc51   :  { %4798 = vmatprep.subr.bf16.mxu1 %v5183_v25 }
 0xc54   :  { %4800 = vmatpush3.bf16.msra.mxu1 %v4799_v7 }
 0xc55   :  { %4801 = vmatprep.subr.bf16.mxu1 %v5183_v25 }
 0xc58   :  { %4803 = vmatpush3.bf16.msra.mxu1 %v4802_v22 }
 0xc59   :  { %4804 = vmatprep.subr.bf16.mxu1 %v5183_v25 }
 0xc5c   :  { %4806 = vmatpush3.bf16.msra.mxu1 %v4805_v45 }
 0xd12   :  { %v3591_v13 = vpop.f32.mrb[42].mxu1  ;;  %v3662_v38 = vpop.f32.mrb[50].mxu0 }
 0xd13   :  { %v4821_v56 = vadd.f32 %v3591_v13, %v5695_v51  ;;  %v3593_v57 = vpop.f32.mrb[43].mxu1  ;;  %v3664_v59 = vpop.f32.mrb[51].mxu0  ;;  %v4837_v14 = vadd.f32 %v3662_v38, %v5704_v3 }
 0xd14   :  { %v4822_v19 = vadd.f32 %v3593_v57, %v5699_v24  ;;  %v4838_v28 = vadd.f32 %v3664_v59, %v5709_v10  ;;  %v3810_v10 = vld [vmem:[%s5996_s9] ss:$0 sm:$0xff] }
 0xd15   :  { %v3671_v60 = vmul.f32 0.5, %v4821_v56 }
 0xd16   :  { %v3675_v17 = vmul.f32 0.5, %v4822_v19  ;;  %v3680_v30 = vmul.f32 0.5, %v4838_v28 }
 0xd17   :  { %4991 = vtanh.f32 %v3671_v60 }
 0xd18   :  { %4993 = vtanh.f32 %v3675_v17 }
 0xd19   :  { %4995 = vtanh.f32 %v4837_v14 }
 0xd1a   :  { %4997 = vtanh.f32 %v3680_v30 }
 0xd21   :  { %v4992_v34 = vpop.eup %4991 }
 0xd22   :  { %v4994_v35 = vpop.eup %4993  ;;  %v3673_v53 = vadd.f32 1.0, %v4992_v34 }
 0xd23   :  { %v3677_v54 = vadd.f32 1.0, %v4994_v35  ;;  %v4996_v61 = vpop.eup %4995 }
 0xd24   :  { %v3674_v51 = vmul.f32 0.5, %v3673_v53  ;;  %v4998_v18 = vpop.eup %4997 }
 0xd25   :  { %v3678_v62 = vmul.f32 0.5, %v3677_v54  ;;  %v3682_v3 = vadd.f32 1.0, %v4998_v18 }
 0xd26   :  { %v3685_v4 = vmul.f32 %v4996_v61, %v3674_v51 }
 0xd27   :  { %v3684_v24 = vmul.f32 %v3678_v62, %v5962_v12  ;;  %v3683_v15 = vmul.f32 0.5, %v3682_v3 }
 0xd29   :  { %v3686_v6 = vadd.f32 %v3685_v4, %v3684_v24 }
 0xd2b   :  { %4999 = vtanh.f32 %v3686_v6 }
 0xd35   :  { %v5000_v23 = vpop.eup %4999 }
 0xd36   :  { %v3688_v27 = vmul.f32 %v5000_v23, %v3683_v15 }
 0xd38   :  { %4109 = vmatmul.mubr.f32.vlgmr.msra.gmra.mrb[44].mxu1 %v3688_v27 }
 0xe0b   :  { %v3778_v29 = vpop.f32.mrb[44].mxu1 }
 0xe0c   :  { %v3779_v31 = vadd.f32 %v3810_v10, %v3778_v29  ;;  %v4110_v36 = vpop.f32.mrb[45].mxu1 }
 0xe0e   :  { %3782 = vst [vmem:[#allocation14] sm:$0xff] %v3779_v31 }
 0xe0f   :  { %5146 = shalt.err (!%p5143_p10)
}
 0xe10   :  { %s5147_s16 = scalar_lea.hbm %s5997_s10, 128 }
 0xe11   :  { %p5148_p11 = scmp.ne.s32.totalorder %s5997_s10, %s5147_s16  ;;  %p5151_p12 = scmp.lt.u32.totalorder %s5147_s16, %s5997_s10 }
 0xe13   :  { %p5153_p13 = pnand %p5151_p12, %p5148_p11 }
 0xe15   :  { %5156 = shalt.err (!%p5153_p13)
}
 0xe16   :  { %3792 = dma.vmem_to_hbm [thread:$0]  %s3790_s30, 128, %s5997_s10, [#allocation5]  }
 0xe17   :  { %5165 = dma.done.wait [#allocation5], 128  }
 0xe18   :  { %5166 = vsyncadd [#allocation5], 4294967168 }
 0xe19   :  { %3796 = vsyncpa [#allocation4], 1 }
 0xe1a   :  { %3797 = vsyncpa [#allocation7], 1 }
 0xe1b   :  { %3798 = vsyncpa [#allocation10], 1 }
 0xe1c   :  { %3799 = vsyncpa [#allocation13], 1 }
 0xe1d   :  { %3800 = vsyncpa [#allocation5], 1 }

</bundles_post_ra>
